<compile_context>
chip_gen: v5e
topology: v5e:2x2
jax: 0.10.0
libtpu: 0.0.40
codegen_flags: <defaults>
</compile_context>

<pallas_src>
import functools

import jax
import jax.numpy as jnp
from jax.experimental import pallas as pl
from jax.experimental.pallas import tpu as pltpu

LN_EPS = 1e-5  # PyTorch nn.LayerNorm default eps


def _pick_vmem_limit():
    """Per-generation scoped-VMEM limit (review: raise on v5e/v6e, shrink on v7x)."""
    try:
        kind = jax.devices()[0].device_kind.lower()
    except Exception:  # pragma: no cover - defensive
        kind = ""
    if "v7" in kind:
        return 48 * 1024 * 1024          # 64 MiB physical -> leave headroom
    if any(v in kind for v in ("v4", "v5", "v6")):
        return 100 * 1024 * 1024         # 128 MiB physical
    return None                          # unknown chip: use compiler default


def _layernorm(x, gamma, beta):
    # x: (tokens, D) f32, gamma/beta: (1, D) f32
    mean = jnp.mean(x, axis=-1, keepdims=True)
    var = jnp.mean((x - mean) ** 2, axis=-1, keepdims=True)
    return (x - mean) * jax.lax.rsqrt(var + LN_EPS) * gamma + beta


def gpt_stack_kernel(x_ref,
                     wqkv_ref, bqkv_ref, wo_ref, bo_ref,
                     g1_ref, b1_ref,
                     wf1_ref, bf1_ref, wf2_ref, bf2_ref,
                     g2_ref, b2_ref,
                     gf_ref, bef_ref,
                     out_ref, act_ref, *, heads):
    """Fused N-layer GPT stack. grid = (batch_block, layer); residual kept in VMEM."""
    layer = pl.program_id(1)
    n_layers = pl.num_programs(1)

    # Load the embedding into the VMEM-resident residual stream at the first layer.
    @pl.when(layer == 0)
    def _():
        act_ref[...] = x_ref[...].astype(jnp.float32)

    x = act_ref[...]                                   # (bb, T, D) f32 residual stream
    bb, T, D = x.shape
    dh = D // heads

    # ---- fused QKV projection over flat tokens (one wide MXU matmul) ----
    xt = x.reshape(bb * T, D)
    qkv = jnp.dot(xt.astype(jnp.bfloat16), wqkv_ref[0],
                  preferred_element_type=jnp.float32)
    qkv = qkv + bqkv_ref[0].astype(jnp.float32)        # (bb*T, 3D) f32

    # ---- reshape-based head split (1/sqrt(dh) already folded into Wq at init) ----
    def split_heads(z):
        z = z.reshape(bb, T, heads, dh)
        z = jnp.swapaxes(z, 1, 2)                      # (bb, H, T, dh)
        return z.reshape(bb * heads, T, dh).astype(jnp.bfloat16)

    q = split_heads(qkv[:, :D])
    k = split_heads(qkv[:, D:2 * D])
    v = split_heads(qkv[:, 2 * D:])

    # ---- batched causal attention over all (batch, head) pairs at once ----
    s = jnp.einsum('bqd,bkd->bqk', q, k,
                   preferred_element_type=jnp.float32)          # (bb*H, T, T) f32
    row = jax.lax.broadcasted_iota(jnp.int32, (T, T), 0)
    col = jax.lax.broadcasted_iota(jnp.int32, (T, T), 1)
    s = jnp.where(col <= row, s, jnp.float32(-1e9))
    s = s - jnp.max(s, axis=-1, keepdims=True)
    p = jnp.exp(s)
    p = p / jnp.sum(p, axis=-1, keepdims=True)                  # exact divide
    o = jnp.einsum('bqk,bkd->bqd', p.astype(jnp.bfloat16), v,
                   preferred_element_type=jnp.float32)          # (bb*H, T, dh)

    # ---- merge heads (reshape/swapaxes, no concat loop) + output projection ----
    attn = jnp.swapaxes(o.reshape(bb, heads, T, dh), 1, 2).reshape(bb * T, D)
    attn = jnp.dot(attn.astype(jnp.bfloat16), wo_ref[0],
                   preferred_element_type=jnp.float32)
    attn = attn + bo_ref[0].astype(jnp.float32)

    # ---- block-internal residual + post-LN, then ReLU FFN + post-LN ----
    h1 = _layernorm(xt + attn, g1_ref[0], b1_ref[0])
    ff = jnp.dot(h1.astype(jnp.bfloat16), wf1_ref[0],
                 preferred_element_type=jnp.float32)
    ff = jnp.maximum(ff + bf1_ref[0].astype(jnp.float32), 0.0)
    ff = jnp.dot(ff.astype(jnp.bfloat16), wf2_ref[0],
                 preferred_element_type=jnp.float32)
    ff = ff + bf2_ref[0].astype(jnp.float32)
    y = _layernorm(h1 + ff, g2_ref[0], b2_ref[0])                # Gpt_Block(x)

    # GPT.forward:  output += block(output); output = self.norm(output)   (every layer)
    act_ref[...] = _layernorm(xt + y, gf_ref[...], bef_ref[...]).reshape(bb, T, D)

    @pl.when(layer == n_layers - 1)
    def _():
        out_ref[...] = act_ref[...].astype(out_ref.dtype)


def head_kernel(x_ref, wt_ref, b_ref, out_ref):
    """Tied projection + F.softmax(dim=1) (softmax over the SEQUENCE axis), vocab-tiled.

    The tied table arrives pre-transposed as (D, tv) so the MXU contraction needs no
    per-tile transpose; the whole batch is resident so the table streams once total.
    """
    B, T, D = x_ref.shape
    x = x_ref[...].reshape(B * T, D)                    # bf16 tokens
    logits = jnp.dot(x, wt_ref[...], preferred_element_type=jnp.float32)  # (B*T, tv)
    logits = logits + b_ref[...].astype(jnp.float32)
    logits = logits.reshape(B, T, -1)
    # full output is (B, T, V); dim=1 == the T axis -> exact under vocab tiling.
    m = jnp.max(logits, axis=1, keepdims=True)
    e = jnp.exp(logits - m)
    out_ref[...] = (e / jnp.sum(e, axis=1, keepdims=True)).astype(out_ref.dtype)


def gpt_forward(tokens, params, *, heads):
    emb = params["emb"]                                 # (V, D) bf16, tied with the head
    x0 = jnp.take(emb, tokens, axis=0)                  # (B, T, D) embedding gather (glue)
    B, T, D = x0.shape
    N = params["wqkv"].shape[0]
    d_ff = params["wf1"].shape[-1]

    # Split the batch into at most 2 blocks: weights stream once per layer per block
    # (instead of once per batch element), and v7x's two TCs each get a block.
    nb = 2 if (B % 2 == 0 and B >= 2) else 1
    bb = B // nb
    vmem_limit = _pick_vmem_limit()

    def lw(shape):  # per-layer weight spec: block indexed by the layer grid axis
        return pl.BlockSpec(shape, lambda i, n: (n, 0, 0))

    x = pl.pallas_call(
        functools.partial(gpt_stack_kernel, heads=heads),
        out_shape=jax.ShapeDtypeStruct((B, T, D), jnp.bfloat16),
        grid=(nb, N),
        in_specs=[
            pl.BlockSpec((bb, T, D), lambda i, n: (i, 0, 0)),       # x0 (layer-invariant)
            lw((1, D, 3 * D)), lw((1, 1, 3 * D)),                   # wqkv, bqkv
            lw((1, D, D)), lw((1, 1, D)),                           # wo, bo
            lw((1, 1, D)), lw((1, 1, D)),                           # g1, b1
            lw((1, D, d_ff)), lw((1, 1, d_ff)),                     # wf1, bf1
            lw((1, d_ff, D)), lw((1, 1, D)),                        # wf2, bf2
            lw((1, 1, D)), lw((1, 1, D)),                           # g2, b2
            pl.BlockSpec((1, D), lambda i, n: (0, 0)),              # shared final LN gamma
            pl.BlockSpec((1, D), lambda i, n: (0, 0)),              # shared final LN beta
        ],
        out_specs=pl.BlockSpec((bb, T, D), lambda i, n: (i, 0, 0)),
        scratch_shapes=[pltpu.VMEM((bb, T, D), jnp.float32)],       # resident residual
        compiler_params=pltpu.CompilerParams(
            dimension_semantics=("parallel", "arbitrary"),
            vmem_limit_bytes=vmem_limit),
    )(x0,
      params["wqkv"], params["bqkv"], params["wo"], params["bo"],
      params["g1"], params["b1"],
      params["wf1"], params["bf1"], params["wf2"], params["bf2"],
      params["g2"], params["b2"],
      params["norm_g"], params["norm_b"])

    # Tied output head: table pre-transposed once to (D, V), streamed once (grid over V),
    # whole batch resident, bf16 probs writeback.
    V = emb.shape[0]
    emb_t = jnp.transpose(emb)                          # (D, V) one-time glue transpose
    tv = 256 if V % 256 == 0 else (128 if V % 128 == 0 else V)
    assert V % tv == 0
    out = pl.pallas_call(
        head_kernel,
        out_shape=jax.ShapeDtypeStruct((B, T, V), jnp.bfloat16),
        grid=(V // tv,),
        in_specs=[
            pl.BlockSpec((B, T, D), lambda vj: (0, 0, 0)),          # activations, resident
            pl.BlockSpec((D, tv), lambda vj: (0, vj)),              # pre-transposed table
            pl.BlockSpec((1, tv), lambda vj: (0, vj)),              # bias tile
        ],
        out_specs=pl.BlockSpec((B, T, tv), lambda vj: (0, 0, vj)),  # lane-dense output
        compiler_params=pltpu.CompilerParams(
            dimension_semantics=("parallel",),
            vmem_limit_bytes=vmem_limit),
    )(x, emb_t, params["probs_b"])
    return out


def init_params(key, vocab_size, d_model, heads, N):
    d_ff = 4 * d_model
    dh = d_model // heads
    ks = jax.random.split(key, 5)

    def nrm(k, shape, scale=0.02):
        return scale * jax.random.normal(k, shape, dtype=jnp.float32)

    # Fold the 1/sqrt(dh) attention scale into the Wq slice of the fused QKV weight.
    wqkv = nrm(ks[1], (N, d_model, 3 * d_model))
    wqkv = wqkv.at[:, :, :d_model].multiply(1.0 / float(dh) ** 0.5)

    return dict(
        emb=nrm(ks[0], (vocab_size, d_model)).astype(jnp.bfloat16),  # tied embedding/head
        probs_b=jnp.zeros((1, vocab_size), jnp.float32),
        norm_g=jnp.ones((1, d_model), jnp.float32),
        norm_b=jnp.zeros((1, d_model), jnp.float32),
        # per-layer weights stacked on a leading layer axis (streamed by BlockSpec)
        wqkv=wqkv.astype(jnp.bfloat16),
        bqkv=jnp.zeros((N, 1, 3 * d_model), jnp.bfloat16),
        wo=nrm(ks[2], (N, d_model, d_model)).astype(jnp.bfloat16),
        bo=jnp.zeros((N, 1, d_model), jnp.bfloat16),
        g1=jnp.ones((N, 1, d_model), jnp.float32),
        b1=jnp.zeros((N, 1, d_model), jnp.float32),
        wf1=nrm(ks[3], (N, d_model, d_ff)).astype(jnp.bfloat16),
        bf1=jnp.zeros((N, 1, d_ff), jnp.bfloat16),
        wf2=nrm(ks[4], (N, d_ff, d_model)).astype(jnp.bfloat16),
        bf2=jnp.zeros((N, 1, d_model), jnp.bfloat16),
        g2=jnp.ones((N, 1, d_model), jnp.float32),
        b2=jnp.zeros((N, 1, d_model), jnp.float32),
    )


if __name__ == "__main__":
    # small shapes, but aligned to TPU (8, 128) tiling; dh = 128 (MXU-friendly head dim)
    vocab_size = 512
    d_model = 256
    heads = 2
    N = 2
    B, T = 2, 16
    assert d_model % heads == 0

    key = jax.random.PRNGKey(0)
    kp, kt = jax.random.split(key)
    params = init_params(kp, vocab_size, d_model, heads, N)
    tokens = jax.random.randint(kt, (B, T), 0, vocab_size, dtype=jnp.int32)

    fwd = jax.jit(functools.partial(gpt_forward, heads=heads))
    out = fwd(tokens, params)
    out = jax.block_until_ready(out)
    assert out.shape == (B, T, vocab_size)
    assert bool(jnp.all(jnp.isfinite(out.astype(jnp.float32))))
    print("KERNEL_OK")
</pallas_src>

<mosaic_0001>
module attributes {stable_mosaic.version = 11 : i64} {
  func.func @gpt_stack_kernel(%arg0: i32, %arg1: i32, %arg2: memref<1x16x256xbf16, #tpu.memory_space<vmem>>, %arg3: memref<1x256x768xbf16, #tpu.memory_space<vmem>>, %arg4: memref<1x1x768xbf16, #tpu.memory_space<vmem>>, %arg5: memref<1x256x256xbf16, #tpu.memory_space<vmem>>, %arg6: memref<1x1x256xbf16, #tpu.memory_space<vmem>>, %arg7: memref<1x1x256xf32, #tpu.memory_space<vmem>>, %arg8: memref<1x1x256xf32, #tpu.memory_space<vmem>>, %arg9: memref<1x256x1024xbf16, #tpu.memory_space<vmem>>, %arg10: memref<1x1x1024xbf16, #tpu.memory_space<vmem>>, %arg11: memref<1x1024x256xbf16, #tpu.memory_space<vmem>>, %arg12: memref<1x1x256xbf16, #tpu.memory_space<vmem>>, %arg13: memref<1x1x256xf32, #tpu.memory_space<vmem>>, %arg14: memref<1x1x256xf32, #tpu.memory_space<vmem>>, %arg15: memref<1x256xf32, #tpu.memory_space<vmem>>, %arg16: memref<1x256xf32, #tpu.memory_space<vmem>>, %arg17: memref<1x16x256xbf16, #tpu.memory_space<vmem>>, %arg18: memref<1x16x256xf32, #tpu.memory_space<vmem>>) attributes {dimension_semantics = [#tpu.dimension_semantics<parallel>, #tpu.dimension_semantics<arbitrary>], iteration_bounds = array<i64: 2, 2>, scalar_prefetch = 0 : i64, scratch_operands = 1 : i64, tpu.core_type = #tpu.core_type<tc>, window_params = [{transform_indices = @transform_0, window_bounds = array<i64: 1, 16, 256>}, {transform_indices = @transform_1, window_bounds = array<i64: 1, 256, 768>}, {transform_indices = @transform_2, window_bounds = array<i64: 1, 1, 768>}, {transform_indices = @transform_3, window_bounds = array<i64: 1, 256, 256>}, {transform_indices = @transform_4, window_bounds = array<i64: 1, 1, 256>}, {transform_indices = @transform_5, window_bounds = array<i64: 1, 1, 256>}, {transform_indices = @transform_6, window_bounds = array<i64: 1, 1, 256>}, {transform_indices = @transform_7, window_bounds = array<i64: 1, 256, 1024>}, {transform_indices = @transform_8, window_bounds = array<i64: 1, 1, 1024>}, {transform_indices = @transform_9, window_bounds = array<i64: 1, 1024, 256>}, {transform_indices = @transform_10, window_bounds = array<i64: 1, 1, 256>}, {transform_indices = @transform_11, window_bounds = array<i64: 1, 1, 256>}, {transform_indices = @transform_12, window_bounds = array<i64: 1, 1, 256>}, {pipeline_mode = #tpu.pipeline_mode<synchronous>, transform_indices = @transform_13, window_bounds = array<i64: 1, 256>}, {pipeline_mode = #tpu.pipeline_mode<synchronous>, transform_indices = @transform_14, window_bounds = array<i64: 1, 256>}, {transform_indices = @transform_15, window_bounds = array<i64: 1, 16, 256>}]} {
    %c0_i32 = arith.constant 0 : i32
    %0 = arith.cmpi eq, %arg1, %c0_i32 : i32
    %1 = arith.extui %0 : i1 to i32
    %c0_i32_0 = arith.constant 0 : i32
    %2 = arith.cmpi ne, %1, %c0_i32_0 : i32
    scf.if %2 {
      %c0_71 = arith.constant 0 : index
      %c0_72 = arith.constant 0 : index
      %c0_73 = arith.constant 0 : index
      %164 = vector.load %arg2[%c0_71, %c0_72, %c0_73] : memref<1x16x256xbf16, #tpu.memory_space<vmem>>, vector<1x16x256xbf16>
      %165 = arith.extf %164 : vector<1x16x256xbf16> to vector<1x16x256xf32>
      %c0_74 = arith.constant 0 : index
      %c0_75 = arith.constant 0 : index
      %c0_76 = arith.constant 0 : index
      %166 = vector.load %arg18[%c0_74, %c0_75, %c0_76] : memref<1x16x256xf32, #tpu.memory_space<vmem>>, vector<1x16x256xf32>
      tpu.vector_store %arg18[%c0_74, %c0_75, %c0_76], %165 {strides = array<i32>} : memref<1x16x256xf32, #tpu.memory_space<vmem>>, vector<1x16x256xf32>,
    } else {
    }
    %c0 = arith.constant 0 : index
    %c0_1 = arith.constant 0 : index
    %c0_2 = arith.constant 0 : index
    %3 = vector.load %arg18[%c0, %c0_1, %c0_2] : memref<1x16x256xf32, #tpu.memory_space<vmem>>, vector<1x16x256xf32>
    %4 = vector.shape_cast %3 : vector<1x16x256xf32> to vector<16x256xf32>
    %5 = arith.truncf %4 : vector<16x256xf32> to vector<16x256xbf16>
    %c0_3 = arith.constant 0 : index
    %c0_4 = arith.constant 0 : index
    %c0_5 = arith.constant 0 : index
    %6 = vector.load %arg3[%c0_3, %c0_4, %c0_5] : memref<1x256x768xbf16, #tpu.memory_space<vmem>>, vector<1x256x768xbf16>
    %7 = vector.shape_cast %6 : vector<1x256x768xbf16> to vector<256x768xbf16>
    %cst = arith.constant dense<0.000000e+00> : vector<16x768xf32>
    %8 = tpu.matmul %5, %7, %cst {dimension_numbers = #tpu.dot_dimension_numbers<[1], [0], [0], [1], [0, 0, 1, 1], [], []>} : vector<16x256xbf16>, vector<256x768xbf16>, vector<16x768xf32> -> vector<16x768xf32>
    %c0_6 = arith.constant 0 : index
    %c0_7 = arith.constant 0 : index
    %c0_8 = arith.constant 0 : index
    %9 = vector.load %arg4[%c0_6, %c0_7, %c0_8] : memref<1x1x768xbf16, #tpu.memory_space<vmem>>, vector<1x1x768xbf16>
    %10 = vector.shape_cast %9 : vector<1x1x768xbf16> to vector<1x768xbf16>
    %11 = arith.extf %10 : vector<1x768xbf16> to vector<1x768xf32>
    %12 = vector.broadcast %11 : vector<1x768xf32> to vector<16x768xf32>
    %13 = arith.addf %8, %12 : vector<16x768xf32>
    %14 = vector.extract_strided_slice %13 {offsets = [0, 0], sizes = [16, 256], strides = [1, 1]} : vector<16x768xf32> to vector<16x256xf32>
    %15 = vector.shape_cast %14 : vector<16x256xf32> to vector<1x16x2x128xf32>
    %16 = tpu.transpose %15, [0, 2, 1, 3] : vector<1x16x2x128xf32> -> vector<1x2x16x128xf32>
    %17 = vector.shape_cast %16 : vector<1x2x16x128xf32> to vector<2x16x128xf32>
    %18 = arith.truncf %17 : vector<2x16x128xf32> to vector<2x16x128xbf16>
    %19 = vector.extract_strided_slice %13 {offsets = [0, 256], sizes = [16, 256], strides = [1, 1]} : vector<16x768xf32> to vector<16x256xf32>
    %20 = vector.shape_cast %19 : vector<16x256xf32> to vector<1x16x2x128xf32>
    %21 = tpu.transpose %20, [0, 2, 1, 3] : vector<1x16x2x128xf32> -> vector<1x2x16x128xf32>
    %22 = vector.shape_cast %21 : vector<1x2x16x128xf32> to vector<2x16x128xf32>
    %23 = arith.truncf %22 : vector<2x16x128xf32> to vector<2x16x128xbf16>
    %24 = vector.extract_strided_slice %13 {offsets = [0, 512], sizes = [16, 256], strides = [1, 1]} : vector<16x768xf32> to vector<16x256xf32>
    %25 = vector.shape_cast %24 : vector<16x256xf32> to vector<1x16x2x128xf32>
    %26 = tpu.transpose %25, [0, 2, 1, 3] : vector<1x16x2x128xf32> -> vector<1x2x16x128xf32>
    %27 = vector.shape_cast %26 : vector<1x2x16x128xf32> to vector<2x16x128xf32>
    %28 = arith.truncf %27 : vector<2x16x128xf32> to vector<2x16x128xbf16>
    "tpu.trace_start"() <{level = 10 : i32, message = "bqd,bkd->bqk"}> : () -> ()
    %cst_9 = arith.constant dense<0.000000e+00> : vector<2x16x16xf32>
    %29 = tpu.matmul %18, %23, %cst_9 {dimension_numbers = #tpu.dot_dimension_numbers<[2], [2], [1], [1], [0, 0, 0, 1, 1, 1], [0], [0]>} : vector<2x16x128xbf16>, vector<2x16x128xbf16>, vector<2x16x16xf32> -> vector<2x16x16xf32>
    "tpu.trace_stop"() : () -> ()
    %30 = tpu.iota {dimensions = array<i32: 0>} : vector<16x16xi32>
    %31 = tpu.iota {dimensions = array<i32: 1>} : vector<16x16xi32>
    %32 = arith.cmpi sle, %31, %30 : vector<16x16xi32>
    %cst_10 = arith.constant -1.000000e+09 : f32
    %33 = vector.shape_cast %32 : vector<16x16xi1> to vector<1x16x16xi1>
    %34 = vector.broadcast %33 : vector<1x16x16xi1> to vector<2x16x16xi1>
    %35 = vector.broadcast %cst_10 : f32 to vector<2x16x16xf32>
    %36 = arith.select %34, %29, %35 : vector<2x16x16xi1>, vector<2x16x16xf32>
    %cst_11 = arith.constant dense<0xFF800000> : vector<2x16xf32>
    %37 = vector.multi_reduction <maximumf>, %36, %cst_11 [2] : vector<2x16x16xf32> to vector<2x16xf32>
    %38 = vector.shape_cast %37 : vector<2x16xf32> to vector<2x16x1xf32>
    %39 = vector.broadcast %38 : vector<2x16x1xf32> to vector<2x16x16xf32>
    %40 = arith.subf %36, %39 : vector<2x16x16xf32>
    %41 = math.exp %40 : vector<2x16x16xf32>
    %cst_12 = arith.constant dense<0.000000e+00> : vector<2x16xf32>
    %42 = vector.multi_reduction <add>, %41, %cst_12 [2] : vector<2x16x16xf32> to vector<2x16xf32>
    %43 = vector.shape_cast %42 : vector<2x16xf32> to vector<2x16x1xf32>
    %44 = vector.broadcast %43 : vector<2x16x1xf32> to vector<2x16x16xf32>
    %45 = arith.divf %41, %44 : vector<2x16x16xf32>
    %46 = arith.truncf %45 : vector<2x16x16xf32> to vector<2x16x16xbf16>
    "tpu.trace_start"() <{level = 10 : i32, message = "bqk,bkd->bqd"}> : () -> ()
    %cst_13 = arith.constant dense<0.000000e+00> : vector<2x16x128xf32>
    %47 = tpu.matmul %46, %28, %cst_13 {dimension_numbers = #tpu.dot_dimension_numbers<[2], [1], [1], [2], [0, 0, 0, 1, 1, 2], [0], [0]>} : vector<2x16x16xbf16>, vector<2x16x128xbf16>, vector<2x16x128xf32> -> vector<2x16x128xf32>
    "tpu.trace_stop"() : () -> ()
    %48 = vector.shape_cast %47 : vector<2x16x128xf32> to vector<1x2x16x128xf32>
    %49 = tpu.transpose %48, [0, 2, 1, 3] : vector<1x2x16x128xf32> -> vector<1x16x2x128xf32>
    %50 = vector.shape_cast %49 : vector<1x16x2x128xf32> to vector<16x256xf32>
    %51 = arith.truncf %50 : vector<16x256xf32> to vector<16x256xbf16>
    %c0_14 = arith.constant 0 : index
    %c0_15 = arith.constant 0 : index
    %c0_16 = arith.constant 0 : index
    %52 = vector.load %arg5[%c0_14, %c0_15, %c0_16] : memref<1x256x256xbf16, #tpu.memory_space<vmem>>, vector<1x256x256xbf16>
    %53 = vector.shape_cast %52 : vector<1x256x256xbf16> to vector<256x256xbf16>
    %cst_17 = arith.constant dense<0.000000e+00> : vector<16x256xf32>
    %54 = tpu.matmul %51, %53, %cst_17 {dimension_numbers = #tpu.dot_dimension_numbers<[1], [0], [0], [1], [0, 0, 1, 1], [], []>} : vector<16x256xbf16>, vector<256x256xbf16>, vector<16x256xf32> -> vector<16x256xf32>
    %c0_18 = arith.constant 0 : index
    %c0_19 = arith.constant 0 : index
    %c0_20 = arith.constant 0 : index
    %55 = vector.load %arg6[%c0_18, %c0_19, %c0_20] : memref<1x1x256xbf16, #tpu.memory_space<vmem>>, vector<1x1x256xbf16>
    %56 = vector.shape_cast %55 : vector<1x1x256xbf16> to vector<1x256xbf16>
    %57 = arith.extf %56 : vector<1x256xbf16> to vector<1x256xf32>
    %58 = vector.broadcast %57 : vector<1x256xf32> to vector<16x256xf32>
    %59 = arith.addf %54, %58 : vector<16x256xf32>
    %60 = arith.addf %4, %59 : vector<16x256xf32>
    %c0_21 = arith.constant 0 : index
    %c0_22 = arith.constant 0 : index
    %c0_23 = arith.constant 0 : index
    %61 = vector.load %arg7[%c0_21, %c0_22, %c0_23] : memref<1x1x256xf32, #tpu.memory_space<vmem>>, vector<1x1x256xf32>
    %62 = vector.shape_cast %61 : vector<1x1x256xf32> to vector<1x256xf32>
    %c0_24 = arith.constant 0 : index
    %c0_25 = arith.constant 0 : index
    %c0_26 = arith.constant 0 : index
    %63 = vector.load %arg8[%c0_24, %c0_25, %c0_26] : memref<1x1x256xf32, #tpu.memory_space<vmem>>, vector<1x1x256xf32>
    %64 = vector.shape_cast %63 : vector<1x1x256xf32> to vector<1x256xf32>
    %cst_27 = arith.constant dense<0.000000e+00> : vector<16xf32>
    %65 = vector.multi_reduction <add>, %60, %cst_27 [1] : vector<16x256xf32> to vector<16xf32>
    %66 = vector.shape_cast %65 : vector<16xf32> to vector<16x1xf32>
    %cst_28 = arith.constant 2.560000e+02 : f32
    %67 = vector.broadcast %cst_28 : f32 to vector<16x1xf32>
    %68 = arith.divf %66, %67 : vector<16x1xf32>
    %69 = vector.broadcast %68 : vector<16x1xf32> to vector<16x256xf32>
    %70 = arith.subf %60, %69 : vector<16x256xf32>
    %71 = arith.mulf %70, %70 : vector<16x256xf32>
    %cst_29 = arith.constant dense<0.000000e+00> : vector<16xf32>
    %72 = vector.multi_reduction <add>, %71, %cst_29 [1] : vector<16x256xf32> to vector<16xf32>
    %73 = vector.shape_cast %72 : vector<16xf32> to vector<16x1xf32>
    %cst_30 = arith.constant 2.560000e+02 : f32
    %74 = vector.broadcast %cst_30 : f32 to vector<16x1xf32>
    %75 = arith.divf %73, %74 : vector<16x1xf32>
    %76 = vector.broadcast %68 : vector<16x1xf32> to vector<16x256xf32>
    %77 = arith.subf %60, %76 : vector<16x256xf32>
    %cst_31 = arith.constant 9.99999974E-6 : f32
    %78 = vector.broadcast %cst_31 : f32 to vector<16x1xf32>
    %79 = arith.addf %75, %78 : vector<16x1xf32>
    %80 = math.rsqrt %79 : vector<16x1xf32>
    %81 = vector.broadcast %80 : vector<16x1xf32> to vector<16x256xf32>
    %82 = arith.mulf %77, %81 : vector<16x256xf32>
    %83 = vector.broadcast %62 : vector<1x256xf32> to vector<16x256xf32>
    %84 = arith.mulf %82, %83 : vector<16x256xf32>
    %85 = vector.broadcast %64 : vector<1x256xf32> to vector<16x256xf32>
    %86 = arith.addf %84, %85 : vector<16x256xf32>
    %87 = arith.truncf %86 : vector<16x256xf32> to vector<16x256xbf16>
    %c0_32 = arith.constant 0 : index
    %c0_33 = arith.constant 0 : index
    %c0_34 = arith.constant 0 : index
    %88 = vector.load %arg9[%c0_32, %c0_33, %c0_34] : memref<1x256x1024xbf16, #tpu.memory_space<vmem>>, vector<1x256x1024xbf16>
    %89 = vector.shape_cast %88 : vector<1x256x1024xbf16> to vector<256x1024xbf16>
    %cst_35 = arith.constant dense<0.000000e+00> : vector<16x1024xf32>
    %90 = tpu.matmul %87, %89, %cst_35 {dimension_numbers = #tpu.dot_dimension_numbers<[1], [0], [0], [1], [0, 0, 1, 1], [], []>} : vector<16x256xbf16>, vector<256x1024xbf16>, vector<16x1024xf32> -> vector<16x1024xf32>
    %c0_36 = arith.constant 0 : index
    %c0_37 = arith.constant 0 : index
    %c0_38 = arith.constant 0 : index
    %91 = vector.load %arg10[%c0_36, %c0_37, %c0_38] : memref<1x1x1024xbf16, #tpu.memory_space<vmem>>, vector<1x1x1024xbf16>
    %92 = vector.shape_cast %91 : vector<1x1x1024xbf16> to vector<1x1024xbf16>
    %93 = arith.extf %92 : vector<1x1024xbf16> to vector<1x1024xf32>
    %94 = vector.broadcast %93 : vector<1x1024xf32> to vector<16x1024xf32>
    %95 = arith.addf %90, %94 : vector<16x1024xf32>
    %cst_39 = arith.constant 0.000000e+00 : f32
    %96 = vector.broadcast %cst_39 : f32 to vector<16x1024xf32>
    %97 = arith.maximumf %95, %96 : vector<16x1024xf32>
    %98 = arith.truncf %97 : vector<16x1024xf32> to vector<16x1024xbf16>
    %c0_40 = arith.constant 0 : index
    %c0_41 = arith.constant 0 : index
    %c0_42 = arith.constant 0 : index
    %99 = vector.load %arg11[%c0_40, %c0_41, %c0_42] : memref<1x1024x256xbf16, #tpu.memory_space<vmem>>, vector<1x1024x256xbf16>
    %100 = vector.shape_cast %99 : vector<1x1024x256xbf16> to vector<1024x256xbf16>
    %cst_43 = arith.constant dense<0.000000e+00> : vector<16x256xf32>
    %101 = tpu.matmul %98, %100, %cst_43 {dimension_numbers = #tpu.dot_dimension_numbers<[1], [0], [0], [1], [0, 0, 1, 1], [], []>} : vector<16x1024xbf16>, vector<1024x256xbf16>, vector<16x256xf32> -> vector<16x256xf32>
    %c0_44 = arith.constant 0 : index
    %c0_45 = arith.constant 0 : index
    %c0_46 = arith.constant 0 : index
    %102 = vector.load %arg12[%c0_44, %c0_45, %c0_46] : memref<1x1x256xbf16, #tpu.memory_space<vmem>>, vector<1x1x256xbf16>
    %103 = vector.shape_cast %102 : vector<1x1x256xbf16> to vector<1x256xbf16>
    %104 = arith.extf %103 : vector<1x256xbf16> to vector<1x256xf32>
    %105 = vector.broadcast %104 : vector<1x256xf32> to vector<16x256xf32>
    %106 = arith.addf %101, %105 : vector<16x256xf32>
    %107 = arith.addf %86, %106 : vector<16x256xf32>
    %c0_47 = arith.constant 0 : index
    %c0_48 = arith.constant 0 : index
    %c0_49 = arith.constant 0 : index
    %108 = vector.load %arg13[%c0_47, %c0_48, %c0_49] : memref<1x1x256xf32, #tpu.memory_space<vmem>>, vector<1x1x256xf32>
    %109 = vector.shape_cast %108 : vector<1x1x256xf32> to vector<1x256xf32>
    %c0_50 = arith.constant 0 : index
    %c0_51 = arith.constant 0 : index
    %c0_52 = arith.constant 0 : index
    %110 = vector.load %arg14[%c0_50, %c0_51, %c0_52] : memref<1x1x256xf32, #tpu.memory_space<vmem>>, vector<1x1x256xf32>
    %111 = vector.shape_cast %110 : vector<1x1x256xf32> to vector<1x256xf32>
    %cst_53 = arith.constant dense<0.000000e+00> : vector<16xf32>
    %112 = vector.multi_reduction <add>, %107, %cst_53 [1] : vector<16x256xf32> to vector<16xf32>
    %113 = vector.shape_cast %112 : vector<16xf32> to vector<16x1xf32>
    %cst_54 = arith.constant 2.560000e+02 : f32
    %114 = vector.broadcast %cst_54 : f32 to vector<16x1xf32>
    %115 = arith.divf %113, %114 : vector<16x1xf32>
    %116 = vector.broadcast %115 : vector<16x1xf32> to vector<16x256xf32>
    %117 = arith.subf %107, %116 : vector<16x256xf32>
    %118 = arith.mulf %117, %117 : vector<16x256xf32>
    %cst_55 = arith.constant dense<0.000000e+00> : vector<16xf32>
    %119 = vector.multi_reduction <add>, %118, %cst_55 [1] : vector<16x256xf32> to vector<16xf32>
    %120 = vector.shape_cast %119 : vector<16xf32> to vector<16x1xf32>
    %cst_56 = arith.constant 2.560000e+02 : f32
    %121 = vector.broadcast %cst_56 : f32 to vector<16x1xf32>
    %122 = arith.divf %120, %121 : vector<16x1xf32>
    %123 = vector.broadcast %115 : vector<16x1xf32> to vector<16x256xf32>
    %124 = arith.subf %107, %123 : vector<16x256xf32>
    %cst_57 = arith.constant 9.99999974E-6 : f32
    %125 = vector.broadcast %cst_57 : f32 to vector<16x1xf32>
    %126 = arith.addf %122, %125 : vector<16x1xf32>
    %127 = math.rsqrt %126 : vector<16x1xf32>
    %128 = vector.broadcast %127 : vector<16x1xf32> to vector<16x256xf32>
    %129 = arith.mulf %124, %128 : vector<16x256xf32>
    %130 = vector.broadcast %109 : vector<1x256xf32> to vector<16x256xf32>
    %131 = arith.mulf %129, %130 : vector<16x256xf32>
    %132 = vector.broadcast %111 : vector<1x256xf32> to vector<16x256xf32>
    %133 = arith.addf %131, %132 : vector<16x256xf32>
    %134 = arith.addf %4, %133 : vector<16x256xf32>
    %c0_58 = arith.constant 0 : index
    %c0_59 = arith.constant 0 : index
    %135 = vector.load %arg15[%c0_58, %c0_59] : memref<1x256xf32, #tpu.memory_space<vmem>>, vector<1x256xf32>
    %c0_60 = arith.constant 0 : index
    %c0_61 = arith.constant 0 : index
    %136 = vector.load %arg16[%c0_60, %c0_61] : memref<1x256xf32, #tpu.memory_space<vmem>>, vector<1x256xf32>
    %cst_62 = arith.constant dense<0.000000e+00> : vector<16xf32>
    %137 = vector.multi_reduction <add>, %134, %cst_62 [1] : vector<16x256xf32> to vector<16xf32>
    %138 = vector.shape_cast %137 : vector<16xf32> to vector<16x1xf32>
    %cst_63 = arith.constant 2.560000e+02 : f32
    %139 = vector.broadcast %cst_63 : f32 to vector<16x1xf32>
    %140 = arith.divf %138, %139 : vector<16x1xf32>
    %141 = vector.broadcast %140 : vector<16x1xf32> to vector<16x256xf32>
    %142 = arith.subf %134, %141 : vector<16x256xf32>
    %143 = arith.mulf %142, %142 : vector<16x256xf32>
    %cst_64 = arith.constant dense<0.000000e+00> : vector<16xf32>
    %144 = vector.multi_reduction <add>, %143, %cst_64 [1] : vector<16x256xf32> to vector<16xf32>
    %145 = vector.shape_cast %144 : vector<16xf32> to vector<16x1xf32>
    %cst_65 = arith.constant 2.560000e+02 : f32
    %146 = vector.broadcast %cst_65 : f32 to vector<16x1xf32>
    %147 = arith.divf %145, %146 : vector<16x1xf32>
    %148 = vector.broadcast %140 : vector<16x1xf32> to vector<16x256xf32>
    %149 = arith.subf %134, %148 : vector<16x256xf32>
    %cst_66 = arith.constant 9.99999974E-6 : f32
    %150 = vector.broadcast %cst_66 : f32 to vector<16x1xf32>
    %151 = arith.addf %147, %150 : vector<16x1xf32>
    %152 = math.rsqrt %151 : vector<16x1xf32>
    %153 = vector.broadcast %152 : vector<16x1xf32> to vector<16x256xf32>
    %154 = arith.mulf %149, %153 : vector<16x256xf32>
    %155 = vector.broadcast %135 : vector<1x256xf32> to vector<16x256xf32>
    %156 = arith.mulf %154, %155 : vector<16x256xf32>
    %157 = vector.broadcast %136 : vector<1x256xf32> to vector<16x256xf32>
    %158 = arith.addf %156, %157 : vector<16x256xf32>
    %159 = vector.shape_cast %158 : vector<16x256xf32> to vector<1x16x256xf32>
    %c0_67 = arith.constant 0 : index
    %c0_68 = arith.constant 0 : index
    %c0_69 = arith.constant 0 : index
    %160 = vector.load %arg18[%c0_67, %c0_68, %c0_69] : memref<1x16x256xf32, #tpu.memory_space<vmem>>, vector<1x16x256xf32>
    tpu.vector_store %arg18[%c0_67, %c0_68, %c0_69], %159 {strides = array<i32>} : memref<1x16x256xf32, #tpu.memory_space<vmem>>, vector<1x16x256xf32>,
    %c1_i32 = arith.constant 1 : i32
    %161 = arith.cmpi eq, %arg1, %c1_i32 : i32
    %162 = arith.extui %161 : i1 to i32
    %c0_i32_70 = arith.constant 0 : i32
    %163 = arith.cmpi ne, %162, %c0_i32_70 : i32
    scf.if %163 {
      %c0_71 = arith.constant 0 : index
      %c0_72 = arith.constant 0 : index
      %c0_73 = arith.constant 0 : index
      %164 = vector.load %arg18[%c0_71, %c0_72, %c0_73] : memref<1x16x256xf32, #tpu.memory_space<vmem>>, vector<1x16x256xf32>
      %165 = arith.truncf %164 : vector<1x16x256xf32> to vector<1x16x256xbf16>
      %c0_74 = arith.constant 0 : index
      %c0_75 = arith.constant 0 : index
      %c0_76 = arith.constant 0 : index
      %166 = vector.load %arg17[%c0_74, %c0_75, %c0_76] : memref<1x16x256xbf16, #tpu.memory_space<vmem>>, vector<1x16x256xbf16>
      tpu.vector_store %arg17[%c0_74, %c0_75, %c0_76], %165 {strides = array<i32>} : memref<1x16x256xbf16, #tpu.memory_space<vmem>>, vector<1x16x256xbf16>,
    } else {
    }
    return
  }
  func.func @transform_0(%arg0: i32, %arg1: i32) -> (i32, i32, i32) {
    %c0_i32 = arith.constant 0 : i32
    %c0_i32_0 = arith.constant 0 : i32
    %c0_i32_1 = arith.constant 0 : i32
    return %arg0, %c0_i32, %c0_i32_0 : i32, i32, i32
  }
  func.func @transform_1(%arg0: i32, %arg1: i32) -> (i32, i32, i32) {
    %c0_i32 = arith.constant 0 : i32
    %c0_i32_0 = arith.constant 0 : i32
    %c0_i32_1 = arith.constant 0 : i32
    return %arg1, %c0_i32, %c0_i32_0 : i32, i32, i32
  }
  func.func @transform_2(%arg0: i32, %arg1: i32) -> (i32, i32, i32) {
    %c0_i32 = arith.constant 0 : i32
    %c0_i32_0 = arith.constant 0 : i32
    %c0_i32_1 = arith.constant 0 : i32
    return %arg1, %c0_i32, %c0_i32_0 : i32, i32, i32
  }
  func.func @transform_3(%arg0: i32, %arg1: i32) -> (i32, i32, i32) {
    %c0_i32 = arith.constant 0 : i32
    %c0_i32_0 = arith.constant 0 : i32
    %c0_i32_1 = arith.constant 0 : i32
    return %arg1, %c0_i32, %c0_i32_0 : i32, i32, i32
  }
  func.func @transform_4(%arg0: i32, %arg1: i32) -> (i32, i32, i32) {
    %c0_i32 = arith.constant 0 : i32
    %c0_i32_0 = arith.constant 0 : i32
    %c0_i32_1 = arith.constant 0 : i32
    return %arg1, %c0_i32, %c0_i32_0 : i32, i32, i32
  }
  func.func @transform_5(%arg0: i32, %arg1: i32) -> (i32, i32, i32) {
    %c0_i32 = arith.constant 0 : i32
    %c0_i32_0 = arith.constant 0 : i32
    %c0_i32_1 = arith.constant 0 : i32
    return %arg1, %c0_i32, %c0_i32_0 : i32, i32, i32
  }
  func.func @transform_6(%arg0: i32, %arg1: i32) -> (i32, i32, i32) {
    %c0_i32 = arith.constant 0 : i32
    %c0_i32_0 = arith.constant 0 : i32
    %c0_i32_1 = arith.constant 0 : i32
    return %arg1, %c0_i32, %c0_i32_0 : i32, i32, i32
  }
  func.func @transform_7(%arg0: i32, %arg1: i32) -> (i32, i32, i32) {
    %c0_i32 = arith.constant 0 : i32
    %c0_i32_0 = arith.constant 0 : i32
    %c0_i32_1 = arith.constant 0 : i32
    return %arg1, %c0_i32, %c0_i32_0 : i32, i32, i32
  }
  func.func @transform_8(%arg0: i32, %arg1: i32) -> (i32, i32, i32) {
    %c0_i32 = arith.constant 0 : i32
    %c0_i32_0 = arith.constant 0 : i32
    %c0_i32_1 = arith.constant 0 : i32
    return %arg1, %c0_i32, %c0_i32_0 : i32, i32, i32
  }
  func.func @transform_9(%arg0: i32, %arg1: i32) -> (i32, i32, i32) {
    %c0_i32 = arith.constant 0 : i32
    %c0_i32_0 = arith.constant 0 : i32
    %c0_i32_1 = arith.constant 0 : i32
    return %arg1, %c0_i32, %c0_i32_0 : i32, i32, i32
  }
  func.func @transform_10(%arg0: i32, %arg1: i32) -> (i32, i32, i32) {
    %c0_i32 = arith.constant 0 : i32
    %c0_i32_0 = arith.constant 0 : i32
    %c0_i32_1 = arith.constant 0 : i32
    return %arg1, %c0_i32, %c0_i32_0 : i32, i32, i32
  }
  func.func @transform_11(%arg0: i32, %arg1: i32) -> (i32, i32, i32) {
    %c0_i32 = arith.constant 0 : i32
    %c0_i32_0 = arith.constant 0 : i32
    %c0_i32_1 = arith.constant 0 : i32
    return %arg1, %c0_i32, %c0_i32_0 : i32, i32, i32
  }
  func.func @transform_12(%arg0: i32, %arg1: i32) -> (i32, i32, i32) {
    %c0_i32 = arith.constant 0 : i32
    %c0_i32_0 = arith.constant 0 : i32
    %c0_i32_1 = arith.constant 0 : i32
    return %arg1, %c0_i32, %c0_i32_0 : i32, i32, i32
  }
  func.func @transform_13(%arg0: i32, %arg1: i32) -> (i32, i32) {
    %c0_i32 = arith.constant 0 : i32
    %c0_i32_0 = arith.constant 0 : i32
    %c0_i32_1 = arith.constant 0 : i32
    return %c0_i32, %c0_i32_0 : i32, i32
  }
  func.func @transform_14(%arg0: i32, %arg1: i32) -> (i32, i32) {
    %c0_i32 = arith.constant 0 : i32
    %c0_i32_0 = arith.constant 0 : i32
    %c0_i32_1 = arith.constant 0 : i32
    return %c0_i32, %c0_i32_0 : i32, i32
  }
  func.func @transform_15(%arg0: i32, %arg1: i32) -> (i32, i32, i32) {
    %c0_i32 = arith.constant 0 : i32
    %c0_i32_0 = arith.constant 0 : i32
    %c0_i32_1 = arith.constant 0 : i32
    return %arg0, %c0_i32, %c0_i32_0 : i32, i32, i32
  }
}

module attributes {stable_mosaic.version = 11 : i64} {
  func.func @head_kernel(%arg0: i32, %arg1: memref<2x16x256xbf16, #tpu.memory_space<vmem>>, %arg2: memref<256x256xbf16, #tpu.memory_space<vmem>>, %arg3: memref<1x256xf32, #tpu.memory_space<vmem>>, %arg4: memref<2x16x256xbf16, #tpu.memory_space<vmem>>) attributes {dimension_semantics = [#tpu.dimension_semantics<parallel>], iteration_bounds = array<i64: 2>, scalar_prefetch = 0 : i64, scratch_operands = 0 : i64, tpu.core_type = #tpu.core_type<tc>, window_params = [{pipeline_mode = #tpu.pipeline_mode<synchronous>, transform_indices = @transform_0, window_bounds = array<i64: 2, 16, 256>}, {transform_indices = @transform_1, window_bounds = array<i64: 256, 256>}, {transform_indices = @transform_2, window_bounds = array<i64: 1, 256>}, {transform_indices = @transform_3, window_bounds = array<i64: 2, 16, 256>}]} {
    %c0 = arith.constant 0 : index
    %c0_0 = arith.constant 0 : index
    %c0_1 = arith.constant 0 : index
    %0 = vector.load %arg1[%c0, %c0_0, %c0_1] : memref<2x16x256xbf16, #tpu.memory_space<vmem>>, vector<2x16x256xbf16>
    %1 = vector.shape_cast %0 : vector<2x16x256xbf16> to vector<32x256xbf16>
    %c0_2 = arith.constant 0 : index
    %c0_3 = arith.constant 0 : index
    %2 = vector.load %arg2[%c0_2, %c0_3] : memref<256x256xbf16, #tpu.memory_space<vmem>>, vector<256x256xbf16>
    %cst = arith.constant dense<0.000000e+00> : vector<32x256xf32>
    %3 = tpu.matmul %1, %2, %cst {dimension_numbers = #tpu.dot_dimension_numbers<[1], [0], [0], [1], [0, 0, 1, 1], [], []>} : vector<32x256xbf16>, vector<256x256xbf16>, vector<32x256xf32> -> vector<32x256xf32>
    %c0_4 = arith.constant 0 : index
    %c0_5 = arith.constant 0 : index
    %4 = vector.load %arg3[%c0_4, %c0_5] : memref<1x256xf32, #tpu.memory_space<vmem>>, vector<1x256xf32>
    %5 = vector.broadcast %4 : vector<1x256xf32> to vector<32x256xf32>
    %6 = arith.addf %3, %5 : vector<32x256xf32>
    %7 = vector.shape_cast %6 : vector<32x256xf32> to vector<2x16x256xf32>
    %cst_6 = arith.constant dense<0xFF800000> : vector<2x256xf32>
    %8 = vector.multi_reduction <maximumf>, %7, %cst_6 [1] : vector<2x16x256xf32> to vector<2x256xf32>
    %9 = vector.shape_cast %8 : vector<2x256xf32> to vector<2x1x256xf32>
    %10 = vector.broadcast %9 : vector<2x1x256xf32> to vector<2x16x256xf32>
    %11 = arith.subf %7, %10 : vector<2x16x256xf32>
    %12 = math.exp %11 : vector<2x16x256xf32>
    %cst_7 = arith.constant dense<0.000000e+00> : vector<2x256xf32>
    %13 = vector.multi_reduction <add>, %12, %cst_7 [1] : vector<2x16x256xf32> to vector<2x256xf32>
    %14 = vector.shape_cast %13 : vector<2x256xf32> to vector<2x1x256xf32>
    %15 = vector.broadcast %14 : vector<2x1x256xf32> to vector<2x16x256xf32>
    %16 = arith.divf %12, %15 : vector<2x16x256xf32>
    %17 = arith.truncf %16 : vector<2x16x256xf32> to vector<2x16x256xbf16>
    %c0_8 = arith.constant 0 : index
    %c0_9 = arith.constant 0 : index
    %c0_10 = arith.constant 0 : index
    %18 = vector.load %arg4[%c0_8, %c0_9, %c0_10] : memref<2x16x256xbf16, #tpu.memory_space<vmem>>, vector<2x16x256xbf16>
    tpu.vector_store %arg4[%c0_8, %c0_9, %c0_10], %17 {strides = array<i32>} : memref<2x16x256xbf16, #tpu.memory_space<vmem>>, vector<2x16x256xbf16>,
    return
  }
  func.func @transform_0(%arg0: i32) -> (i32, i32, i32) {
    %c0_i32 = arith.constant 0 : i32
    %c0_i32_0 = arith.constant 0 : i32
    %c0_i32_1 = arith.constant 0 : i32
    %c0_i32_2 = arith.constant 0 : i32
    return %c0_i32, %c0_i32_0, %c0_i32_1 : i32, i32, i32
  }
  func.func @transform_1(%arg0: i32) -> (i32, i32) {
    %c0_i32 = arith.constant 0 : i32
    %c0_i32_0 = arith.constant 0 : i32
    return %c0_i32, %arg0 : i32, i32
  }
  func.func @transform_2(%arg0: i32) -> (i32, i32) {
    %c0_i32 = arith.constant 0 : i32
    %c0_i32_0 = arith.constant 0 : i32
    return %c0_i32, %arg0 : i32, i32
  }
  func.func @transform_3(%arg0: i32) -> (i32, i32, i32) {
    %c0_i32 = arith.constant 0 : i32
    %c0_i32_0 = arith.constant 0 : i32
    %c0_i32_1 = arith.constant 0 : i32
    return %c0_i32, %c0_i32_0, %arg0 : i32, i32, i32
  }
}

</mosaic_0001>

<bundles_post_ra>
// kernel: gpt_forward.3
= control target key start
LH: loop header
LB: loop body
LE: loop exit
PB: predicated region body
PF: predicated region fallthrough
CT: control target
= control target key end

     0   :  { %8 = vsyncpa [#allocation4], 0  ;;  %s1539_s0 = inlined_call_operand.vmem [shape: bf16[2,16,256], index: 0, kind: input, shape index: {}]   ;;  %s1540_s1 = inlined_call_operand.vmem [shape: bf16[256,512], index: 1, kind: input, shape index: {}]   ;;  %s1541_s2 = inlined_call_operand.vmem [shape: f32[1,512], index: 2, kind: input, shape index: {}]   ;;  %s1542_s3 = inlined_call_operand.hbm [shape: bf16[2,16,512], index: 3, kind: output, shape index: {}]  }
   0x1   :  { %10 = vsyncpa [#allocation4 + $0x1], 0  ;;  %s1243_s12 = smov 0   ;;  %s1245_s13 = smov 0  }
   0x2   :  { %s1247_s14 = smov 0   ;;  %s1249_s15 = smov 0  }
   0x3 LB: > { %s1264_s16 = sadd.s32 4294967295, %s1218_s15   ;;  %s893_s17 = sadd.s32 4294967294, %s1218_s15   ;;  %s1218_s15 = sphi %s1249_s15, %s1548_s15   ;;  %s1214_s14 = sphi %s1247_s14, %s1547_s14   ;;  %s1210_s13 = sphi %s1245_s13, %s1546_s13   ;;  %s1206_s12 = sphi %s1243_s12, %s1545_s12  }
   0x4   : > { %s1268_s18 = sadd.s32 1, %s1218_s15   ;;  %s44_s19 = sadd.s32 1, %s1214_s14 }
   0x5   : > { %s41_s20 = ssub.s32 %s1218_s15, %s1268_s18  ;;  %p51_p0 = scmp.ne.s32.totalorder %s1214_s14, %s1210_s13 }
   0x6   : > { %p42_p1 = scmp.eq.s32.totalorder %s41_s20, 0  ;;  %p52_p2 = scmp.eq.s32.totalorder %s1218_s15, 0 }
   0x7   : > { %p107_p3 = scmp.eq.s32.totalorder %s1264_s16, 1  ;;  %p112_p4 = scmp.ne.s32.totalorder %s1210_s13, %s1206_s12 }
   0x8   : > { %s1280_s21 = scalar_select %p42_p1, %s1214_s14, %s44_s19  }
   0x9   : > { %p53_p5 = por %p52_p2, %p51_p0  ;;  %p1282_p6 = por %p107_p3, %p51_p0 }
   0xa   : > { %p113_p7 = scmp.eq.s32.totalorder %s893_s17, 1  ;;  %p895_p9 = scmp.ge.s32.totalorder %s1218_s15, 2 }
   0xc   : > { %p1286_p8 = por %p113_p7, %p112_p4  ;;  %132 = sbr.rel (%p895_p9) target bundleno = 53 (0x35), region = 20 }
  0x11   : > { %135 = sbr.rel (!%p53_p5) target bundleno = 53 (0x35), region = 24  ;;  %s137_s24 = sand.u32 (%p53_p5), 1, %s1214_s14  }
  0x12   : > { %s1052_s25 = sshll.u32 (%p53_p5), %s1218_s15, 3  ;;  %s896_s26 = sshll.u32 (%p53_p5), %s137_s24, 8 }
  0x13   : > { %s1298_s29 = scalar_lea.vmem (%p53_p5), %s1540_s1, %s1052_s25  ;;  %s1303_s30 = scalar_lea.vmem (%p53_p5), [#allocation2], %s896_s26 }
  0x14   : > { %v233_v0 = vld [vmem:[%s1298_s29] sm:$0xff] (%p53_p5)  ;;  %v235_v1 = vld [vmem:[%s1298_s29 + $0x10] sm:$0xff] (%p53_p5) }
  0x15   : > { %v237_v2 = vld [vmem:[%s1298_s29 + $0x20] sm:$0xff] (%p53_p5)  ;;  %234 = vst [vmem:[%s1303_s30] sm:$0xff] (%p53_p5), %v233_v0  ;;  %v239_v3 = vld [vmem:[%s1298_s29 + $0x30] sm:$0xff] (%p53_p5) }
  0x16   : > { %236 = vst [vmem:[%s1303_s30 + $0x8] sm:$0xff] %v235_v1  ;;  %v241_v4 = vld [vmem:[%s1298_s29 + $0x40] sm:$0xff]  ;;  %v243_v5 = vld [vmem:[%s1298_s29 + $0x50] sm:$0xff] }
  0x17   : > { %238 = vst [vmem:[%s1303_s30 + $0x10] sm:$0xff] %v237_v2  ;;  %v245_v6 = vld [vmem:[%s1298_s29 + $0x60] sm:$0xff]  ;;  %v247_v7 = vld [vmem:[%s1298_s29 + $0x70] sm:$0xff] }
  0x18   : > { %240 = vst [vmem:[%s1303_s30 + $0x18] sm:$0xff] %v239_v3  ;;  %v249_v8 = vld [vmem:[%s1298_s29 + $0x80] sm:$0xff]  ;;  %v251_v9 = vld [vmem:[%s1298_s29 + $0x90] sm:$0xff] }
  0x19   : > { %242 = vst [vmem:[%s1303_s30 + $0x20] sm:$0xff] %v241_v4  ;;  %v253_v10 = vld [vmem:[%s1298_s29 + $0xa0] sm:$0xff]  ;;  %v255_v11 = vld [vmem:[%s1298_s29 + $0xb0] sm:$0xff] }
  0x1a   : > { %244 = vst [vmem:[%s1303_s30 + $0x28] sm:$0xff] %v243_v5  ;;  %v257_v12 = vld [vmem:[%s1298_s29 + $0xc0] sm:$0xff]  ;;  %v259_v13 = vld [vmem:[%s1298_s29 + $0xd0] sm:$0xff] }
  0x1b   : > { %246 = vst [vmem:[%s1303_s30 + $0x30] sm:$0xff] %v245_v6  ;;  %v261_v14 = vld [vmem:[%s1298_s29 + $0xe0] sm:$0xff]  ;;  %v263_v15 = vld [vmem:[%s1298_s29 + $0xf0] sm:$0xff] }
  0x1c   : > { %248 = vst [vmem:[%s1303_s30 + $0x38] sm:$0xff] %v247_v7  ;;  %v265_v16 = vld [vmem:[%s1298_s29 + $0x100] sm:$0xff]  ;;  %v267_v17 = vld [vmem:[%s1298_s29 + $0x110] sm:$0xff] }
  0x1d   : > { %250 = vst [vmem:[%s1303_s30 + $0x40] sm:$0xff] %v249_v8  ;;  %v269_v18 = vld [vmem:[%s1298_s29 + $0x120] sm:$0xff]  ;;  %v271_v19 = vld [vmem:[%s1298_s29 + $0x130] sm:$0xff] }
  0x1e   : > { %252 = vst [vmem:[%s1303_s30 + $0x48] sm:$0xff] %v251_v9  ;;  %v273_v20 = vld [vmem:[%s1298_s29 + $0x140] sm:$0xff]  ;;  %v275_v21 = vld [vmem:[%s1298_s29 + $0x150] sm:$0xff] }
  0x1f   : > { %254 = vst [vmem:[%s1303_s30 + $0x50] sm:$0xff] %v253_v10  ;;  %v277_v22 = vld [vmem:[%s1298_s29 + $0x160] sm:$0xff]  ;;  %v279_v23 = vld [vmem:[%s1298_s29 + $0x170] sm:$0xff] }
  0x20   : > { %256 = vst [vmem:[%s1303_s30 + $0x58] sm:$0xff] %v255_v11  ;;  %v281_v24 = vld [vmem:[%s1298_s29 + $0x180] sm:$0xff]  ;;  %v283_v25 = vld [vmem:[%s1298_s29 + $0x190] sm:$0xff] }
  0x21   : > { %258 = vst [vmem:[%s1303_s30 + $0x60] sm:$0xff] %v257_v12  ;;  %v285_v26 = vld [vmem:[%s1298_s29 + $0x1a0] sm:$0xff]  ;;  %v287_v27 = vld [vmem:[%s1298_s29 + $0x1b0] sm:$0xff] }
  0x22   : > { %260 = vst [vmem:[%s1303_s30 + $0x68] sm:$0xff] %v259_v13  ;;  %v289_v28 = vld [vmem:[%s1298_s29 + $0x1c0] sm:$0xff]  ;;  %v291_v29 = vld [vmem:[%s1298_s29 + $0x1d0] sm:$0xff] }
  0x23   : > { %262 = vst [vmem:[%s1303_s30 + $0x70] sm:$0xff] %v261_v14  ;;  %v293_v30 = vld [vmem:[%s1298_s29 + $0x1e0] sm:$0xff]  ;;  %v295_v31 = vld [vmem:[%s1298_s29 + $0x1f0] sm:$0xff] }
  0x24   : > { %264 = vst [vmem:[%s1303_s30 + $0x78] sm:$0xff] %v263_v15 }
  0x25   : > { %266 = vst [vmem:[%s1303_s30 + $0x80] sm:$0xff] %v265_v16 }
  0x26   : > { %268 = vst [vmem:[%s1303_s30 + $0x88] sm:$0xff] %v267_v17 }
  0x27   : > { %270 = vst [vmem:[%s1303_s30 + $0x90] sm:$0xff] %v269_v18 }
  0x28   : > { %272 = vst [vmem:[%s1303_s30 + $0x98] sm:$0xff] %v271_v19 }
  0x29   : > { %274 = vst [vmem:[%s1303_s30 + $0xa0] sm:$0xff] %v273_v20 }
  0x2a   : > { %276 = vst [vmem:[%s1303_s30 + $0xa8] sm:$0xff] %v275_v21 }
  0x2b   : > { %278 = vst [vmem:[%s1303_s30 + $0xb0] sm:$0xff] %v277_v22 }
  0x2c   : > { %280 = vst [vmem:[%s1303_s30 + $0xb8] sm:$0xff] %v279_v23 }
  0x2d   : > { %282 = vst [vmem:[%s1303_s30 + $0xc0] sm:$0xff] %v281_v24 }
  0x2e   : > { %284 = vst [vmem:[%s1303_s30 + $0xc8] sm:$0xff] %v283_v25 }
  0x2f   : > { %286 = vst [vmem:[%s1303_s30 + $0xd0] sm:$0xff] %v285_v26 }
  0x30   : > { %288 = vst [vmem:[%s1303_s30 + $0xd8] sm:$0xff] %v287_v27 }
  0x31   : > { %290 = vst [vmem:[%s1303_s30 + $0xe0] sm:$0xff] %v289_v28 }
  0x32   : > { %292 = vst [vmem:[%s1303_s30 + $0xe8] sm:$0xff] %v291_v29 }
  0x33   : > { %294 = vst [vmem:[%s1303_s30 + $0xf0] sm:$0xff] %v293_v30 }
  0x34   : > { %296 = vst [vmem:[%s1303_s30 + $0xf8] sm:$0xff] %v295_v31 }
  0x35 PF: > { %p899_p10 = scmp.ge.s32.totalorder %s1218_s15, 1  ;;  %p309_p11 = scmp.lt.s32.totalorder %s1218_s15, 3 }
  0x37   : > { %p310_p12 = pnand %p899_p10, %p309_p11 }
  0x38   : > { %s1369_s4 = sand.u32 (!%p310_p12), 1, %s1210_s13   ;;  %s1089_s17 = sshll.u32 (!%p310_p12), %s1264_s16, 3 }
  0x39   : > { %313 = sbr.rel (%p310_p12) target bundleno = 324 (0x144), region = 66  ;;  %s900_s5 = sshll.u32 (!%p310_p12), %s1369_s4, 8 }
  0x3a   : > { %s1372_s6 = scalar_lea.vmem (!%p310_p12), [#allocation2], %s900_s5  ;;  %s901_s10 = sshll.u32 (!%p310_p12), %s1369_s4, 5 }
  0x3b   : > { %s1495_s11 = scalar_lea.vmem (!%p310_p12), [#allocation3], %s901_s10  ;;  %s812_s24 = scalar_lea.hbm (!%p310_p12), %s1542_s3, %s1089_s17 }
  0x3c   : > { %s815_s25 = sshll.u32 (!%p310_p12), %s812_s24, 4  ;;  %s801_s26 = scalar_lea.sflag (!%p310_p12), [#allocation4], %s1369_s4  ;;  %s816_s25 = int_to_ptr.hbm [resolvable:$true] %s815_s25 }
  0x3d   : > { %s1170_s27 = sshra.s32 (!%p310_p12), %s816_s25, 4  ;;  %s1176_s5 = scalar_lea.hbm (!%p310_p12), %s1542_s3, 64  ;;  %s1171_s27 = int_to_ptr.hbm [resolvable:$true] %s1170_s27 }
  0x3e   : > { %v977_v32 = vld [vmem:[%s1372_s6 + $0x70] sm:$0xf]  ;;  %v1072_v33 = vld [vmem:[%s1372_s6 + $0x74] sm:$0xf0]  ;;  %v1071_v37 = vld [vmem:[%s1372_s6 + $0x74] sm:$0xf]  ;;  %p1177_p3 = scmp.lt.s32.totalorder %s1171_s27, %s1542_s3 }
  0x3f   : > { %v1041_v34 = vld [vmem:[%s1372_s6 + $0xf0] sm:$0xf]  ;;  %v978_v35 = vor.u32 %v1072_v33, %v977_v32  ;;  %v1088_v36 = vld [vmem:[%s1372_s6 + $0xf4] sm:$0xf0]  ;;  %v979_v38 = vld [vmem:[%s1372_s6 + $0x78] sm:$0xf0] }
  0x40   : > { %v1042_v39 = vor.u32 %v1088_v36, %v1041_v34  ;;  %v982_v40 = vor.u32 %v1071_v37, %v979_v38  ;;  %v1087_v41 = vld [vmem:[%s1372_s6 + $0xf4] sm:$0xf]  ;;  %v1043_v42 = vld [vmem:[%s1372_s6 + $0xf8] sm:$0xf0]  ;;  %v969_v43 = vld [vmem:[%s1372_s6 + $0x60] sm:$0xf] }
  0x41   : > { %572 = vmatpush.bf16.msra.mxu0 %v978_v35  ;;  %v1046_v44 = vor.u32 %v1087_v41, %v1043_v42  ;;  %v1070_v45 = vld [vmem:[%s1372_s6 + $0x64] sm:$0xf0]  ;;  %v1033_v46 = vld [vmem:[%s1372_s6 + $0xe0] sm:$0xf]  ;;  %v1069_v50 = vld [vmem:[%s1372_s6 + $0x64] sm:$0xf] }
  0x42   : > { %v1086_v47 = vld [vmem:[%s1372_s6 + $0xe4] sm:$0xf0]  ;;  %591 = vmatpush.bf16.msra.mxu1 %v1042_v39  ;;  %610 = vmatpush.bf16.msra.mxu2 %v982_v40  ;;  %v970_v48 = vor.u32 %v1070_v45, %v969_v43  ;;  %v971_v51 = vld [vmem:[%s1372_s6 + $0x68] sm:$0xf0]  ;;  %v1085_v52 = vld [vmem:[%s1372_s6 + $0xe4] sm:$0xf] }
  0x43   : > { %v1034_v49 = vor.u32 %v1086_v47, %v1033_v46  ;;  %629 = vmatpush.bf16.msra.mxu3 %v1046_v44  ;;  %v974_v53 = vor.u32 %v1069_v50, %v971_v51  ;;  %v1035_v54 = vld [vmem:[%s1372_s6 + $0xe8] sm:$0xf0]  ;;  %v961_v55 = vld [vmem:[%s1372_s6 + $0x50] sm:$0xf]  ;;  %v1068_v56 = vld [vmem:[%s1372_s6 + $0x54] sm:$0xf0] }
  0x44   : > { %v1038_v57 = vor.u32 %v1085_v52, %v1035_v54  ;;  %v1025_v58 = vld [vmem:[%s1372_s6 + $0xd0] sm:$0xf]  ;;  %v1084_v59 = vld [vmem:[%s1372_s6 + $0xd4] sm:$0xf0]  ;;  %v1067_v60 = vld [vmem:[%s1372_s6 + $0x54] sm:$0xf]  ;;  %v962_v61 = vor.u32 %v1068_v56, %v961_v55 }
  0x45   : > { %573 = vmatpush.bf16.msra.mxu0 %v970_v48  ;;  %v963_v62 = vld [vmem:[%s1372_s6 + $0x58] sm:$0xf0]  ;;  %v1083_v63 = vld [vmem:[%s1372_s6 + $0xd4] sm:$0xf]  ;;  %v1026_v1 = vor.u32 %v1084_v59, %v1025_v58  ;;  %v953_v3 = vld [vmem:[%s1372_s6 + $0x40] sm:$0xf] }
  0x46   : > { %v1027_v0 = vld [vmem:[%s1372_s6 + $0xd8] sm:$0xf0]  ;;  %592 = vmatpush.bf16.msra.mxu1 %v1034_v49  ;;  %611 = vmatpush.bf16.msra.mxu2 %v974_v53  ;;  %v966_v2 = vor.u32 %v1067_v60, %v963_v62  ;;  %v1066_v4 = vld [vmem:[%s1372_s6 + $0x44] sm:$0xf0]  ;;  %v1017_v5 = vld [vmem:[%s1372_s6 + $0xc0] sm:$0xf] }
  0x47   : > { %630 = vmatpush.bf16.msra.mxu3 %v1038_v57  ;;  %v1030_v6 = vor.u32 %v1083_v63, %v1027_v0  ;;  %v1082_v7 = vld [vmem:[%s1372_s6 + $0xc4] sm:$0xf0]  ;;  %v1065_v8 = vld [vmem:[%s1372_s6 + $0x44] sm:$0xf]  ;;  %v955_v9 = vld [vmem:[%s1372_s6 + $0x48] sm:$0xf0]  ;;  %v954_v12 = vor.u32 %v1066_v4, %v953_v3 }
  0x48   : > { %v1081_v10 = vld [vmem:[%s1372_s6 + $0xc4] sm:$0xf]  ;;  %v1019_v11 = vld [vmem:[%s1372_s6 + $0xc8] sm:$0xf0]  ;;  %v1018_v13 = vor.u32 %v1082_v7, %v1017_v5  ;;  %v958_v14 = vor.u32 %v1065_v8, %v955_v9  ;;  %v945_v15 = vld [vmem:[%s1372_s6 + $0x30] sm:$0xf] }
  0x49   : > { %574 = vmatpush.bf16.msra.mxu0 %v962_v61  ;;  %v1064_v16 = vld [vmem:[%s1372_s6 + $0x34] sm:$0xf0]  ;;  %v1009_v17 = vld [vmem:[%s1372_s6 + $0xb0] sm:$0xf]  ;;  %v1022_v18 = vor.u32 %v1081_v10, %v1019_v11  ;;  %v1063_v20 = vld [vmem:[%s1372_s6 + $0x34] sm:$0xf] }
  0x4a   : > { %593 = vmatpush.bf16.msra.mxu1 %v1026_v1  ;;  %612 = vmatpush.bf16.msra.mxu2 %v966_v2  ;;  %v1080_v19 = vld [vmem:[%s1372_s6 + $0xb4] sm:$0xf0]  ;;  %v947_v21 = vld [vmem:[%s1372_s6 + $0x38] sm:$0xf0]  ;;  %v1079_v22 = vld [vmem:[%s1372_s6 + $0xb4] sm:$0xf]  ;;  %v946_v24 = vor.u32 %v1064_v16, %v945_v15 }
  0x4b   : > { %631 = vmatpush.bf16.msra.mxu3 %v1030_v6  ;;  %v1011_v23 = vld [vmem:[%s1372_s6 + $0xb8] sm:$0xf0]  ;;  %v1010_v25 = vor.u32 %v1080_v19, %v1009_v17  ;;  %v950_v26 = vor.u32 %v1063_v20, %v947_v21  ;;  %v937_v27 = vld [vmem:[%s1372_s6 + $0x20] sm:$0xf]  ;;  %v1062_v28 = vld [vmem:[%s1372_s6 + $0x24] sm:$0xf0] }
  0x4c   : > { %v1001_v29 = vld [vmem:[%s1372_s6 + $0xa0] sm:$0xf]  ;;  %v1014_v30 = vor.u32 %v1079_v22, %v1011_v23  ;;  %v1078_v31 = vld [vmem:[%s1372_s6 + $0xa4] sm:$0xf0]  ;;  %v1061_v32 = vld [vmem:[%s1372_s6 + $0x24] sm:$0xf]  ;;  %v938_v36 = vor.u32 %v1062_v28, %v937_v27 }
  0x4d   : > { %575 = vmatpush.bf16.msra.mxu0 %v954_v12  ;;  %v939_v33 = vld [vmem:[%s1372_s6 + $0x28] sm:$0xf0]  ;;  %v1077_v34 = vld [vmem:[%s1372_s6 + $0xa4] sm:$0xf]  ;;  %v1002_v37 = vor.u32 %v1078_v31, %v1001_v29  ;;  %v929_v39 = vld [vmem:[%s1372_s6 + $0x10] sm:$0xf] }
  0x4e   : > { %594 = vmatpush.bf16.msra.mxu1 %v1018_v13  ;;  %613 = vmatpush.bf16.msra.mxu2 %v958_v14  ;;  %v1003_v35 = vld [vmem:[%s1372_s6 + $0xa8] sm:$0xf0]  ;;  %v942_v38 = vor.u32 %v1061_v32, %v939_v33  ;;  %v1060_v40 = vld [vmem:[%s1372_s6 + $0x14] sm:$0xf0]  ;;  %v993_v41 = vld [vmem:[%s1372_s6 + $0x90] sm:$0xf] }
  0x4f   : > { %632 = vmatpush.bf16.msra.mxu3 %v1022_v18  ;;  %v1006_v42 = vor.u32 %v1077_v34, %v1003_v35  ;;  %v1076_v43 = vld [vmem:[%s1372_s6 + $0x94] sm:$0xf0]  ;;  %v1059_v44 = vld [vmem:[%s1372_s6 + $0x14] sm:$0xf]  ;;  %v931_v45 = vld [vmem:[%s1372_s6 + $0x18] sm:$0xf0]  ;;  %v930_v48 = vor.u32 %v1060_v40, %v929_v39 }
  0x50   : > { %v1075_v46 = vld [vmem:[%s1372_s6 + $0x94] sm:$0xf]  ;;  %v995_v47 = vld [vmem:[%s1372_s6 + $0x98] sm:$0xf0]  ;;  %v994_v49 = vor.u32 %v1076_v43, %v993_v41  ;;  %v934_v50 = vor.u32 %v1059_v44, %v931_v45  ;;  %v921_v51 = vld [vmem:[%s1372_s6] sm:$0xf] }
  0x51   : > { %576 = vmatpush.bf16.msra.mxu0 %v946_v24  ;;  %v1058_v52 = vld [vmem:[%s1372_s6 + $0x4] sm:$0xf0]  ;;  %v985_v53 = vld [vmem:[%s1372_s6 + $0x80] sm:$0xf]  ;;  %v998_v54 = vor.u32 %v1075_v46, %v995_v47  ;;  %v1057_v56 = vld [vmem:[%s1372_s6 + $0x4] sm:$0xf] }
  0x52   : > { %595 = vmatpush.bf16.msra.mxu1 %v1010_v25  ;;  %614 = vmatpush.bf16.msra.mxu2 %v950_v26  ;;  %v1074_v55 = vld [vmem:[%s1372_s6 + $0x84] sm:$0xf0]  ;;  %v923_v57 = vld [vmem:[%s1372_s6 + $0x8] sm:$0xf0]  ;;  %v1073_v58 = vld [vmem:[%s1372_s6 + $0x84] sm:$0xf]  ;;  %v922_v60 = vor.u32 %v1058_v52, %v921_v51 }
  0x53   : > { %633 = vmatpush.bf16.msra.mxu3 %v1014_v30  ;;  %v987_v59 = vld [vmem:[%s1372_s6 + $0x88] sm:$0xf0]  ;;  %v905_v61 = vld [vmem:[%s1539_s0] sm:$0xf]  ;;  %v1054_v62 = vld [vmem:[%s1539_s0 + $0x4] sm:$0xf0]  ;;  %v986_v63 = vor.u32 %v1074_v55, %v985_v53  ;;  %v926_v0 = vor.u32 %v1057_v56, %v923_v57 }
  0x54   : > { %v1053_v1 = vld [vmem:[%s1539_s0 + $0x4] sm:$0xf]  ;;  %v907_v2 = vld [vmem:[%s1539_s0 + $0x8] sm:$0xf0]  ;;  %v990_v3 = vor.u32 %v1073_v58, %v987_v59  ;;  %v906_v4 = vor.u32 %v1054_v62, %v905_v61  ;;  %v913_v6 = vld [vmem:[%s1539_s0 + $0x10] sm:$0xf] }
  0x55   : > { %577 = vmatpush.bf16.msra.mxu0 %v938_v36  ;;  %v910_v5 = vor.u32 %v1053_v1, %v907_v2  ;;  %v1056_v7 = vld [vmem:[%s1539_s0 + $0x14] sm:$0xf0]  ;;  %v1055_v8 = vld [vmem:[%s1539_s0 + $0x14] sm:$0xf]  ;;  %v915_v9 = vld [vmem:[%s1539_s0 + $0x18] sm:$0xf0] }
  0x56   : > { %596 = vmatpush.bf16.msra.mxu1 %v1002_v37  ;;  %615 = vmatpush.bf16.msra.mxu2 %v942_v38  ;;  %v914_v10 = vor.u32 %v1056_v7, %v913_v6  ;;  %v918_v11 = vor.u32 %v1055_v8, %v915_v9  ;;  %s902_s6 = sshll.u32 %s1264_s16, 1  ;;  %s813_s16 = sshll.u32 %s1495_s11, 4  ;;  %s814_s16 = int_to_ptr.vmem [resolvable:$true] %s813_s16 }
  0x57   : > { %634 = vmatpush.bf16.msra.mxu3 %v1006_v42  ;;  %p345_p13 = scmp.lt.s32.totalorder %s902_s6, 3  ;;  %s1172_s28 = scalar_lea.hbm %s1171_s27, 32 }
  0x58   : > { %p1173_p0 = scmp.ne.s32.totalorder %s1171_s27, %s1172_s28  ;;  %p1178_p4 = scmp.lt.s32.totalorder %s1176_s5, %s1172_s28 }
  0x59   : > { %578 = vmatpush.bf16.msra.mxu0 %v930_v48  ;;  %s1550_s6 = smov (!%p345_p13, %s902_s6), 3 }
  0x5a   : > { %597 = vmatpush.bf16.msra.mxu1 %v994_v49  ;;  %616 = vmatpush.bf16.msra.mxu2 %v934_v50  ;;  %s347_s9 = scalar_lea.vmem %s1541_s2, %s1550_s6  ;;  %p1174_p1 = pnand %p1173_p0, %p1282_p6 }
  0x5b   : > { %635 = vmatpush.bf16.msra.mxu3 %v998_v54  ;;  %v386_v12 = vld [vmem:[%s347_s9] sm:$0x3]  ;;  %p1179_p5 = por %p1178_p4, %p1177_p3 }
  0x5c   : > { %v388_v15 = vperm.slane %v386_v12, 0  ;;  %v389_v22 = vperm.slane %v386_v12, 1  ;;  %p1175_p2 = pneg %p1174_p1 }
  0x5d   : > { %579 = vmatpush.bf16.msra.mxu0 %v922_v60 }
  0x5e   : > { %598 = vmatpush.bf16.msra.mxu1 %v986_v63  ;;  %617 = vmatpush.bf16.msra.mxu2 %v926_v0  ;;  %p1180_p7 = pnand %p1179_p5, %p1175_p2 }
  0x5f   : > { %636 = vmatpush.bf16.msra.mxu3 %v990_v3 }
  0x60   : > { %580 = vmatmul.bf16.vlgmr.msra.gmra.mxu0 %v906_v4 }
  0x61   : > { %599 = vmatmul.bf16.vlgmr.msra.gmra.mxu1 %v910_v5  ;;  %618 = vmatmul.bf16.vlgmr.msra.gmra.mxu2 %v906_v4 }
  0x62   : > { %637 = vmatmul.bf16.vlgmr.msra.gmra.mxu3 %v910_v5 }
  0x70   : > { %585 = vmatmul.bf16.gmra.mxu0 %v914_v10 }
  0x71   : > { %604 = vmatmul.bf16.gmra.mxu1 %v918_v11  ;;  %623 = vmatmul.bf16.gmra.mxu2 %v914_v10 }
  0x72   : > { %642 = vmatmul.bf16.gmra.mxu3 %v918_v11 }
  0xdd   : > { %v581_v13 = vpop.f32.mrf.mxu0 }
  0xde   : > { %v600_v14 = vpop.f32.mrf.mxu1  ;;  %v582_v16 = vadd.f32 %v581_v13, %v388_v15 }
  0xe0   : > { %v601_v23 = vadd.f32 %v600_v14, %v582_v16 }
  0xe4   : > { %v619_v17 = vpop.f32.mrf.mxu2 }
  0xe5   : > { %v638_v18 = vpop.f32.mrf.mxu3  ;;  %v583_v19 = vpop.f32.mrf.mxu0  ;;  %v620_v26 = vadd.f32 %v619_v17, %v389_v22 }
  0xe6   : > { %v584_v20 = vadd.f32 %v583_v19, %v388_v15  ;;  %v602_v21 = vpop.f32.mrf.mxu1 }
  0xe7   : > { %v639_v34 = vadd.f32 %v638_v18, %v620_v26 }
  0xe8   : > { %v603_v24 = vadd.f32 %v602_v21, %v584_v20 }
  0xea   : > { %v648_v25 = vmax.f32 %v601_v23, %v603_v24 }
  0xec   : > { %v649_v27 = vrot.slane %v648_v25, 4  ;;  %v621_v28 = vpop.f32.mrf.mxu2 }
  0xed   : > { %v622_v29 = vadd.f32 %v621_v28, %v389_v22  ;;  %v640_v30 = vpop.f32.mrf.mxu3  ;;  %v586_v31 = vpop.f32.mrf.mxu0 }
  0xee   : > { %v650_v32 = vmax.f32 %v648_v25, %v649_v27  ;;  %v605_v33 = vpop.f32.mrf.mxu1  ;;  %v587_v41 = vadd.f32 %v586_v31, %v388_v15 }
  0xef   : > { %v641_v35 = vadd.f32 %v640_v30, %v622_v29 }
  0xf0   : > { %v651_v36 = vrot.slane %v650_v32, 2  ;;  %v606_v52 = vadd.f32 %v605_v33, %v587_v41 }
  0xf1   : > { %v655_v37 = vmax.f32 %v639_v34, %v641_v35 }
  0xf2   : > { %v652_v38 = vmax.f32 %v650_v32, %v651_v36 }
  0xf3   : > { %v656_v39 = vrot.slane %v655_v37, 4 }
  0xf4   : > { %v653_v40 = vrot.slane %v652_v38, 1  ;;  %v624_v42 = vpop.f32.mrf.mxu2 }
  0xf5   : > { %v657_v43 = vmax.f32 %v655_v37, %v656_v39  ;;  %v643_v44 = vpop.f32.mrf.mxu3  ;;  %v588_v45 = vpop.f32.mrf.mxu0  ;;  %v625_v59 = vadd.f32 %v624_v42, %v389_v22 }
  0xf6   : > { %v654_v46 = vmax.f32 %v652_v38, %v653_v40  ;;  %v589_v47 = vadd.f32 %v588_v45, %v388_v15  ;;  %v607_v49 = vpop.f32.mrf.mxu1 }
  0xf7   : > { %v658_v48 = vrot.slane %v657_v43, 2  ;;  %v644_v4 = vadd.f32 %v643_v44, %v625_v59 }
  0xf8   : > { %v676_v50 = vsub.f32 %v601_v23, %v654_v46  ;;  %v678_v51 = vsub.f32 %v603_v24, %v654_v46  ;;  %v608_v53 = vadd.f32 %v607_v49, %v589_v47 }
  0xf9   : > { %v659_v54 = vmax.f32 %v657_v43, %v658_v48 }
  0xfa   : > { %v684_v55 = vmul.f32 1.442695, %v676_v50  ;;  %v688_v56 = vmul.f32 1.442695, %v678_v51  ;;  %v662_v57 = vmax.f32 %v606_v52, %v608_v53 }
  0xfb   : > { %v660_v58 = vrot.slane %v659_v54, 1 }
  0xfc   : > { %1132 = vpow2.f32 %v684_v55  ;;  %v663_v60 = vrot.slane %v662_v57, 4  ;;  %v626_v61 = vpop.f32.mrf.mxu2 }
  0xfd   : > { %1134 = vpow2.f32 %v688_v56  ;;  %v661_v62 = vmax.f32 %v659_v54, %v660_v58  ;;  %v627_v63 = vadd.f32 %v626_v61, %v389_v22  ;;  %v645_v1 = vpop.f32.mrf.mxu3 }
  0xfe   : > { %v664_v0 = vmax.f32 %v662_v57, %v663_v60 }
  0xff   : > { %v677_v2 = vsub.f32 %v639_v34, %v661_v62  ;;  %v679_v3 = vsub.f32 %v641_v35, %v661_v62  ;;  %v646_v5 = vadd.f32 %v645_v1, %v627_v63 }
 0x100   : > { %v665_v6 = vrot.slane %v664_v0, 2 }
 0x101   : > { %v686_v7 = vmul.f32 1.442695, %v677_v2  ;;  %v690_v8 = vmul.f32 1.442695, %v679_v3  ;;  %v669_v9 = vmax.f32 %v644_v4, %v646_v5 }
 0x102   : > { %v1466_v10 = vpop.eup %1132  ;;  %v666_v11 = vmax.f32 %v664_v0, %v665_v6 }
 0x103   : > { %v1468_v12 = vpop.eup %1134  ;;  %1136 = vpow2.f32 %v686_v7  ;;  %v670_v13 = vrot.slane %v669_v9, 4 }
 0x104   : > { %v700_v14 = vadd.f32 %v1468_v12, %v1466_v10  ;;  %1138 = vpow2.f32 %v690_v8  ;;  %v667_v15 = vrot.slane %v666_v11, 1 }
 0x105   : > { %v671_v16 = vmax.f32 %v669_v9, %v670_v13 }
 0x106   : > { %v701_v17 = vrot.slane %v700_v14, 4  ;;  %v668_v18 = vmax.f32 %v666_v11, %v667_v15 }
 0x107   : > { %v672_v19 = vrot.slane %v671_v16, 2 }
 0x108   : > { %v702_v20 = vadd.f32 %v701_v17, %v700_v14  ;;  %v680_v21 = vsub.f32 %v606_v52, %v668_v18  ;;  %v682_v22 = vsub.f32 %v608_v53, %v668_v18 }
 0x109   : > { %v1472_v23 = vpop.eup %1136  ;;  %v673_v24 = vmax.f32 %v671_v16, %v672_v19 }
 0x10a   : > { %v1474_v25 = vpop.eup %1138  ;;  %v703_v26 = vrot.slane %v702_v20, 2  ;;  %v692_v27 = vmul.f32 1.442695, %v680_v21  ;;  %v696_v28 = vmul.f32 1.442695, %v682_v22 }
 0x10b   : > { %v707_v29 = vadd.f32 %v1474_v25, %v1472_v23  ;;  %v674_v30 = vrot.slane %v673_v24, 1 }
 0x10c   : > { %v704_v31 = vadd.f32 %v703_v26, %v702_v20  ;;  %1140 = vpow2.f32 %v692_v27 }
 0x10d   : > { %v708_v32 = vrot.slane %v707_v29, 4  ;;  %1142 = vpow2.f32 %v696_v28  ;;  %v675_v33 = vmax.f32 %v673_v24, %v674_v30 }
 0x10e   : > { %v705_v34 = vrot.slane %v704_v31, 1 }
 0x10f   : > { %v709_v35 = vadd.f32 %v708_v32, %v707_v29  ;;  %v681_v36 = vsub.f32 %v644_v4, %v675_v33  ;;  %v683_v37 = vsub.f32 %v646_v5, %v675_v33 }
 0x110   : > { %v706_v38 = vadd.f32 %v705_v34, %v704_v31 }
 0x111   : > { %v710_v39 = vrot.slane %v709_v35, 2  ;;  %v694_v40 = vmul.f32 1.442695, %v681_v36  ;;  %v698_v41 = vmul.f32 1.442695, %v683_v37 }
 0x112   : > { %v1478_v42 = vpop.eup %1140  ;;  %1144 = vrcp.f32 %v706_v38  ;;  %v739_v63 = vand.u32 2147483648, %v706_v38  ;;  %vm733_vm1 = vweird.f32 %v706_v38  ;;  %v737_v3 = vand.u32 2147483647, %v706_v38 }
 0x113   : > { %v1480_v43 = vpop.eup %1142  ;;  %v711_v44 = vadd.f32 %v710_v39, %v709_v35  ;;  %1146 = vpow2.f32 %v694_v40 }
 0x114   : > { %v714_v45 = vadd.f32 %v1480_v43, %v1478_v42  ;;  %1148 = vpow2.f32 %v698_v41  ;;  %v740_v7 = vor.u32 1.1754944e-38, %v739_v63  ;;  %vm738_vm4 = vcmp.eq.f32.partialorder %v737_v3, 8.507059e+37 }
 0x115   : > { %v712_v46 = vrot.slane %v711_v44, 1 }
 0x116   : > { %v715_v47 = vrot.slane %v714_v45, 4 }
 0x117   : > { %v713_v48 = vadd.f32 %v712_v46, %v711_v44 }
 0x118   : > { %v1145_v49 = vpop.eup %1144  ;;  %v716_v50 = vadd.f32 %v715_v47, %v714_v45 }
 0x119   : > { %v1484_v51 = vpop.eup %1146  ;;  %v729_v52 = vmul.f32 %v1145_v49, %v706_v38  ;;  %1150 = vrcp.f32 %v713_v48  ;;  %vm734_vm0 = vweird.f32 %v1145_v49  ;;  %v754_v8 = vand.u32 2147483648, %v713_v48 }
 0x11a   : > { %v1486_v53 = vpop.eup %1148  ;;  %v717_v54 = vrot.slane %v716_v50, 2  ;;  %vm735_vm2 = vmor %vm733_vm1, %vm734_vm0  ;;  %v752_v11 = vand.u32 2147483647, %v713_v48  ;;  %vm748_vm5 = vweird.f32 %v713_v48 }
 0x11b   : > { %v730_v55 = vsub.f32 1.0, %v729_v52  ;;  %v721_v56 = vadd.f32 %v1486_v53, %v1484_v51  ;;  %v755_v17 = vor.u32 1.1754944e-38, %v754_v8 }
 0x11c   : > { %v718_v57 = vadd.f32 %v717_v54, %v716_v50  ;;  %vm753_vm7 = vcmp.eq.f32.partialorder %v752_v11, 8.507059e+37 }
 0x11d   : > { %v731_v58 = vmul.f32 %v1145_v49, %v730_v55  ;;  %v722_v59 = vrot.slane %v721_v56, 4 }
 0x11e   : > { %v719_v60 = vrot.slane %v718_v57, 1 }
 0x11f   : > { %v1151_v61 = vpop.eup %1150  ;;  %v732_v62 = vadd.f32 %v1145_v49, %v731_v58  ;;  %v723_v0 = vadd.f32 %v722_v59, %v721_v56 }
 0x120   : > { %v744_v1 = vmul.f32 %v1151_v61, %v713_v48  ;;  %v720_v2 = vadd.f32 %v719_v60, %v718_v57  ;;  %vm749_vm3 = vweird.f32 %v1151_v61 }
 0x121   : > { %v724_v4 = vrot.slane %v723_v0, 2  ;;  %v736_v6 = vsel %vm735_vm2, %v1145_v49, %v732_v62  ;;  %vm750_vm6 = vmor %vm748_vm5, %vm749_vm3 }
 0x122   : > { %v745_v5 = vsub.f32 1.0, %v744_v1  ;;  %1152 = vrcp.f32 %v720_v2  ;;  %v741_v14 = vsel %vm738_vm4, %v740_v7, %v736_v6  ;;  %v771_v34 = vand.u32 2147483648, %v720_v2 }
 0x123   : > { %v725_v13 = vadd.f32 %v724_v4, %v723_v0  ;;  %v742_v21 = vmul.f32 %v1466_v10, %v741_v14  ;;  %v758_v26 = vmul.f32 %v1468_v12, %v741_v14  ;;  %vm765_vm9 = vweird.f32 %v720_v2 }
 0x124   : > { %v746_v9 = vmul.f32 %v1151_v61, %v745_v5  ;;  %v772_v39 = vor.u32 1.1754944e-38, %v771_v34 }
 0x125   : > { %v726_v16 = vrot.slane %v725_v13, 1 }
 0x126   : > { %v747_v15 = vadd.f32 %v1151_v61, %v746_v9 }
 0x127   : > { %v727_v20 = vadd.f32 %v726_v16, %v725_v13 }
 0x128   : > { %v1153_v18 = vpop.eup %1152  ;;  %v751_v19 = vsel %vm750_vm6, %v1151_v61, %v747_v15 }
 0x129   : > { %v756_v22 = vsel %vm753_vm7, %v755_v17, %v751_v19  ;;  %v761_v24 = vmul.f32 %v1153_v18, %v720_v2  ;;  %1154 = vrcp.f32 %v727_v20  ;;  %vm766_vm8 = vweird.f32 %v1153_v18 }
 0x12a   : > { %v757_v27 = vmul.f32 %v1472_v23, %v756_v22  ;;  %v759_v28 = vmul.f32 %v1474_v25, %v756_v22  ;;  %v769_v23 = vand.u32 2147483647, %v720_v2  ;;  %vm767_vm10 = vmor %vm765_vm9, %vm766_vm8  ;;  %v786_v35 = vand.u32 2147483648, %v727_v20 }
 0x12b   : > { %v762_v29 = vsub.f32 1.0, %v761_v24  ;;  %v784_v38 = vand.u32 2147483647, %v727_v20  ;;  %vm780_vm13 = vweird.f32 %v727_v20 }
 0x12c   : > { %v792_v30 = vpack.c.bf16 %v757_v27, %v742_v21  ;;  %v793_v31 = vpack.c.bf16 %v759_v28, %v758_v26  ;;  %vm770_vm12 = vcmp.eq.f32.partialorder %v769_v23, 8.507059e+37  ;;  %v787_v44 = vor.u32 1.1754944e-38, %v786_v35 }
 0x12d   : > { %v763_v32 = vmul.f32 %v1153_v18, %v762_v29  ;;  %vm785_vm15 = vcmp.eq.f32.partialorder %v784_v38, 8.507059e+37 }
 0x12e   : > { %796 = vst [vmem:[%s1495_s11] sm:$0xff] %v792_v30 }
 0x12f   : > { %797 = vst [vmem:[%s1495_s11 + $0x8] sm:$0xff] %v793_v31  ;;  %v1155_v10 = vpop.eup %1154  ;;  %v764_v33 = vadd.f32 %v1153_v18, %v763_v32 }
 0x130   : > { %v776_v12 = vmul.f32 %v1155_v10, %v727_v20  ;;  %vm781_vm11 = vweird.f32 %v1155_v10 }
 0x131   : > { %v768_v36 = vsel %vm767_vm10, %v1153_v18, %v764_v33  ;;  %vm782_vm14 = vmor %vm780_vm13, %vm781_vm11 }
 0x132   : > { %v777_v25 = vsub.f32 1.0, %v776_v12  ;;  %v773_v41 = vsel %vm770_vm12, %v772_v39, %v768_v36 }
 0x133   : > { %v774_v47 = vmul.f32 %v1478_v42, %v773_v41  ;;  %v790_v48 = vmul.f32 %v1480_v43, %v773_v41 }
 0x134   : > { %v778_v37 = vmul.f32 %v1155_v10, %v777_v25 }
 0x136   : > { %v779_v40 = vadd.f32 %v1155_v10, %v778_v37 }
 0x138   : > { %v783_v45 = vsel %vm782_vm14, %v1155_v10, %v779_v40 }
 0x139   : > { %v788_v46 = vsel %vm785_vm15, %v787_v44, %v783_v45 }
 0x13a   : > { %v789_v49 = vmul.f32 %v1484_v51, %v788_v46  ;;  %v791_v50 = vmul.f32 %v1486_v53, %v788_v46 }
 0x13c   : > { %v794_v52 = vpack.c.bf16 %v789_v49, %v774_v47  ;;  %v795_v54 = vpack.c.bf16 %v791_v50, %v790_v48 }
 0x13e   : > { %798 = vst [vmem:[%s1495_s11 + $0x10] sm:$0xff] %v794_v52 }
 0x13f   : > { %799 = vst [vmem:[%s1495_s11 + $0x18] sm:$0xff] %v795_v54 }
 0x140   : > { %1183 = shalt.err (!%p1180_p7)
}
 0x141   : > { %s1220_s4 = smov 128   ;;  %s1221_s8 = smov 256  }
 0x142   : > { %s1222_s9 = smov 8  }
 0x143   : > { %1090 = dma.vmem_to_hbm [thread:$0]  (%p1282_p6), %s814_s16, 512, %s816_s25, %s801_s26, %s1220_s4, %s1221_s8, %s1222_s9  }
 0x144 PF: > { %s830_s10 = sand.u32 1, %s1206_s12   ;;  %p1093_p10 = pnand %p895_p9, %p1286_p8 }
 0x145   : > { %s831_s11 = scalar_lea.sflag [#allocation4], %s830_s10 }
 0x146   : > { %p1094_p11 = pneg %p1093_p10 }
 0x148   : > { %1201 = dma.done.wait (%p1094_p11), %s831_s11, 512  }
 0x149   : > { %1203 = vsyncadd (%p1094_p11), %s831_s11, 4294966784  ;;  %p13_p12 = scmp.ge.s32.totalorder %s1268_s18, 4   ;;  %s1545_s12 = smov %s1210_s13 }
 0x14a   : > { %s1546_s13 = smov %s1214_s14  ;;  %s1547_s14 = smov %s1280_s21 }
 0x14b   : > { %s1548_s15 = smov %s1268_s18  ;;  %15 = sbr.rel (!%p13_p12) target bundleno = 3 (0x3), region = 113 }
 0x150   :  { %837 = vsyncpa [#allocation4], 1 }
 0x151   :  { %839 = vsyncpa [#allocation4 + $0x1], 1 }

// kernel: gpt_forward.2
= control target key start
LH: loop header
LB: loop body
LE: loop exit
PB: predicated region body
PF: predicated region fallthrough
CT: control target
= control target key end

     0   :  { %s9259_s0 = inlined_call_operand.vmem [shape: bf16[2,16,256], index: 0, kind: input, shape index: {}]   ;;  %s9260_s1 = inlined_call_operand.hbm [shape: bf16[2,256,768], index: 1, kind: input, shape index: {}]   ;;  %s9261_s2 = inlined_call_operand.vmem [shape: bf16[2,1,768], index: 2, kind: input, shape index: {}]   ;;  %s9262_s3 = inlined_call_operand.hbm [shape: bf16[2,256,256], index: 3, kind: input, shape index: {}]   ;;  %s9263_s4 = inlined_call_operand.vmem [shape: bf16[2,1,256], index: 4, kind: input, shape index: {}]   ;;  %s9264_s5 = inlined_call_operand.vmem [shape: f32[2,1,256], index: 5, kind: input, shape index: {}]   ;;  %s9265_s6 = inlined_call_operand.vmem [shape: f32[2,1,256], index: 6, kind: input, shape index: {}]   ;;  %s9266_s7 = inlined_call_operand.hbm [shape: bf16[2,256,1024], index: 7, kind: input, shape index: {}]   ;;  %s9267_s8 = inlined_call_operand.vmem [shape: bf16[2,1,1024], index: 8, kind: input, shape index: {}]   ;;  %s9268_s9 = inlined_call_operand.hbm [shape: bf16[2,1024,256], index: 9, kind: input, shape index: {}]   ;;  %s9269_s10 = inlined_call_operand.vmem [shape: bf16[2,1,256], index: 10, kind: input, shape index: {}]   ;;  %s9270_s11 = inlined_call_operand.vmem [shape: f32[2,1,256], index: 11, kind: input, shape index: {}]   ;;  %s9271_s12 = inlined_call_operand.vmem [shape: f32[2,1,256], index: 12, kind: input, shape index: {}]   ;;  %s9272_s13 = inlined_call_operand.vmem [shape: f32[1,256], index: 13, kind: input, shape index: {}]   ;;  %s9273_s14 = inlined_call_operand.vmem [shape: f32[1,256], index: 14, kind: input, shape index: {}]   ;;  %s9274_s15 = inlined_call_operand.vmem [shape: bf16[2,16,256], index: 15, kind: output, shape index: {}]  }
   0x1   :  { %9284 = sst [smem:[#allocation21_spill]] %s9259_s0 }
   0x2   :  { %9285 = sst [smem:[#allocation22_spill]] %s9260_s1 }
   0x3   :  { %9286 = sst [smem:[#allocation23_spill]] %s9261_s2 }
   0x4   :  { %9287 = sst [smem:[#allocation24_spill]] %s9262_s3 }
   0x5   :  { %9288 = sst [smem:[#allocation25_spill]] %s9263_s4 }
   0x6   :  { %9289 = sst [smem:[#allocation26_spill]] %s9264_s5 }
   0x7   :  { %9290 = sst [smem:[#allocation27_spill]] %s9265_s6 }
   0x8   :  { %9291 = sst [smem:[#allocation28_spill]] %s9266_s7 }
   0x9   :  { %9292 = sst [smem:[#allocation29_spill]] %s9267_s8 }
   0xa   :  { %9293 = sst [smem:[#allocation30_spill]] %s9268_s9 }
   0xb   :  { %9294 = sst [smem:[#allocation31_spill]] %s9269_s10 }
   0xc   :  { %9295 = sst [smem:[#allocation32_spill]] %s9270_s11 }
   0xd   :  { %9296 = sst [smem:[#allocation33_spill]] %s9271_s12 }
   0xe   :  { %9297 = sst [smem:[#allocation34_spill]] %s9272_s13 }
   0xf   :  { %9298 = sst [smem:[#allocation35_spill]] %s9273_s14 }
  0x10   :  { %9299 = sst [smem:[#allocation36_spill]] %s9274_s15 }
  0x11   :  { %20 = vsyncpa [#allocation4], 0 }
  0x12   :  { %22 = vsyncpa [#allocation4 + $0x1], 0 }
  0x13   :  { %23 = vsyncpa [#allocation6], 0 }
  0x14   :  { %25 = vsyncpa [#allocation6 + $0x1], 0 }
  0x15   :  { %26 = vsyncpa [#allocation9], 0 }
  0x16   :  { %28 = vsyncpa [#allocation9 + $0x1], 0  ;;  %s7739_s18 = smov 0   ;;  %s7741_s19 = smov 0  }
  0x17   :  { %s7743_s20 = smov 0   ;;  %s7745_s21 = smov 0  }
  0x18   :  { %s7747_s22 = smov 0   ;;  %s7749_s23 = smov 0  }
  0x19   :  { %s7751_s24 = smov 0   ;;  %s7753_s25 = smov 0  }
  0x1a LB: > { %9300 = sst [smem:[#allocation13_spill]] %s7624_s19  ;;  %s9277_s26 = sadd.s32 4294967295, %s7648_s25   ;;  %s7648_s25 = sphi %s7753_s25, %s34_s25   ;;  %s7644_s24 = sphi %s7751_s24, %s9345_s24   ;;  %s7640_s23 = sphi %s7749_s23, %s9344_s23   ;;  %s7636_s22 = sphi %s7747_s22, %s9343_s22   ;;  %s7632_s21 = sphi %s7745_s21, %s9342_s21   ;;  %s7628_s20 = sphi %s7743_s20, %s9341_s20   ;;  %s7624_s19 = sphi %s7741_s19, %s9340_s19   ;;  %s7620_s18 = sphi %s7739_s18, %s9339_s18  }
  0x1b   : > { %9301 = sst [smem:[#allocation14_spill]] %s7628_s20  ;;  %s43_s27 = sadd.s32 1, %s7640_s23 }
  0x1c   : > { %9302 = sst [smem:[#allocation15_spill]] %s7640_s23  ;;  %p44_p0 = scmp.ge.s32.totalorder %s43_s27, 2 }
  0x1d   : > { %9303 = sst [smem:[#allocation16_spill]] %s7644_s24  ;;  %s46_s28 = sadd.s32 1, %s7644_s24 }
  0x1e   : > { %9304 = sst [smem:[#allocation17_spill]] %s7648_s25  ;;  %s79_s29 = sadd.s32 1, %s7628_s20 }
  0x1f   : > { %p86_p1 = scmp.ne.s32.totalorder %s7628_s20, %s7624_s19  ;;  %s9347_s27 = smov (%p44_p0, %s43_s27), 0 }
  0x20   : > { %9305 = sst [smem:[#allocation18_spill]] %s9347_s27  ;;  %s9349_s28 = smov (!%p44_p0, %s46_s28), %s7644_s24 }
  0x21   : > { %s76_s30 = ssub.s32 %s7640_s23, %s9347_s27  ;;  %p87_p2 = scmp.eq.s32.totalorder %s7648_s25, 0 }
  0x22   : > { %p48_p3 = scmp.ge.s32.totalorder %s9349_s28, 2  ;;  %p77_p4 = scmp.eq.s32.totalorder %s76_s30, 0 }
  0x23   : > { %p88_p5 = por %p87_p2, %p86_p1  ;;  %p92_p6 = scmp.ne.s32.totalorder %s7624_s19, %s7620_s18 }
  0x24   : > { %s9351_s28 = smov (%p48_p3, %s9349_s28), 0  ;;  %p93_p7 = scmp.eq.s32.totalorder %s9277_s26, 0 }
  0x25   : > { %9306 = sst [smem:[#allocation19_spill]] %s9351_s28  ;;  %p7342_p8 = scmp.lt.s32.totalorder %s7648_s25, 4 }
  0x26   : > { %s7793_s16 = scalar_select %p77_p4, %s7628_s20, %s79_s29  }
  0x27   : > { %s7799_s17 = sand.u32 1, %s7628_s20   ;;  %p7801_p9 = por %p93_p7, %p92_p6 }
  0x28   : > { %9307 = sst [smem:[#allocation20_spill]] %s7793_s16  ;;  %s513_s27 = sand.u32 1, %s7648_s25  }
  0x29   : > { %p7806_p10 = pnand %p7342_p8, %p88_p5  ;;  %s5362_s18 = sshll.u32 %s7799_s17, 8 }
  0x2a   : > { %s6928_s29 = sshll.u32 %s7640_s23, 8  ;;  %s9310_s3 = sld [smem:[#allocation24_spill]] }
  0x2b   : > { %s517_s20 = scalar_lea.vmem [#allocation5], %s5362_s18  ;;  %p5371_p11 = scmp.ge.s32.totalorder %s7648_s25, 1 }
  0x2c   : > { %s525_s14 = sshll.u32 %s517_s20, 4  ;;  %s7816_s15 = scalar_lea.sflag [#allocation6], %s513_s27  ;;  %s526_s14 = int_to_ptr.vmem [resolvable:$true] %s525_s14 }
  0x2d   : > { %s9279_s12 = smov 128   ;;  %s9280_s11 = smov 8  }
  0x2e   : > { %p626_p12 = scmp.lt.s32.totalorder %s7648_s25, 5  ;;  %s7317_s26 = smul.u32 768, %s7799_s17 }
  0x2f   : > { %s7318_s28 = smul.u32 768, %s7640_s23  ;;  %s9312_s1 = sld [smem:[#allocation22_spill]] }
  0x30   : > { %s522_s16 = scalar_lea.hbm %s9310_s3, %s6928_s29  ;;  %p7825_p13 = pnand %p5371_p11, %p626_p12 }
  0x31   : > { %s523_s13 = sshll.u32 %s522_s16, 4  ;;  %s488_s29 = scalar_lea.vmem [#allocation3], %s7317_s26  ;;  %s524_s13 = int_to_ptr.hbm [resolvable:$true] %s523_s13 }
  0x32   : > { %7335 = dma.hbm_to_vmem [thread:$0]  (!%p7806_p10), %s524_s13, 4096, %s526_s14, %s7816_s15, %s9279_s12, %s9279_s12, %s9280_s11  }
  0x33   : > { %s496_s3 = sshll.u32 %s488_s29, 4  ;;  %s5365_s13 = sshll.u32 %s7799_s17, 10  ;;  %s497_s3 = int_to_ptr.vmem [resolvable:$true] %s496_s3 }
  0x34   : > { %s485_s14 = scalar_lea.sflag [#allocation4], %s7799_s17  ;;  %s7652_s12 = smov 384  }
  0x35   : > { %s493_s18 = scalar_lea.hbm %s9312_s1, %s7318_s28  ;;  %s7653_s11 = smov 24  }
  0x36   : > { %s494_s10 = sshll.u32 %s493_s18, 4  ;;  %s6929_s8 = sshll.u32 %s7640_s23, 10  ;;  %s495_s10 = int_to_ptr.hbm [resolvable:$true] %s494_s10 }
  0x37   : > { %7332 = dma.hbm_to_vmem [thread:$0]  (!%p7806_p10), %s495_s10, 12288, %s497_s3, %s485_s14, %s7652_s12, %s7652_s12, %s7653_s11  }
  0x38   : > { %s9313_s7 = sld [smem:[#allocation28_spill]]  ;;  %s560_s26 = scalar_lea.vmem [#allocation7], %s5365_s13 }
  0x39   : > { %s568_s28 = sshll.u32 %s560_s26, 4  ;;  %s7654_s18 = smov 512   ;;  %s569_s28 = int_to_ptr.vmem [resolvable:$true] %s568_s28 }
  0x3a   : > { %s7655_s29 = smov 32   ;;  %s9314_s9 = sld [smem:[#allocation30_spill]] }
  0x3b   : > { %s589_s11 = scalar_lea.vmem [#allocation8], %s5365_s13  ;;  %s586_s5 = scalar_lea.sflag [#allocation9], %s7799_s17 }
  0x3c   : > { %s597_s12 = sshll.u32 %s589_s11, 4  ;;  %s9315_s6 = smov 8   ;;  %s598_s12 = int_to_ptr.vmem [resolvable:$true] %s597_s12 }
  0x3d   : > { %s9316_s14 = smov 128  }
  0x3e   : > { %s565_s16 = scalar_lea.hbm %s9313_s7, %s6929_s8 }
  0x3f   : > { %s566_s27 = sshll.u32 %s565_s16, 4  ;;  %630 = sbr.rel (%p7825_p13) target bundleno = 2290 (0x8f2), region = 80  ;;  %s567_s27 = int_to_ptr.hbm [resolvable:$true] %s566_s27 }
  0x40   : > { %7338 = dma.hbm_to_vmem [thread:$0]  (!%p7806_p10), %s567_s27, 16384, %s569_s28, %s7816_s15, %s7654_s18, %s7654_s18, %s7655_s29  }
  0x41   : > { %s594_s3 = scalar_lea.hbm %s9314_s9, %s6929_s8  ;;  %s632_s15 = sand.u32 (!%p7825_p13), 1, %s7624_s19  }
  0x42   : > { %s595_s10 = sshll.u32 %s594_s3, 4  ;;  %s7319_s16 = smul.u32 (!%p7825_p13), 768, %s632_s15  ;;  %s596_s10 = int_to_ptr.hbm [resolvable:$true] %s595_s10 }
  0x43   : > { %7341 = dma.hbm_to_vmem [thread:$0]  (!%p7806_p10), %s596_s10, 16384, %s598_s12, %s586_s5, %s9316_s14, %s9316_s14, %s9315_s6  }
  0x44   : > { %s633_s1 = scalar_lea.sflag [#allocation4], %s632_s15  ;;  %s7857_s4 = scalar_lea.vmem [#allocation3], %s7319_s16 }
  0x45   : > { %7607 = dma.done.wait (%p7801_p9), %s633_s1, 12288  }
  0x46   : > { %7609 = vsyncadd (%p7801_p9), %s633_s1, 4294955008  ;;  %s9317_s8 = sadd.s32 4294967295, %s7648_s25   ;;  %s5372_s30 = sshll.u32 %s632_s15, 8 }
  0x47   : > { %s642_s17 = sand.u32 1, %s9317_s8   ;;  %s7865_s20 = scalar_lea.vmem [#allocation5], %s5372_s30 }
  0x48   : > { %s643_s13 = scalar_lea.sflag [#allocation6], %s642_s17 }
  0x49   : > { %7611 = dma.done.wait (%p7801_p9), %s643_s13, 20480  }
  0x4a   : > { %7613 = vsyncadd (%p7801_p9), %s643_s13, 4294946816  ;;  %s5373_s26 = sshll.u32 %s632_s15, 10  ;;  %s663_s27 = scalar_lea.sflag [#allocation9], %s632_s15 }
  0x4b   : > { %s7871_s28 = scalar_lea.vmem [#allocation7], %s5373_s26  ;;  %s7873_s18 = scalar_lea.vmem [#allocation8], %s5373_s26 }
  0x4c   : > { %7615 = dma.done.wait (%p7801_p9), %s663_s27, 16384  }
  0x4d   : > { %7617 = vsyncadd (%p7801_p9), %s663_s27, 4294950912  ;;  %p766_p0 = scmp.lt.s32.totalorder %s7636_s22, 1  ;;  %p771_p1 = scmp.lt.s32.totalorder %s7632_s21, 1 }
  0x4e   : > { %s9318_s0 = sld [smem:[#allocation21_spill]]  ;;  %p5386_p2 = scmp.ne.s32.totalorder %s7632_s21, 0 }
  0x4f   : > { %s9353_s22 = smov (!%p766_p0, %s7636_s22), 1  ;;  %s9319_s2 = sld [smem:[#allocation23_spill]] }
  0x50   : > { %s772_s29 = scalar_select %p771_p1, %s7632_s21, 1 }
  0x51   : > { %s6931_s3 = sshll.u32 %s9353_s22, 4  ;;  %s9324_s15 = sld [smem:[#allocation31_spill]] }
  0x52   : > { %s7320_s5 = smul.u32 6, %s772_s29  ;;  %s7886_s6 = sshll.u32 %s772_s29, 1 }
  0x53   : > { %s5380_s24 = sshll.u32 %s772_s29, 3  ;;  %s9323_s29 = sld [smem:[#allocation29_spill]] }
  0x54   : > { %s770_s12 = scalar_lea.vmem %s9318_s0, %s6931_s3  ;;  %s9322_s0 = sld [smem:[#allocation27_spill]] }
  0x55   : > { %s7891_s16 = scalar_lea.vmem %s9319_s2, %s7320_s5  ;;  %s9325_s1 = sld [smem:[#allocation32_spill]] }
  0x56   : > { %s9326_s13 = sld [smem:[#allocation33_spill]] }
  0x57   : > { %s794_s2 = scalar_lea.vmem %s9324_s15, %s7886_s6 }
  0x59   : > { %s7908_s19 = scalar_lea.vmem %s9323_s29, %s5380_s24 }
  0x5a   : > { %s786_s7 = scalar_lea.vmem %s9322_s0, %s7886_s6  ;;  %s9327_s0 = sld [smem:[#allocation36_spill]] }
  0x5b   : > { %s798_s8 = scalar_lea.vmem %s9325_s1, %s7886_s6 }
  0x5c   : > { %s802_s26 = scalar_lea.vmem %s9326_s13, %s7886_s6  ;;  %812 = sbr.rel (%p5386_p2) target bundleno = 104 (0x68), region = 100 }
  0x60   : > { %s7925_s11 = scalar_lea.vmem %s9327_s0, %s6931_s3 }
  0x61   : > { %v813_v0 = vld [vmem:[%s770_s12] sm:$0xff]  ;;  %v814_v1 = vld [vmem:[%s770_s12 + $0x8] sm:$0xff] }
  0x62   : > { %v815_v2 = vunpack.c.l.bf16 %v813_v0  ;;  %v816_v3 = vunpack.c.h.bf16 %v813_v0  ;;  %v817_v4 = vunpack.c.l.bf16 %v814_v1  ;;  %v818_v5 = vunpack.c.h.bf16 %v814_v1 }
  0x64   : > { %819 = vst [vmem:[#allocation2 + $0x10] sm:$0xff] %v815_v2 }
  0x65   : > { %820 = vst [vmem:[#allocation2] sm:$0xff] %v816_v3 }
  0x66   : > { %821 = vst [vmem:[#allocation2 + $0x18] sm:$0xff] %v817_v4 }
  0x67   : > { %822 = vst [vmem:[#allocation2 + $0x8] sm:$0xff] %v818_v5 }
  0x68 PF: > { %v5557_v6 = vld [vmem:[%s7857_s4 + $0x150] sm:$0xf]  ;;  %v6978_v7 = vld [vmem:[%s7857_s4 + $0x164] sm:$0xf0]  ;;  %v6975_v11 = vld [vmem:[%s7857_s4 + $0x154] sm:$0xf] }
  0x69   : > { %v5749_v8 = vld [vmem:[%s7857_s4 + $0x2d0] sm:$0xf]  ;;  %v5558_v9 = vor.u32 %v6978_v7, %v5557_v6  ;;  %v7026_v10 = vld [vmem:[%s7857_s4 + $0x2e4] sm:$0xf0]  ;;  %v5559_v12 = vld [vmem:[%s7857_s4 + $0x168] sm:$0xf0] }
  0x6a   : > { %v5750_v13 = vor.u32 %v7026_v10, %v5749_v8  ;;  %v5562_v14 = vor.u32 %v6975_v11, %v5559_v12  ;;  %v7023_v15 = vld [vmem:[%s7857_s4 + $0x2d4] sm:$0xf]  ;;  %v5751_v16 = vld [vmem:[%s7857_s4 + $0x2e8] sm:$0xf0]  ;;  %v5533_v17 = vld [vmem:[%s7857_s4 + $0x120] sm:$0xf] }
  0x6b   : > { %1428 = vmatpush.bf16.msra.mxu0 %v5558_v9  ;;  %v5754_v18 = vor.u32 %v7023_v15, %v5751_v16  ;;  %v6972_v19 = vld [vmem:[%s7857_s4 + $0x134] sm:$0xf0]  ;;  %v5725_v20 = vld [vmem:[%s7857_s4 + $0x2a0] sm:$0xf]  ;;  %v6969_v24 = vld [vmem:[%s7857_s4 + $0x124] sm:$0xf] }
  0x6c   : > { %v7020_v21 = vld [vmem:[%s7857_s4 + $0x2b4] sm:$0xf0]  ;;  %1442 = vmatpush.bf16.msra.mxu1 %v5750_v13  ;;  %1456 = vmatpush.bf16.msra.mxu2 %v5562_v14  ;;  %v5534_v22 = vor.u32 %v6972_v19, %v5533_v17  ;;  %v5535_v25 = vld [vmem:[%s7857_s4 + $0x138] sm:$0xf0]  ;;  %v7017_v26 = vld [vmem:[%s7857_s4 + $0x2a4] sm:$0xf] }
  0x6d   : > { %v5726_v23 = vor.u32 %v7020_v21, %v5725_v20  ;;  %1470 = vmatpush.bf16.msra.mxu3 %v5754_v18  ;;  %v5538_v27 = vor.u32 %v6969_v24, %v5535_v25  ;;  %v5727_v28 = vld [vmem:[%s7857_s4 + $0x2b8] sm:$0xf0]  ;;  %v5509_v29 = vld [vmem:[%s7857_s4 + $0xf0] sm:$0xf]  ;;  %v6966_v30 = vld [vmem:[%s7857_s4 + $0x104] sm:$0xf0] }
  0x6e   : > { %v5730_v31 = vor.u32 %v7017_v26, %v5727_v28  ;;  %v5701_v32 = vld [vmem:[%s7857_s4 + $0x270] sm:$0xf]  ;;  %v7014_v33 = vld [vmem:[%s7857_s4 + $0x284] sm:$0xf0]  ;;  %v6963_v34 = vld [vmem:[%s7857_s4 + $0xf4] sm:$0xf]  ;;  %v5510_v35 = vor.u32 %v6966_v30, %v5509_v29 }
  0x6f   : > { %1429 = vmatpush.bf16.msra.mxu0 %v5534_v22  ;;  %v5511_v36 = vld [vmem:[%s7857_s4 + $0x108] sm:$0xf0]  ;;  %v7011_v37 = vld [vmem:[%s7857_s4 + $0x274] sm:$0xf]  ;;  %v5702_v39 = vor.u32 %v7014_v33, %v5701_v32  ;;  %v5485_v41 = vld [vmem:[%s7857_s4 + $0xc0] sm:$0xf] }
  0x70   : > { %v5703_v38 = vld [vmem:[%s7857_s4 + $0x288] sm:$0xf0]  ;;  %1443 = vmatpush.bf16.msra.mxu1 %v5726_v23  ;;  %1457 = vmatpush.bf16.msra.mxu2 %v5538_v27  ;;  %v5514_v40 = vor.u32 %v6963_v34, %v5511_v36  ;;  %v6960_v42 = vld [vmem:[%s7857_s4 + $0xd4] sm:$0xf0]  ;;  %v5677_v43 = vld [vmem:[%s7857_s4 + $0x240] sm:$0xf] }
  0x71   : > { %1471 = vmatpush.bf16.msra.mxu3 %v5730_v31  ;;  %v5706_v44 = vor.u32 %v7011_v37, %v5703_v38  ;;  %v7008_v45 = vld [vmem:[%s7857_s4 + $0x254] sm:$0xf0]  ;;  %v6957_v46 = vld [vmem:[%s7857_s4 + $0xc4] sm:$0xf]  ;;  %v5487_v47 = vld [vmem:[%s7857_s4 + $0xd8] sm:$0xf0]  ;;  %v5486_v50 = vor.u32 %v6960_v42, %v5485_v41 }
  0x72   : > { %v7005_v48 = vld [vmem:[%s7857_s4 + $0x244] sm:$0xf]  ;;  %v5679_v49 = vld [vmem:[%s7857_s4 + $0x258] sm:$0xf0]  ;;  %v5678_v51 = vor.u32 %v7008_v45, %v5677_v43  ;;  %v5490_v52 = vor.u32 %v6957_v46, %v5487_v47  ;;  %v5461_v53 = vld [vmem:[%s7857_s4 + $0x90] sm:$0xf] }
  0x73   : > { %1430 = vmatpush.bf16.msra.mxu0 %v5510_v35  ;;  %v6954_v54 = vld [vmem:[%s7857_s4 + $0xa4] sm:$0xf0]  ;;  %v5653_v55 = vld [vmem:[%s7857_s4 + $0x210] sm:$0xf]  ;;  %v5682_v56 = vor.u32 %v7005_v48, %v5679_v49  ;;  %v6951_v58 = vld [vmem:[%s7857_s4 + $0x94] sm:$0xf] }
  0x74   : > { %1444 = vmatpush.bf16.msra.mxu1 %v5702_v39  ;;  %1458 = vmatpush.bf16.msra.mxu2 %v5514_v40  ;;  %v7002_v57 = vld [vmem:[%s7857_s4 + $0x224] sm:$0xf0]  ;;  %v5463_v59 = vld [vmem:[%s7857_s4 + $0xa8] sm:$0xf0]  ;;  %v6999_v60 = vld [vmem:[%s7857_s4 + $0x214] sm:$0xf]  ;;  %v5462_v62 = vor.u32 %v6954_v54, %v5461_v53 }
  0x75   : > { %1472 = vmatpush.bf16.msra.mxu3 %v5706_v44  ;;  %v5655_v61 = vld [vmem:[%s7857_s4 + $0x228] sm:$0xf0]  ;;  %v5654_v63 = vor.u32 %v7002_v57, %v5653_v55  ;;  %v5466_v0 = vor.u32 %v6951_v58, %v5463_v59  ;;  %v5437_v1 = vld [vmem:[%s7857_s4 + $0x60] sm:$0xf]  ;;  %v6948_v2 = vld [vmem:[%s7857_s4 + $0x74] sm:$0xf0] }
  0x76   : > { %v5629_v3 = vld [vmem:[%s7857_s4 + $0x1e0] sm:$0xf]  ;;  %v5658_v4 = vor.u32 %v6999_v60, %v5655_v61  ;;  %v6996_v5 = vld [vmem:[%s7857_s4 + $0x1f4] sm:$0xf0]  ;;  %v6945_v6 = vld [vmem:[%s7857_s4 + $0x64] sm:$0xf]  ;;  %v5438_v10 = vor.u32 %v6948_v2, %v5437_v1 }
  0x77   : > { %1431 = vmatpush.bf16.msra.mxu0 %v5486_v50  ;;  %v5439_v7 = vld [vmem:[%s7857_s4 + $0x78] sm:$0xf0]  ;;  %v6993_v8 = vld [vmem:[%s7857_s4 + $0x1e4] sm:$0xf]  ;;  %v5630_v11 = vor.u32 %v6996_v5, %v5629_v3  ;;  %v5413_v13 = vld [vmem:[%s7857_s4 + $0x30] sm:$0xf] }
  0x78   : > { %1445 = vmatpush.bf16.msra.mxu1 %v5678_v51  ;;  %1459 = vmatpush.bf16.msra.mxu2 %v5490_v52  ;;  %v5631_v9 = vld [vmem:[%s7857_s4 + $0x1f8] sm:$0xf0]  ;;  %v5442_v12 = vor.u32 %v6945_v6, %v5439_v7  ;;  %v6942_v14 = vld [vmem:[%s7857_s4 + $0x44] sm:$0xf0]  ;;  %v5605_v15 = vld [vmem:[%s7857_s4 + $0x1b0] sm:$0xf] }
  0x79   : > { %1473 = vmatpush.bf16.msra.mxu3 %v5682_v56  ;;  %v5634_v16 = vor.u32 %v6993_v8, %v5631_v9  ;;  %v6990_v17 = vld [vmem:[%s7857_s4 + $0x1c4] sm:$0xf0]  ;;  %v6939_v18 = vld [vmem:[%s7857_s4 + $0x34] sm:$0xf]  ;;  %v5415_v19 = vld [vmem:[%s7857_s4 + $0x48] sm:$0xf0]  ;;  %v5414_v22 = vor.u32 %v6942_v14, %v5413_v13 }
  0x7a   : > { %v6987_v20 = vld [vmem:[%s7857_s4 + $0x1b4] sm:$0xf]  ;;  %v5607_v21 = vld [vmem:[%s7857_s4 + $0x1c8] sm:$0xf0]  ;;  %v5389_v23 = vld [vmem:[%s7857_s4] sm:$0xf]  ;;  %v5606_v26 = vor.u32 %v6990_v17, %v5605_v15  ;;  %v5418_v27 = vor.u32 %v6939_v18, %v5415_v19 }
  0x7b   : > { %1432 = vmatpush.bf16.msra.mxu0 %v5462_v62  ;;  %v6936_v24 = vld [vmem:[%s7857_s4 + $0x14] sm:$0xf0]  ;;  %v5581_v25 = vld [vmem:[%s7857_s4 + $0x180] sm:$0xf]  ;;  %v6933_v29 = vld [vmem:[%s7857_s4 + $0x4] sm:$0xf]  ;;  %v5610_v31 = vor.u32 %v6987_v20, %v5607_v21 }
  0x7c   : > { %1446 = vmatpush.bf16.msra.mxu1 %v5654_v63  ;;  %1460 = vmatpush.bf16.msra.mxu2 %v5466_v0  ;;  %v6984_v28 = vld [vmem:[%s7857_s4 + $0x194] sm:$0xf0]  ;;  %v5391_v30 = vld [vmem:[%s7857_s4 + $0x18] sm:$0xf0]  ;;  %v6981_v32 = vld [vmem:[%s7857_s4 + $0x184] sm:$0xf]  ;;  %v5390_v38 = vor.u32 %v6936_v24, %v5389_v23 }
  0x7d   : > { %1474 = vmatpush.bf16.msra.mxu3 %v5658_v4  ;;  %v5583_v33 = vld [vmem:[%s7857_s4 + $0x198] sm:$0xf0]  ;;  %v5565_v34 = vld [vmem:[%s7857_s4 + $0x158] sm:$0xf]  ;;  %v6979_v35 = vld [vmem:[%s7857_s4 + $0x16c] sm:$0xf0]  ;;  %v5582_v42 = vor.u32 %v6984_v28, %v5581_v25  ;;  %v5394_v43 = vor.u32 %v6933_v29, %v5391_v30 }
  0x7e   : > { %v5757_v36 = vld [vmem:[%s7857_s4 + $0x2d8] sm:$0xf]  ;;  %v7027_v37 = vld [vmem:[%s7857_s4 + $0x2ec] sm:$0xf0]  ;;  %v6976_v39 = vld [vmem:[%s7857_s4 + $0x15c] sm:$0xf]  ;;  %v5586_v47 = vor.u32 %v6981_v32, %v5583_v33  ;;  %v5566_v48 = vor.u32 %v6979_v35, %v5565_v34 }
  0x7f   : > { %1433 = vmatpush.bf16.msra.mxu0 %v5438_v10  ;;  %v5567_v40 = vld [vmem:[%s7857_s4 + $0x170] sm:$0xf0]  ;;  %v7024_v41 = vld [vmem:[%s7857_s4 + $0x2dc] sm:$0xf]  ;;  %v824_v49 = vld [vmem:[#allocation2] sm:$0xff]  ;;  %v5758_v51 = vor.u32 %v7027_v37, %v5757_v36  ;;  %vm1597_vm0 = vcmask 1047556  }
  0x80   : > { %1447 = vmatpush.bf16.msra.mxu1 %v5630_v11  ;;  %1461 = vmatpush.bf16.msra.mxu2 %v5442_v12  ;;  %v5759_v44 = vld [vmem:[%s7857_s4 + $0x2f0] sm:$0xf0]  ;;  %v825_v46 = vld [vmem:[#allocation2 + $0x18] sm:$0xff]  ;;  %v826_v50 = vld [vmem:[#allocation2 + $0x8] sm:$0xff]  ;;  %v5570_v52 = vor.u32 %v6976_v39, %v5567_v40  ;;  %vm2216_vm2 = vcmask 130048   ;;  %s9328_s25 = sld [smem:[#allocation25_spill]] }
  0x81   : > { %1475 = vmatpush.bf16.msra.mxu3 %v5634_v16  ;;  %v823_v45 = vld [vmem:[#allocation2 + $0x10] sm:$0xff]  ;;  %v5541_v53 = vld [vmem:[%s7857_s4 + $0x128] sm:$0xf]  ;;  %v6973_v54 = vld [vmem:[%s7857_s4 + $0x13c] sm:$0xf0]  ;;  %v5762_v56 = vor.u32 %v7024_v41, %v5759_v44  ;;  %v8008_v61 = vpack.c.bf16 %v826_v50, %v824_v49  ;;  %s9330_s12 = sld [smem:[#allocation26_spill]] }
  0x82   : > { %v5733_v55 = vld [vmem:[%s7857_s4 + $0x2a8] sm:$0xf]  ;;  %v8003_v57 = vpack.c.bf16 %v825_v46, %v823_v45  ;;  %v7021_v58 = vld [vmem:[%s7857_s4 + $0x2bc] sm:$0xf0]  ;;  %v6970_v59 = vld [vmem:[%s7857_s4 + $0x12c] sm:$0xf]  ;;  %v5542_v0 = vor.u32 %v6973_v54, %v5541_v53 }
  0x83   : > { %1434 = vmatpush.bf16.msra.mxu0 %v5414_v22  ;;  %v5543_v60 = vld [vmem:[%s7857_s4 + $0x140] sm:$0xf0]  ;;  %v7018_v62 = vld [vmem:[%s7857_s4 + $0x2ac] sm:$0xf]  ;;  %v5734_v1 = vor.u32 %v7021_v58, %v5733_v55  ;;  %v5517_v3 = vld [vmem:[%s7857_s4 + $0xf8] sm:$0xf] }
  0x84   : > { %1448 = vmatpush.bf16.msra.mxu1 %v5606_v26  ;;  %1462 = vmatpush.bf16.msra.mxu2 %v5418_v27  ;;  %v5735_v63 = vld [vmem:[%s7857_s4 + $0x2c0] sm:$0xf0]  ;;  %v5546_v2 = vor.u32 %v6970_v59, %v5543_v60  ;;  %v6967_v4 = vld [vmem:[%s7857_s4 + $0x10c] sm:$0xf0]  ;;  %v5709_v5 = vld [vmem:[%s7857_s4 + $0x278] sm:$0xf] }
  0x85   : > { %1476 = vmatpush.bf16.msra.mxu3 %v5610_v31  ;;  %v5738_v6 = vor.u32 %v7018_v62, %v5735_v63  ;;  %v7015_v7 = vld [vmem:[%s7857_s4 + $0x28c] sm:$0xf0]  ;;  %v6964_v8 = vld [vmem:[%s7857_s4 + $0xfc] sm:$0xf]  ;;  %v5519_v9 = vld [vmem:[%s7857_s4 + $0x110] sm:$0xf0]  ;;  %v5518_v12 = vor.u32 %v6967_v4, %v5517_v3 }
  0x86   : > { %v7012_v10 = vld [vmem:[%s7857_s4 + $0x27c] sm:$0xf]  ;;  %v5711_v11 = vld [vmem:[%s7857_s4 + $0x290] sm:$0xf0]  ;;  %v5710_v13 = vor.u32 %v7015_v7, %v5709_v5  ;;  %v5522_v14 = vor.u32 %v6964_v8, %v5519_v9  ;;  %v5493_v15 = vld [vmem:[%s7857_s4 + $0xc8] sm:$0xf] }
  0x87   : > { %1435 = vmatpush.bf16.msra.mxu0 %v5390_v38  ;;  %v6961_v16 = vld [vmem:[%s7857_s4 + $0xdc] sm:$0xf0]  ;;  %v5685_v17 = vld [vmem:[%s7857_s4 + $0x248] sm:$0xf]  ;;  %v5714_v18 = vor.u32 %v7012_v10, %v5711_v11  ;;  %v6958_v20 = vld [vmem:[%s7857_s4 + $0xcc] sm:$0xf]  ;;  %s9331_s24 = scalar_lea.vmem %s9330_s12, %s7886_s6 }
  0x88   : > { %1449 = vmatpush.bf16.msra.mxu1 %v5582_v42  ;;  %1463 = vmatpush.bf16.msra.mxu2 %v5394_v43  ;;  %v7009_v19 = vld [vmem:[%s7857_s4 + $0x25c] sm:$0xf0]  ;;  %v5495_v21 = vld [vmem:[%s7857_s4 + $0xe0] sm:$0xf0]  ;;  %v7006_v22 = vld [vmem:[%s7857_s4 + $0x24c] sm:$0xf]  ;;  %v5494_v24 = vor.u32 %v6961_v16, %v5493_v15 }
  0x89   : > { %1477 = vmatpush.bf16.msra.mxu3 %v5586_v47  ;;  %v5687_v23 = vld [vmem:[%s7857_s4 + $0x260] sm:$0xf0]  ;;  %v5686_v25 = vor.u32 %v7009_v19, %v5685_v17  ;;  %v5498_v26 = vor.u32 %v6958_v20, %v5495_v21  ;;  %v5469_v27 = vld [vmem:[%s7857_s4 + $0x98] sm:$0xf]  ;;  %v6955_v28 = vld [vmem:[%s7857_s4 + $0xac] sm:$0xf0] }
  0x8a   : > { %1436 = vmatmul.bf16.vlgmr.msra.gmra.mxu0 %v8003_v57  ;;  %v5661_v29 = vld [vmem:[%s7857_s4 + $0x218] sm:$0xf]  ;;  %v5690_v30 = vor.u32 %v7006_v22, %v5687_v23  ;;  %v7003_v31 = vld [vmem:[%s7857_s4 + $0x22c] sm:$0xf0]  ;;  %v6952_v32 = vld [vmem:[%s7857_s4 + $0x9c] sm:$0xf]  ;;  %v5470_v36 = vor.u32 %v6955_v28, %v5469_v27 }
  0x8b   : > { %1484 = vmatpush.bf16.msrb.mxu0 %v5566_v48  ;;  %1464 = vmatmul.bf16.vlgmr.msra.gmra.mxu2 %v8003_v57  ;;  %v5471_v33 = vld [vmem:[%s7857_s4 + $0xb0] sm:$0xf0]  ;;  %v7000_v34 = vld [vmem:[%s7857_s4 + $0x21c] sm:$0xf]  ;;  %v5662_v37 = vor.u32 %v7003_v31, %v5661_v29  ;;  %v5445_v39 = vld [vmem:[%s7857_s4 + $0x68] sm:$0xf] }
  0x8c   : > { %1498 = vmatpush.bf16.msrb.mxu1 %v5758_v51  ;;  %1512 = vmatpush.bf16.msrb.mxu2 %v5570_v52  ;;  %v5663_v35 = vld [vmem:[%s7857_s4 + $0x230] sm:$0xf0]  ;;  %v5474_v38 = vor.u32 %v6952_v32, %v5471_v33  ;;  %v6949_v40 = vld [vmem:[%s7857_s4 + $0x7c] sm:$0xf0]  ;;  %v5637_v41 = vld [vmem:[%s7857_s4 + $0x1e8] sm:$0xf] }
  0x8d   : > { %1526 = vmatpush.bf16.msrb.mxu3 %v5762_v56  ;;  %1450 = vmatmul.bf16.vlgmr.msra.gmra.mxu1 %v8008_v61  ;;  %v5666_v42 = vor.u32 %v7000_v34, %v5663_v35  ;;  %v6997_v43 = vld [vmem:[%s7857_s4 + $0x1fc] sm:$0xf0]  ;;  %v6946_v44 = vld [vmem:[%s7857_s4 + $0x6c] sm:$0xf]  ;;  %v5447_v45 = vld [vmem:[%s7857_s4 + $0x80] sm:$0xf0]  ;;  %v5446_v48 = vor.u32 %v6949_v40, %v5445_v39 }
  0x8e   : > { %1478 = vmatmul.bf16.vlgmr.msra.gmra.mxu3 %v8008_v61  ;;  %v6994_v46 = vld [vmem:[%s7857_s4 + $0x1ec] sm:$0xf]  ;;  %v5639_v47 = vld [vmem:[%s7857_s4 + $0x200] sm:$0xf0]  ;;  %v5638_v49 = vor.u32 %v6997_v43, %v5637_v41  ;;  %v5450_v50 = vor.u32 %v6946_v44, %v5447_v45  ;;  %v5421_v51 = vld [vmem:[%s7857_s4 + $0x38] sm:$0xf] }
  0x8f   : > { %1485 = vmatpush.bf16.msrb.mxu0 %v5542_v0  ;;  %v6943_v52 = vld [vmem:[%s7857_s4 + $0x4c] sm:$0xf0]  ;;  %v5613_v53 = vld [vmem:[%s7857_s4 + $0x1b8] sm:$0xf]  ;;  %v5642_v54 = vor.u32 %v6994_v46, %v5639_v47  ;;  %v6940_v56 = vld [vmem:[%s7857_s4 + $0x3c] sm:$0xf] }
  0x90   : > { %1499 = vmatpush.bf16.msrb.mxu1 %v5734_v1  ;;  %1513 = vmatpush.bf16.msrb.mxu2 %v5546_v2  ;;  %v6991_v55 = vld [vmem:[%s7857_s4 + $0x1cc] sm:$0xf0]  ;;  %v5423_v58 = vld [vmem:[%s7857_s4 + $0x50] sm:$0xf0]  ;;  %v6988_v59 = vld [vmem:[%s7857_s4 + $0x1bc] sm:$0xf]  ;;  %v5422_v62 = vor.u32 %v6943_v52, %v5421_v51 }
  0x91   : > { %1527 = vmatpush.bf16.msrb.mxu3 %v5738_v6  ;;  %v5615_v60 = vld [vmem:[%s7857_s4 + $0x1d0] sm:$0xf0]  ;;  %v5614_v63 = vor.u32 %v6991_v55, %v5613_v53  ;;  %v5426_v0 = vor.u32 %v6940_v56, %v5423_v58  ;;  %v5397_v1 = vld [vmem:[%s7857_s4 + $0x8] sm:$0xf]  ;;  %v6937_v2 = vld [vmem:[%s7857_s4 + $0x1c] sm:$0xf0] }
  0x92   : > { %v5589_v3 = vld [vmem:[%s7857_s4 + $0x188] sm:$0xf]  ;;  %v5618_v4 = vor.u32 %v6988_v59, %v5615_v60  ;;  %v6985_v5 = vld [vmem:[%s7857_s4 + $0x19c] sm:$0xf0]  ;;  %v6934_v6 = vld [vmem:[%s7857_s4 + $0xc] sm:$0xf]  ;;  %v5398_v10 = vor.u32 %v6937_v2, %v5397_v1 }
  0x93   : > { %1486 = vmatpush.bf16.msrb.mxu0 %v5518_v12  ;;  %v5399_v7 = vld [vmem:[%s7857_s4 + $0x20] sm:$0xf0]  ;;  %v6982_v8 = vld [vmem:[%s7857_s4 + $0x18c] sm:$0xf]  ;;  %v5590_v11 = vor.u32 %v6985_v5, %v5589_v3  ;;  %v5575_v15 = vld [vmem:[%s7857_s4 + $0x178] sm:$0xf0] }
  0x94   : > { %1500 = vmatpush.bf16.msrb.mxu1 %v5710_v13  ;;  %1514 = vmatpush.bf16.msrb.mxu2 %v5522_v14  ;;  %v5591_v9 = vld [vmem:[%s7857_s4 + $0x1a0] sm:$0xf0]  ;;  %v5402_v12 = vor.u32 %v6934_v6, %v5399_v7  ;;  %v5573_v20 = vld [vmem:[%s7857_s4 + $0x160] sm:$0xf]  ;;  %v6980_v21 = vld [vmem:[%s7857_s4 + $0x174] sm:$0xf0] }
  0x95   : > { %1528 = vmatpush.bf16.msrb.mxu3 %v5714_v18  ;;  %v5594_v13 = vor.u32 %v6982_v8, %v5591_v9  ;;  %v6977_v14 = vld [vmem:[%s7857_s4 + $0x164] sm:$0xf]  ;;  %v5767_v18 = vld [vmem:[%s7857_s4 + $0x2f8] sm:$0xf0]  ;;  %v6971_v22 = vld [vmem:[%s7857_s4 + $0x134] sm:$0xf]  ;;  %v5574_v23 = vor.u32 %v6980_v21, %v5573_v20 }
  0x96   : > { %v5578_v16 = vor.u32 %v6977_v14, %v5575_v15  ;;  %v7025_v17 = vld [vmem:[%s7857_s4 + $0x2e4] sm:$0xf]  ;;  %v7028_v27 = vld [vmem:[%s7857_s4 + $0x2f4] sm:$0xf0]  ;;  %v7019_v28 = vld [vmem:[%s7857_s4 + $0x2b4] sm:$0xf] }
  0x97   : > { %1487 = vmatpush.bf16.msrb.mxu0 %v5494_v24  ;;  %v5770_v19 = vor.u32 %v7025_v17, %v5767_v18  ;;  %v5551_v24 = vld [vmem:[%s7857_s4 + $0x148] sm:$0xf0]  ;;  %v8080_v29 = vld [vmem:[%s7891_s16] sm:$0x3f]  ;;  %v5549_v33 = vld [vmem:[%s7857_s4 + $0x130] sm:$0xf] }
  0x98   : > { %1501 = vmatpush.bf16.msrb.mxu1 %v5686_v25  ;;  %1515 = vmatpush.bf16.msrb.mxu2 %v5498_v26  ;;  %v5554_v25 = vor.u32 %v6971_v22, %v5551_v24  ;;  %v5765_v26 = vld [vmem:[%s7857_s4 + $0x2e0] sm:$0xf]  ;;  %v5743_v31 = vld [vmem:[%s7857_s4 + $0x2c8] sm:$0xf0]  ;;  %v6974_v34 = vld [vmem:[%s7857_s4 + $0x144] sm:$0xf0] }
  0x99   : > { %1529 = vmatpush.bf16.msrb.mxu3 %v5690_v30  ;;  %v5766_v30 = vor.u32 %v7028_v27, %v5765_v26  ;;  %v5746_v32 = vor.u32 %v7019_v28, %v5743_v31  ;;  %v6965_v35 = vld [vmem:[%s7857_s4 + $0x104] sm:$0xf]  ;;  %v5741_v39 = vld [vmem:[%s7857_s4 + $0x2b0] sm:$0xf]  ;;  %v7022_v40 = vld [vmem:[%s7857_s4 + $0x2c4] sm:$0xf0] }
  0x9a   : > { %v7013_v41 = vld [vmem:[%s7857_s4 + $0x284] sm:$0xf]  ;;  %v5742_v43 = vor.u32 %v7022_v40, %v5741_v39  ;;  %v5719_v44 = vld [vmem:[%s7857_s4 + $0x298] sm:$0xf0]  ;;  %v5525_v46 = vld [vmem:[%s7857_s4 + $0x100] sm:$0xf] }
  0x9b   : > { %1488 = vmatpush.bf16.msrb.mxu0 %v5470_v36  ;;  %v5550_v36 = vor.u32 %v6974_v34, %v5549_v33  ;;  %v5722_v45 = vor.u32 %v7013_v41, %v5719_v44  ;;  %v6968_v47 = vld [vmem:[%s7857_s4 + $0x114] sm:$0xf0]  ;;  %v5717_v52 = vld [vmem:[%s7857_s4 + $0x280] sm:$0xf]  ;;  %v5695_v58 = vld [vmem:[%s7857_s4 + $0x268] sm:$0xf0] }
  0x9c   : > { %1502 = vmatpush.bf16.msrb.mxu1 %v5662_v37  ;;  %1516 = vmatpush.bf16.msrb.mxu2 %v5474_v38  ;;  %v5527_v37 = vld [vmem:[%s7857_s4 + $0x118] sm:$0xf0]  ;;  %v7016_v53 = vld [vmem:[%s7857_s4 + $0x294] sm:$0xf0]  ;;  %v5501_v60 = vld [vmem:[%s7857_s4 + $0xd0] sm:$0xf] }
  0x9d   : > { %1530 = vmatpush.bf16.msrb.mxu3 %v5666_v42  ;;  %v5530_v38 = vor.u32 %v6965_v35, %v5527_v37  ;;  %v8091_v42 = vunpack.c.l.bf16 %v8080_v29  ;;  %v5718_v56 = vor.u32 %v7016_v53, %v5717_v52  ;;  %v5479_v1 = vld [vmem:[%s7857_s4 + $0xb8] sm:$0xf0]  ;;  %v5693_v3 = vld [vmem:[%s7857_s4 + $0x250] sm:$0xf]  ;;  %v7001_v5 = vld [vmem:[%s7857_s4 + $0x224] sm:$0xf] }
  0x9e   : > { %v5671_v9 = vld [vmem:[%s7857_s4 + $0x238] sm:$0xf0]  ;;  %v6956_v14 = vld [vmem:[%s7857_s4 + $0xb4] sm:$0xf0]  ;;  %v6947_v15 = vld [vmem:[%s7857_s4 + $0x74] sm:$0xf] }
  0x9f   : > { %1489 = vmatpush.bf16.msrb.mxu0 %v5446_v48  ;;  %v6959_v48 = vld [vmem:[%s7857_s4 + $0xd4] sm:$0xf]  ;;  %v930_v55 = vperm.slane %v8091_v42, 0  ;;  %v931_v7 = vperm.slane %v8091_v42, 2  ;;  %v5455_v17 = vld [vmem:[%s7857_s4 + $0x88] sm:$0xf0] }
  0xa0   : > { %1503 = vmatpush.bf16.msrb.mxu1 %v5638_v49  ;;  %1517 = vmatpush.bf16.msrb.mxu2 %v5450_v50  ;;  %v5526_v49 = vor.u32 %v6968_v47, %v5525_v46  ;;  %v5503_v50 = vld [vmem:[%s7857_s4 + $0xe8] sm:$0xf0]  ;;  %v5669_v20 = vld [vmem:[%s7857_s4 + $0x220] sm:$0xf]  ;;  %v7004_v21 = vld [vmem:[%s7857_s4 + $0x234] sm:$0xf0] }
  0xa1   : > { %1531 = vmatpush.bf16.msrb.mxu3 %v5642_v54  ;;  %v5506_v51 = vor.u32 %v6959_v48, %v5503_v50  ;;  %v7007_v54 = vld [vmem:[%s7857_s4 + $0x254] sm:$0xf]  ;;  %v8110_v6 = vperm.slane %v930_v55, 0  ;;  %v5670_v26 = vor.u32 %v7004_v21, %v5669_v20  ;;  %v5647_v27 = vld [vmem:[%s7857_s4 + $0x208] sm:$0xf0]  ;;  %s9336_s1 = sld [smem:[#allocation34_spill]] }
  0xa2   : > { %v5698_v59 = vor.u32 %v7007_v54, %v5695_v58  ;;  %v6995_v22 = vld [vmem:[%s7857_s4 + $0x1f4] sm:$0xf]  ;;  %v5453_v31 = vld [vmem:[%s7857_s4 + $0x70] sm:$0xf]  ;;  %v6941_v33 = vld [vmem:[%s7857_s4 + $0x44] sm:$0xf] }
  0xa3   : > { %1490 = vmatpush.bf16.msrb.mxu0 %v5422_v62  ;;  %v6962_v62 = vld [vmem:[%s7857_s4 + $0xe4] sm:$0xf0]  ;;  %v6989_v40 = vld [vmem:[%s7857_s4 + $0x1c4] sm:$0xf]  ;;  %v5429_v50 = vld [vmem:[%s7857_s4 + $0x40] sm:$0xf] }
  0xa4   : > { %1504 = vmatpush.bf16.msrb.mxu1 %v5614_v63  ;;  %1518 = vmatpush.bf16.msrb.mxu2 %v5426_v0  ;;  %v6953_v63 = vld [vmem:[%s7857_s4 + $0xa4] sm:$0xf]  ;;  %v5502_v0 = vor.u32 %v6962_v62, %v5501_v60  ;;  %v6998_v39 = vld [vmem:[%s7857_s4 + $0x204] sm:$0xf0]  ;;  %v6935_v52 = vld [vmem:[%s7857_s4 + $0x14] sm:$0xf] }
  0xa5   : > { %1532 = vmatpush.bf16.msrb.mxu3 %v5618_v4  ;;  %v5482_v2 = vor.u32 %v6953_v63, %v5479_v1  ;;  %v7010_v4 = vld [vmem:[%s7857_s4 + $0x264] sm:$0xf0]  ;;  %v5407_v55 = vld [vmem:[%s7857_s4 + $0x28] sm:$0xf0]  ;;  %v5621_v62 = vld [vmem:[%s7857_s4 + $0x1c0] sm:$0xf] }
  0xa6   : > { %v5694_v8 = vor.u32 %v7010_v4, %v5693_v3  ;;  %v5410_v60 = vor.u32 %v6935_v52, %v5407_v55  ;;  %v6992_v63 = vld [vmem:[%s7857_s4 + $0x1d4] sm:$0xf0]  ;;  %v7657_v1 = vmov 1934713408   ;;  %s9337_s13 = sld [smem:[#allocation35_spill]]  ;;  %p6925_p3 = scmp.ne.s32.totalorder %s7632_s21, 1 }
  0xa7   : > { %1491 = vmatpush.bf16.msrb.mxu0 %v5398_v10  ;;  %v7656_v10 = vmov 1983009808  }
  0xa8   : > { %1505 = vmatpush.bf16.msrb.mxu1 %v5590_v11  ;;  %1519 = vmatpush.bf16.msrb.mxu2 %v5402_v12  ;;  %v1600_v11 = vunpack.c.l.s4 %v7656_v10  ;;  %v5674_v12 = vor.u32 %v7001_v5, %v5671_v9  ;;  %v5622_v5 = vor.u32 %v6992_v63, %v5621_v62 }
  0xa9   : > { %1533 = vmatpush.bf16.msrb.mxu3 %v5594_v13  ;;  %v5477_v13 = vld [vmem:[%s7857_s4 + $0xa0] sm:$0xf] }
  0xaa   : > { %1492 = vmatmul.bf16.vlgmr.msrb.gmra.mxu0 %v8003_v57  ;;  %v8125_v28 = vunpack.c.0.s8 %v1600_v11 }
  0xab   : > { %1506 = vmatmul.bf16.vlgmr.msrb.gmra.mxu1 %v8008_v61  ;;  %1520 = vmatmul.bf16.vlgmr.msrb.gmra.mxu2 %v8003_v57 }
  0xac   : > { %1534 = vmatmul.bf16.vlgmr.msrb.gmra.mxu3 %v8008_v61  ;;  %1568 = vmatpush.bf16.msra.mxu2 %v5578_v16  ;;  %v5478_v16 = vor.u32 %v6956_v14, %v5477_v13 }
  0xad   : > { %1582 = vmatpush.bf16.msra.mxu3 %v5770_v19  ;;  %1540 = vmatpush.bf16.msra.mxu0 %v5574_v23  ;;  %v5458_v19 = vor.u32 %v6947_v15, %v5455_v17  ;;  %v5405_v15 = vld [vmem:[%s7857_s4 + $0x10] sm:$0xf] }
  0xae   : > { %1554 = vmatpush.bf16.msra.mxu1 %v5766_v30  ;;  %v5650_v30 = vor.u32 %v6995_v22, %v5647_v27 }
  0xb0   : > { %1569 = vmatpush.bf16.msra.mxu2 %v5554_v25  ;;  %v8122_v25 = vperm.slane %v931_v7, 0  ;;  %v5599_v7 = vld [vmem:[%s7857_s4 + $0x1a8] sm:$0xf0] }
  0xb1   : > { %1583 = vmatpush.bf16.msra.mxu3 %v5746_v32  ;;  %1541 = vmatpush.bf16.msra.mxu0 %v5550_v36  ;;  %v6950_v32 = vld [vmem:[%s7857_s4 + $0x84] sm:$0xf0]  ;;  %v5431_v36 = vld [vmem:[%s7857_s4 + $0x58] sm:$0xf0] }
  0xb2   : > { %1555 = vmatpush.bf16.msra.mxu1 %v5742_v43  ;;  %v5454_v35 = vor.u32 %v6950_v32, %v5453_v31  ;;  %v5434_v37 = vor.u32 %v6941_v33, %v5431_v36 }
  0xb4   : > { %1570 = vmatpush.bf16.msra.mxu2 %v5530_v38  ;;  %v5645_v38 = vld [vmem:[%s7857_s4 + $0x1f0] sm:$0xf] }
  0xb5   : > { %1584 = vmatpush.bf16.msra.mxu3 %v5722_v45  ;;  %1542 = vmatpush.bf16.msra.mxu0 %v5526_v49  ;;  %v5646_v44 = vor.u32 %v6998_v39, %v5645_v38  ;;  %v5623_v45 = vld [vmem:[%s7857_s4 + $0x1d8] sm:$0xf0] }
  0xb6   : > { %1556 = vmatpush.bf16.msra.mxu1 %v5718_v56  ;;  %v5626_v49 = vor.u32 %v6989_v40, %v5623_v45  ;;  %v932_v40 = vperm.slane %v8091_v42, 4 }
  0xb8   : > { %1571 = vmatpush.bf16.msra.mxu2 %v5506_v51  ;;  %v6944_v51 = vld [vmem:[%s7857_s4 + $0x54] sm:$0xf0] }
  0xb9   : > { %1585 = vmatpush.bf16.msra.mxu3 %v5698_v59  ;;  %1543 = vmatpush.bf16.msra.mxu0 %v5502_v0  ;;  %v5430_v54 = vor.u32 %v6944_v51, %v5429_v50  ;;  %v6983_v0 = vld [vmem:[%s7857_s4 + $0x194] sm:$0xf] }
  0xba   : > { %1557 = vmatpush.bf16.msra.mxu1 %v5694_v8  ;;  %v5602_v11 = vor.u32 %v6983_v0, %v5599_v7 }
  0xbc   : > { %1572 = vmatpush.bf16.msra.mxu2 %v5482_v2  ;;  %v1622_v2 = vunpack.c.l.s4 %v7657_v1 }
  0xbd   : > { %1586 = vmatpush.bf16.msra.mxu3 %v5674_v12  ;;  %1544 = vmatpush.bf16.msra.mxu0 %v5478_v16  ;;  %v6938_v16 = vld [vmem:[%s7857_s4 + $0x24] sm:$0xf0] }
  0xbe   : > { %1558 = vmatpush.bf16.msra.mxu1 %v5670_v26  ;;  %v5406_v26 = vor.u32 %v6938_v16, %v5405_v15 }
  0xc0   : > { %1573 = vmatpush.bf16.msra.mxu2 %v5458_v19 }
  0xc1   : > { %1587 = vmatpush.bf16.msra.mxu3 %v5650_v30  ;;  %1545 = vmatpush.bf16.msra.mxu0 %v5454_v35 }
  0xc2   : > { %1559 = vmatpush.bf16.msra.mxu1 %v5646_v44 }
  0xc4   : > { %1574 = vmatpush.bf16.msra.mxu2 %v5434_v37 }
  0xc5   : > { %1588 = vmatpush.bf16.msra.mxu3 %v5626_v49  ;;  %1546 = vmatpush.bf16.msra.mxu0 %v5430_v54 }
  0xc6   : > { %1560 = vmatpush.bf16.msra.mxu1 %v5622_v5 }
  0xc8   : > { %1575 = vmatpush.bf16.msra.mxu2 %v5410_v60 }
  0xc9   : > { %1589 = vmatpush.bf16.msra.mxu3 %v5602_v11  ;;  %1547 = vmatpush.bf16.msra.mxu0 %v5406_v26 }
  0xcb   : > { %1576 = vmatmul.bf16.vlgmr.msra.gmra.mxu2 %v8003_v57 }
  0xcc   : > { %1590 = vmatmul.bf16.vlgmr.msra.gmra.mxu3 %v8008_v61  ;;  %1548 = vmatmul.bf16.vlgmr.msra.gmra.mxu0 %v8003_v57 }
 0x107   : > { %v1437_v18 = vpop.f32.mrf.mxu0 }
 0x108   : > { %v1438_v23 = vadd.f32 %v1437_v18, %v8110_v6  ;;  %v8153_v18 = vunpack.c.0.s8 %v1622_v2 }
 0x10a   : > { %v1451_v24 = vpop.f32.mrf.mxu1 }
 0x10b   : > { %v1452_v34 = vadd.f32 %v1451_v24, %v1438_v23 }
 0x10d   : > { %v1596_v41 = vrot.slane %v1452_v34, 4  ;;  %v1602_v46 = vperm.slane %v1452_v34, %v8125_v28 }
 0x10e   : > { %v1465_v43 = vpop.f32.mrf.mxu2 }
 0x10f   : > { %v1466_v47 = vadd.f32 %v1465_v43, %v8122_v25  ;;  %v1598_v53 = vsel %vm1597_vm0, 0.0, %v1596_v41  ;;  %v1439_v59 = vpop.f32.mrf.mxu0  ;;  %v1619_v8 = vrot.slane %v1602_v46, 4 }
 0x110   : > { %v1606_v56 = vperm.slane %v1598_v53, %v8125_v28  ;;  %v1440_v3 = vadd.f32 %v1439_v59, %v8110_v6 }
 0x111   : > { %v1479_v48 = vpop.f32.mrf.mxu3 }
 0x112   : > { %v1480_v58 = vadd.f32 %v1479_v48, %v1466_v47  ;;  %v1453_v4 = vpop.f32.mrf.mxu1  ;;  %v1631_v12 = vrot.slane %v1606_v56, 4  ;;  %v5597_v47 = vld [vmem:[%s7857_s4 + $0x190] sm:$0xf] }
 0x113   : > { %v1454_v13 = vadd.f32 %v1453_v4, %v1440_v3  ;;  %v933_v4 = vperm.slane %v8091_v42, 6 }
 0x114   : > { %v1607_v9 = vrot.slane %v1480_v58, 4  ;;  %v1612_v10 = vperm.slane %v1480_v58, %v8125_v28  ;;  %v944_v58 = vperm.slane %v932_v40, 0 }
 0x115   : > { %v1649_v19 = vrot.slane %v1454_v13, 4  ;;  %v1654_v22 = vperm.slane %v1454_v13, %v8125_v28  ;;  %v945_v42 = vperm.slane %v933_v4, 0 }
 0x116   : > { %v1608_v14 = vsel %vm1597_vm0, 0.0, %v1607_v9  ;;  %v1617_v17 = vrot.slane %v1612_v10, 4  ;;  %v1467_v20 = vpop.f32.mrf.mxu2  ;;  %v1620_v21 = vsel %vm1597_vm0, %v1612_v10, %v1619_v8 }
 0x117   : > { %v1616_v6 = vperm.slane %v1608_v14, %v8125_v28  ;;  %v1468_v23 = vadd.f32 %v1467_v20, %v8122_v25  ;;  %v1650_v31 = vsel %vm1597_vm0, 0.0, %v1649_v19  ;;  %v1628_v33 = vperm.slane %v1620_v21, %v8153_v18 }
 0x118   : > { %v1618_v35 = vsel %vm1597_vm0, %v1617_v17, %v1602_v46  ;;  %v1671_v36 = vrot.slane %v1654_v22, 4  ;;  %v1658_v37 = vperm.slane %v1650_v31, %v8125_v28  ;;  %v6986_v46 = vld [vmem:[%s7857_s4 + $0x1a4] sm:$0xf0]  ;;  %s9329_s4 = scalar_lea.vmem %s9328_s25, %s7886_s6 }
 0x119   : > { %v1481_v24 = vpop.f32.mrf.mxu3  ;;  %v1629_v27 = vrot.slane %v1616_v6, 4  ;;  %v1632_v30 = vsel %vm1597_vm0, %v1616_v6, %v1631_v12  ;;  %v1624_v41 = vperm.slane %v1618_v35, %v8153_v18  ;;  %v1643_v44 = vrot.slane %v1628_v33, 4 }
 0x11a   : > { %v1482_v32 = vadd.f32 %v1481_v24, %v1468_v23  ;;  %v1640_v34 = vperm.slane %v1632_v30, %v8153_v18  ;;  %v1683_v48 = vrot.slane %v1658_v37, 4  ;;  %v5598_v53 = vor.u32 %v6986_v46, %v5597_v47 }
 0x11b   : > { %v1630_v25 = vsel %vm1597_vm0, %v1629_v27, %v1606_v56  ;;  %v1641_v54 = vrot.slane %v1624_v41, 4  ;;  %v1644_v55 = vsel %vm1597_vm0, 0.0, %v1643_v44 }
 0x11c   : > { %v1659_v38 = vrot.slane %v1482_v32, 4  ;;  %v1664_v39 = vperm.slane %v1482_v32, %v8125_v28  ;;  %v1636_v43 = vperm.slane %v1630_v25, %v8153_v18  ;;  %v1647_v45 = vrot.slane %v1640_v34, 4  ;;  %1561 = vmatpush.bf16.msra.mxu1 %v5598_v53 }
 0x11d   : > { %v1706_v0 = vrot.slane %v1644_v55, 4  ;;  %v1642_v5 = vsel %vm1597_vm0, 0.0, %v1641_v54 }
 0x11e   : > { %v1660_v49 = vsel %vm1597_vm0, 0.0, %v1659_v38  ;;  %v1669_v50 = vrot.slane %v1664_v39, 4  ;;  %v1672_v51 = vsel %vm1597_vm0, %v1664_v39, %v1671_v36  ;;  %v1645_v59 = vrot.slane %v1636_v43, 4 }
 0x11f   : > { %v1668_v52 = vperm.slane %v1660_v49, %v8125_v28  ;;  %v1680_v57 = vperm.slane %v1672_v51, %v8153_v18  ;;  %v1648_v60 = vsel %vm1597_vm0, 0.0, %v1647_v45  ;;  %1562 = vmatmul.bf16.vlgmr.msra.gmra.mxu1 %v8008_v61  ;;  %v1707_v14 = vsel %vm1597_vm0, %v1706_v0, %v1642_v5 }
 0x120   : > { %v1670_v56 = vsel %vm1597_vm0, %v1669_v50, %v1654_v22  ;;  %v1717_v7 = vrot.slane %v1648_v60, 4  ;;  %v1646_v11 = vsel %vm1597_vm0, 0.0, %v1645_v59  ;;  %v8195_v61 = vsel %vm1597_vm0, %v1643_v44, %v1624_v41 }
 0x121   : > { %v1681_v62 = vrot.slane %v1668_v52, 4  ;;  %v1684_v63 = vsel %vm1597_vm0, %v1668_v52, %v1683_v48  ;;  %v1676_v1 = vperm.slane %v1670_v56, %v8153_v18  ;;  %v1695_v2 = vrot.slane %v1680_v57, 4 }
 0x122   : > { %v1692_v8 = vperm.slane %v1684_v63, %v8153_v18  ;;  %v1718_v6 = vsel %vm1597_vm0, %v1717_v7, %v1646_v11  ;;  %v1711_v22 = vperm.slane %v1707_v14, %v8125_v28  ;;  %v8200_v27 = vsel %vm1597_vm0, %v1647_v45, %v1636_v43 }
 0x123   : > { %v1682_v12 = vsel %vm1597_vm0, %v1681_v62, %v1658_v37  ;;  %v1693_v15 = vrot.slane %v1676_v1, 4  ;;  %v1696_v16 = vsel %vm1597_vm0, 0.0, %v1695_v2  ;;  %v1722_v30 = vperm.slane %v1718_v6, %v8125_v28 }
 0x124   : > { %v1688_v17 = vperm.slane %v1682_v12, %v8153_v18  ;;  %v1699_v19 = vrot.slane %v1692_v8, 4  ;;  %v1744_v23 = vrot.slane %v1696_v16, 4  ;;  %v1705_v38 = vperm.slane %v8195_v61, %v8125_v28 }
 0x125   : > { %v1694_v31 = vsel %vm1597_vm0, 0.0, %v1693_v15  ;;  %v8209_v39 = vsel %vm1597_vm0, %v1695_v2, %v1676_v1  ;;  %v1716_v44 = vperm.slane %v8200_v27, %v8125_v28  ;;  %v8213_v45 = vrot.slane %v1711_v22, 4 }
 0x126   : > { %v1697_v35 = vrot.slane %v1688_v17, 4  ;;  %v1700_v25 = vsel %vm1597_vm0, 0.0, %v1699_v19  ;;  %v1745_v47 = vsel %vm1597_vm0, %v1744_v23, %v1694_v31  ;;  %v8216_v48 = vrot.slane %v1722_v30, 4 }
 0x127   : > { %v1493_v3 = vpop.f32.mrf.mxu0  ;;  %v1755_v49 = vrot.slane %v1700_v25, 4  ;;  %v1743_v57 = vperm.slane %v8209_v39, %v8125_v28  ;;  %v1749_v55 = vperm.slane %v1745_v47, %v8125_v28  ;;  %v8226_v60 = vsel %vm1597_vm0, %v1699_v19, %v1688_v17 }
 0x128   : > { %v1494_v9 = vadd.f32 %v1493_v3, %v944_v58  ;;  %v1507_v10 = vpop.f32.mrf.mxu1  ;;  %v1698_v52 = vsel %vm1597_vm0, 0.0, %v1697_v35 }
 0x129   : > { %v1756_v2 = vsel %vm1597_vm0, %v1755_v49, %v1698_v52  ;;  %v1761_v12 = vrot.slane %v1749_v55, 4 }
 0x12a   : > { %v1508_v13 = vadd.f32 %v1507_v10, %v1494_v9  ;;  %v1760_v16 = vperm.slane %v1756_v2, %v8125_v28 }
 0x12c   : > { %v1781_v20 = vrot.slane %v1508_v13, 4  ;;  %v1786_v21 = vperm.slane %v1508_v13, %v8125_v28 }
 0x12e   : > { %v1782_v24 = vsel %vm1597_vm0, 0.0, %v1781_v20  ;;  %v1521_v26 = vpop.f32.mrf.mxu2  ;;  %v1803_v40 = vrot.slane %v1786_v21, 4 }
 0x12f   : > { %v1522_v32 = vadd.f32 %v1521_v26, %v945_v42  ;;  %v1535_v33 = vpop.f32.mrf.mxu3  ;;  %v1495_v34 = vpop.f32.mrf.mxu0  ;;  %v1790_v36 = vperm.slane %v1782_v24, %v8125_v28 }
 0x130   : > { %v1496_v37 = vadd.f32 %v1495_v34, %v944_v58  ;;  %v1509_v43 = vpop.f32.mrf.mxu1 }
 0x131   : > { %v1536_v41 = vadd.f32 %v1535_v33, %v1522_v32  ;;  %v1815_v53 = vrot.slane %v1790_v36, 4 }
 0x132   : > { %v1510_v46 = vadd.f32 %v1509_v43, %v1496_v37 }
 0x133   : > { %v1791_v50 = vrot.slane %v1536_v41, 4  ;;  %v1796_v51 = vperm.slane %v1536_v41, %v8125_v28 }
 0x134   : > { %v1833_v54 = vrot.slane %v1510_v46, 4  ;;  %v1838_v4 = vperm.slane %v1510_v46, %v8125_v28 }
 0x135   : > { %v1792_v56 = vsel %vm1597_vm0, 0.0, %v1791_v50  ;;  %v1801_v58 = vrot.slane %v1796_v51, 4  ;;  %v1804_v59 = vsel %vm1597_vm0, %v1796_v51, %v1803_v40 }
 0x136   : > { %v1800_v62 = vperm.slane %v1792_v56, %v8125_v28  ;;  %v1812_v63 = vperm.slane %v1804_v59, %v8153_v18  ;;  %v1834_v0 = vsel %vm1597_vm0, 0.0, %v1833_v54  ;;  %v1523_v1 = vpop.f32.mrf.mxu2  ;;  %v1855_v24 = vrot.slane %v1838_v4, 4 }
 0x137   : > { %v1802_v3 = vsel %vm1597_vm0, %v1801_v58, %v1786_v21  ;;  %v1524_v5 = vadd.f32 %v1523_v1, %v945_v42  ;;  %v1537_v11 = vpop.f32.mrf.mxu3  ;;  %v1842_v14 = vperm.slane %v1834_v0, %v8125_v28 }
 0x138   : > { %v1808_v7 = vperm.slane %v1802_v3, %v8153_v18  ;;  %v1813_v8 = vrot.slane %v1800_v62, 4  ;;  %v1816_v9 = vsel %vm1597_vm0, %v1800_v62, %v1815_v53  ;;  %v1827_v10 = vrot.slane %v1812_v63, 4 }
 0x139   : > { %v1824_v13 = vperm.slane %v1816_v9, %v8153_v18  ;;  %v1538_v15 = vadd.f32 %v1537_v11, %v1524_v5  ;;  %v1867_v34 = vrot.slane %v1842_v14, 4  ;;  %v1754_v63 = vperm.slane %v8226_v60, %v8125_v28 }
 0x13a   : > { %v1814_v6 = vsel %vm1597_vm0, %v1813_v8, %v1790_v36  ;;  %v1825_v17 = vrot.slane %v1808_v7, 4  ;;  %v1828_v42 = vsel %vm1597_vm0, 0.0, %v1827_v10  ;;  %v1885_v21 = vsel %vm1597_vm0, %v1827_v10, %v1808_v7 }
 0x13b   : > { %v1820_v19 = vperm.slane %v1814_v6, %v8153_v18  ;;  %v1831_v20 = vrot.slane %v1824_v13, 4  ;;  %v1890_v22 = vrot.slane %v1828_v42, 4  ;;  %v1843_v26 = vrot.slane %v1538_v15, 4 }
 0x13c   : > { %v1826_v23 = vsel %vm1597_vm0, 0.0, %v1825_v17  ;;  %v1848_v30 = vperm.slane %v1538_v15, %v8125_v28  ;;  %v1889_v35 = vperm.slane %v1885_v21, %v8125_v28  ;;  %v1767_v11 = vrot.slane %v1760_v16, 4 }
 0x13d   : > { %v1829_v31 = vrot.slane %v1820_v19, 4  ;;  %v1832_v32 = vsel %vm1597_vm0, 0.0, %v1831_v20  ;;  %v1891_v33 = vsel %vm1597_vm0, %v1890_v22, %v1826_v23  ;;  %v1844_v37 = vsel %vm1597_vm0, 0.0, %v1843_v26 }
 0x13e   : > { %v1895_v25 = vperm.slane %v1891_v33, %v8125_v28  ;;  %v1901_v36 = vrot.slane %v1832_v32, 4  ;;  %v1852_v41 = vperm.slane %v1844_v37, %v8125_v28  ;;  %v1853_v43 = vrot.slane %v1848_v30, 4 }
 0x13f   : > { %v1830_v40 = vsel %vm1597_vm0, 0.0, %v1829_v31  ;;  %v1856_v47 = vsel %vm1597_vm0, %v1848_v30, %v1855_v24  ;;  %v1896_v46 = vsel %vm1597_vm0, %v1831_v20, %v1820_v19  ;;  %v1724_v21 = vsel %vm1597_vm0, %v8213_v45, %v1705_v38 }
 0x140   : > { %v1902_v49 = vsel %vm1597_vm0, %v1901_v36, %v1830_v40  ;;  %v1907_v50 = vrot.slane %v1895_v25, 4  ;;  %v1864_v51 = vperm.slane %v1856_v47, %v8153_v18  ;;  %v1854_v53 = vsel %vm1597_vm0, %v1853_v43, %v1838_v4 }
 0x141   : > { %v1906_v52 = vperm.slane %v1902_v49, %v8125_v28  ;;  %v1865_v54 = vrot.slane %v1852_v41, 4  ;;  %v1868_v55 = vsel %vm1597_vm0, %v1852_v41, %v1867_v34  ;;  %v1860_v56 = vperm.slane %v1854_v53, %v8153_v18 }
 0x142   : > { %v1876_v58 = vperm.slane %v1868_v55, %v8153_v18  ;;  %v1879_v59 = vrot.slane %v1864_v51, 4  ;;  %v1908_v62 = vsel %vm1597_vm0, %v1907_v50, %v1889_v35  ;;  %v1900_v0 = vperm.slane %v1896_v46, %v8125_v28 }
 0x143   : > { %v1913_v1 = vrot.slane %v1906_v52, 4  ;;  %v1866_v2 = vsel %vm1597_vm0, %v1865_v54, %v1842_v14  ;;  %v1877_v4 = vrot.slane %v1860_v56, 4  ;;  %v1912_v9 = vperm.slane %v1908_v62, %v8153_v18 }
 0x144   : > { %v1872_v3 = vperm.slane %v1866_v2, %v8153_v18  ;;  %v1880_v5 = vsel %vm1597_vm0, 0.0, %v1879_v59  ;;  %v1883_v7 = vrot.slane %v1876_v58, 4  ;;  %v1762_v14 = vsel %vm1597_vm0, %v1761_v12, %v1743_v57 }
 0x145   : > { %v1928_v8 = vrot.slane %v1880_v5, 4  ;;  %v1914_v10 = vsel %vm1597_vm0, %v1913_v1, %v1900_v0  ;;  %v1878_v13 = vsel %vm1597_vm0, 0.0, %v1877_v4  ;;  %v1923_v6 = vsel %vm1597_vm0, %v1879_v59, %v1860_v56 }
 0x146   : > { %v1881_v60 = vrot.slane %v1872_v3, 4  ;;  %v1884_v15 = vsel %vm1597_vm0, 0.0, %v1883_v7  ;;  %v1918_v19 = vperm.slane %v1914_v10, %v8153_v18  ;;  %v1934_v39 = vsel %vm1597_vm0, %v1883_v7, %v1872_v3 }
 0x147   : > { %v1929_v17 = vsel %vm1597_vm0, %v1928_v8, %v1878_v13  ;;  %v1939_v42 = vrot.slane %v1884_v15, 4  ;;  %v1921_v12 = vrot.slane %v1912_v9, 4  ;;  %v1768_v22 = vsel %vm1597_vm0, %v1767_v11, %v1754_v63 }
 0x148   : > { %v1882_v20 = vsel %vm1597_vm0, 0.0, %v1881_v60  ;;  %v1933_v16 = vperm.slane %v1929_v17, %v8125_v28  ;;  %v1927_v23 = vperm.slane %v1923_v6, %v8125_v28  ;;  %v1766_v30 = vperm.slane %v1762_v14, %v8153_v18 }
 0x149   : > { %v1940_v57 = vsel %vm1597_vm0, %v1939_v42, %v1882_v20  ;;  %v1919_v31 = vrot.slane %v1918_v19, 4  ;;  %v1728_v61 = vperm.slane %v1724_v21, %v8153_v18  ;;  %v1730_v38 = vsel %vm1597_vm0, %v8216_v48, %v1716_v44 }
 0x14a   : > { %v1944_v24 = vperm.slane %v1940_v57, %v8125_v28  ;;  %v1945_v26 = vrot.slane %v1933_v16, 4  ;;  %v1938_v45 = vperm.slane %v1934_v39, %v8125_v28  ;;  %v1772_v34 = vperm.slane %v1768_v22, %v8153_v18  ;;  %v1549_v16 = vpop.f32.mrf.mxu0 }
 0x14b   : > { %v1922_v35 = vsel %vm1597_vm0, %v1918_v19, %v1921_v12  ;;  %v1734_v37 = vperm.slane %v1730_v38, %v8153_v18  ;;  %v1775_v40 = vrot.slane %v1766_v30, 4  ;;  %v1920_v44 = vsel %vm1597_vm0, %v1919_v31, %v1912_v9 }
 0x14c   : > { %v1951_v32 = vrot.slane %v1944_v24, 4  ;;  %v1946_v33 = vsel %vm1597_vm0, %v1945_v26, %v1927_v23  ;;  %v1737_v48 = vrot.slane %v1728_v61, 4  ;;  %v1963_v43 = vpack.c.bf16 %v1922_v35, %v1922_v35 }
 0x14d   : > { %v1950_v25 = vperm.slane %v1946_v33, %v8153_v18  ;;  %v1773_v47 = vrot.slane %v1772_v34, 4  ;;  %v1961_v51 = vpack.c.bf16 %v1920_v44, %v1920_v44  ;;  %v1776_v52 = vsel %vm1597_vm0, %v1772_v34, %v1775_v40 }
 0x14e   : > { %v1952_v36 = vsel %vm1597_vm0, %v1951_v32, %v1938_v45  ;;  %v1735_v53 = vrot.slane %v1734_v37, 4  ;;  %v1738_v55 = vsel %vm1597_vm0, %v1734_v37, %v1737_v48  ;;  %v2183_v56 = vunpack.c.l.b16 %v1963_v43  ;;  %v1577_v19 = vpop.f32.mrf.mxu2 }
 0x14f   : > { %v1956_v27 = vperm.slane %v1952_v36, %v8153_v18  ;;  %v1959_v41 = vrot.slane %v1950_v25, 4  ;;  %v1774_v62 = vsel %vm1597_vm0, %v1773_v47, %v1766_v30  ;;  %v1780_v63 = vpack.c.bf16 %v1776_v52, %v1776_v52  ;;  %v1591_v21 = vpop.f32.mrf.mxu3 }
 0x150   : > { %v2157_v1 = vunpack.c.l.b16 %v1961_v51  ;;  %v1736_v3 = vsel %vm1597_vm0, %v1735_v53, %v1728_v61  ;;  %v1779_v4 = vpack.c.bf16 %v1738_v55, %v1738_v55  ;;  %v1778_v5 = vpack.c.bf16 %v1774_v62, %v1774_v62 }
 0x151   : > { %v1960_v46 = vsel %vm1597_vm0, %v1956_v27, %v1959_v41  ;;  %v1957_v49 = vrot.slane %v1956_v27, 4  ;;  %v2178_v8 = vunpack.c.l.b16 %v1780_v63  ;;  %v1777_v9 = vpack.c.bf16 %v1736_v3, %v1736_v3 }
 0x152   : > { %v1964_v50 = vpack.c.bf16 %v1960_v46, %v1960_v46  ;;  %v2177_v10 = vunpack.c.l.b16 %v1779_v4  ;;  %v2152_v11 = vunpack.c.l.b16 %v1778_v5  ;;  %v927_v14 = vunpack.c.h.bf16 %v8080_v29  ;;  %v1551_v33 = vpop.f32.mrf.mxu0 }
 0x153   : > { %v1958_v54 = vsel %vm1597_vm0, %v1957_v49, %v1950_v25  ;;  %v2151_v60 = vunpack.c.l.b16 %v1777_v9 }
 0x154   : > { %v2184_v58 = vunpack.c.l.b16 %v1964_v50  ;;  %v1962_v59 = vpack.c.bf16 %v1958_v54, %v1958_v54  ;;  %v2179_v13 = vpack.c.b16 %v2178_v8, %v2177_v10  ;;  %v935_v6 = vperm.slane %v927_v14, 2 }
 0x155   : > { %v2153_v15 = vpack.c.b16 %v2152_v11, %v2151_v60  ;;  %v934_v42 = vperm.slane %v927_v14, 0 }
 0x156   : > { %v2185_v0 = vpack.c.b16 %v2184_v58, %v2183_v56  ;;  %v2158_v2 = vunpack.c.l.b16 %v1962_v59  ;;  %v947_v17 = vperm.slane %v935_v6, 0  ;;  %v1579_v26 = vpop.f32.mrf.mxu2 }
 0x157   : > { %v946_v39 = vperm.slane %v934_v42, 0  ;;  %v1593_v61 = vpop.f32.mrf.mxu3 }
 0x158   : > { %2194 = vmatpush.bf16.xpose.msrb.mxu1 %v2185_v0  ;;  %v2159_v7 = vpack.c.b16 %v2158_v2, %v2157_v1  ;;  %v1578_v20 = vadd.f32 %v1577_v19, %v947_v17  ;;  %v1580_v30 = vadd.f32 %v1579_v26, %v947_v17 }
 0x159   : > { %v1550_v22 = vadd.f32 %v1549_v16, %v946_v39  ;;  %v1552_v41 = vadd.f32 %v1551_v33, %v946_v39 }
 0x15a   : > { %2168 = vmatpush.bf16.xpose.msrb.mxu0 %v2159_v7  ;;  %v1592_v57 = vadd.f32 %v1591_v21, %v1578_v20  ;;  %v1594_v32 = vadd.f32 %v1593_v61, %v1580_v30 }
 0x15c   : > { %v1975_v12 = vrot.slane %v1592_v57, 4  ;;  %v1980_v24 = vperm.slane %v1592_v57, %v8125_v28  ;;  %v2027_v25 = vrot.slane %v1594_v32, 4  ;;  %v2032_v43 = vperm.slane %v1594_v32, %v8125_v28 }
 0x15e   : > { %v1976_v23 = vsel %vm1597_vm0, 0.0, %v1975_v12  ;;  %v1985_v45 = vrot.slane %v1980_v24, 4  ;;  %v2028_v48 = vsel %vm1597_vm0, 0.0, %v2027_v25  ;;  %v2037_v59 = vrot.slane %v2032_v43, 4 }
 0x15f   : > { %2195 = vmatmul.bf16.vlgmr.msrb.gmra.mxu1 %v2179_v13  ;;  %v1984_v29 = vperm.slane %v1976_v23, %v8125_v28  ;;  %v2036_v55 = vperm.slane %v2028_v48, %v8125_v28 }
 0x161   : > { %2169 = vmatmul.bf16.vlgmr.msrb.gmra.mxu0 %v2153_v15  ;;  %v1997_v36 = vrot.slane %v1984_v29, 4  ;;  %v2049_v5 = vrot.slane %v2036_v55, 4 }
 0x19c   : > { %v1563_v31 = vpop.f32.mrf.mxu1 }
 0x19d   : > { %v1564_v38 = vadd.f32 %v1563_v31, %v1550_v22 }
 0x19f   : > { %v1965_v34 = vrot.slane %v1564_v38, 4  ;;  %v1970_v35 = vperm.slane %v1564_v38, %v8125_v28 }
 0x1a1   : > { %v1966_v37 = vsel %vm1597_vm0, 0.0, %v1965_v34  ;;  %v1987_v40 = vrot.slane %v1970_v35, 4  ;;  %v1986_v27 = vsel %vm1597_vm0, %v1985_v45, %v1970_v35 }
 0x1a2   : > { %v1974_v44 = vperm.slane %v1966_v37, %v8125_v28  ;;  %v1992_v46 = vperm.slane %v1986_v27, %v8153_v18 }
 0x1a3   : > { %v1988_v47 = vsel %vm1597_vm0, %v1980_v24, %v1987_v40 }
 0x1a4   : > { %v1999_v49 = vrot.slane %v1974_v44, 4  ;;  %v1996_v50 = vperm.slane %v1988_v47, %v8153_v18  ;;  %v1998_v51 = vsel %vm1597_vm0, %v1997_v36, %v1974_v44  ;;  %v1565_v52 = vpop.f32.mrf.mxu1  ;;  %v2009_v63 = vrot.slane %v1992_v46, 4 }
 0x1a5   : > { %v2004_v53 = vperm.slane %v1998_v51, %v8153_v18  ;;  %v1566_v54 = vadd.f32 %v1565_v52, %v1552_v41 }
 0x1a6   : > { %v2000_v56 = vsel %vm1597_vm0, %v1984_v29, %v1999_v49  ;;  %v2011_v58 = vrot.slane %v1996_v50, 4  ;;  %v2010_v10 = vsel %vm1597_vm0, 0.0, %v2009_v63 }
 0x1a7   : > { %v2008_v62 = vperm.slane %v2000_v56, %v8153_v18  ;;  %v2017_v0 = vrot.slane %v1566_v54, 4  ;;  %v2022_v1 = vperm.slane %v1566_v54, %v8125_v28  ;;  %v2013_v2 = vrot.slane %v2004_v53, 4 }
 0x1a8   : > { %v2012_v3 = vsel %vm1597_vm0, 0.0, %v2011_v58  ;;  %v2069_v61 = vsel %vm1597_vm0, %v2011_v58, %v1992_v46 }
 0x1a9   : > { %v2015_v4 = vrot.slane %v2008_v62, 4  ;;  %v2018_v7 = vsel %vm1597_vm0, 0.0, %v2017_v0  ;;  %v2039_v8 = vrot.slane %v2022_v1, 4  ;;  %v2038_v9 = vsel %vm1597_vm0, %v2037_v59, %v2022_v1 }
 0x1aa   : > { %v2026_v13 = vperm.slane %v2018_v7, %v8125_v28  ;;  %v2014_v60 = vsel %vm1597_vm0, 0.0, %v2013_v2  ;;  %v2074_v15 = vrot.slane %v2012_v3, 4  ;;  %v2044_v42 = vperm.slane %v2038_v9, %v8153_v18 }
 0x1ab   : > { %v2016_v11 = vsel %vm1597_vm0, 0.0, %v2015_v4  ;;  %v2040_v6 = vsel %vm1597_vm0, %v2032_v43, %v2039_v8  ;;  %v2080_v32 = vsel %vm1597_vm0, %v2015_v4, %v2004_v53  ;;  %v2073_v27 = vperm.slane %v2069_v61, %v8125_v28 }
 0x1ac   : > { %v2085_v14 = vrot.slane %v2016_v11, 4  ;;  %v2051_v17 = vrot.slane %v2026_v13, 4  ;;  %v2048_v19 = vperm.slane %v2040_v6, %v8153_v18  ;;  %v2050_v20 = vsel %vm1597_vm0, %v2049_v5, %v2026_v13 }
 0x1ad   : > { %v2056_v16 = vperm.slane %v2050_v20, %v8153_v18  ;;  %v2061_v39 = vrot.slane %v2044_v42, 4  ;;  %v2075_v12 = vsel %vm1597_vm0, %v2074_v15, %v2010_v10  ;;  %v2084_v41 = vperm.slane %v2080_v32, %v8125_v28 }
 0x1ae   : > { %v2052_v21 = vsel %vm1597_vm0, %v2036_v55, %v2051_v17  ;;  %v2063_v57 = vrot.slane %v2048_v19, 4  ;;  %v2086_v22 = vsel %vm1597_vm0, %v2085_v14, %v2014_v60  ;;  %v2079_v38 = vperm.slane %v2075_v12, %v8125_v28 }
 0x1af   : > { %v2060_v23 = vperm.slane %v2052_v21, %v8153_v18  ;;  %v2065_v24 = vrot.slane %v2056_v16, 4  ;;  %v2062_v26 = vsel %vm1597_vm0, 0.0, %v2061_v39  ;;  %v2090_v45 = vperm.slane %v2086_v22, %v8125_v28 }
 0x1b0   : > { %v2064_v30 = vsel %vm1597_vm0, 0.0, %v2063_v57  ;;  %v2107_v25 = vsel %vm1597_vm0, %v2063_v57, %v2044_v42  ;;  %v2091_v44 = vrot.slane %v2079_v38, 4  ;;  %v2201_v42 = vlaneseq }
 0x1b1   : > { %v2067_v31 = vrot.slane %v2060_v23, 4  ;;  %v2112_v29 = vrot.slane %v2064_v30, 4  ;;  %v2066_v33 = vsel %vm1597_vm0, 0.0, %v2065_v24  ;;  %v2097_v48 = vrot.slane %v2090_v45, 4 }
 0x1b2   : > { %v2111_v47 = vperm.slane %v2107_v25, %v8125_v28  ;;  %v2092_v52 = vsel %vm1597_vm0, %v2091_v44, %v2073_v27  ;;  %v2202_v19 = vshrl.u32 %v2201_v42, 7  ;;  %v2205_v20 = vand.u32 127, %v2201_v42 }
 0x1b3   : > { %v2068_v34 = vsel %vm1597_vm0, 0.0, %v2067_v31  ;;  %v2113_v35 = vsel %vm1597_vm0, %v2112_v29, %v2062_v26  ;;  %v2118_v37 = vsel %vm1597_vm0, %v2067_v31, %v2056_v16  ;;  %v2098_v53 = vsel %vm1597_vm0, %v2097_v48, %v2084_v41 }
 0x1b4   : > { %v2117_v36 = vperm.slane %v2113_v35, %v8125_v28  ;;  %v2123_v40 = vrot.slane %v2068_v34, 4  ;;  %v2122_v46 = vperm.slane %v2118_v37, %v8125_v28  ;;  %v2096_v56 = vperm.slane %v2092_v52, %v8153_v18 }
 0x1b5   : > { %v2102_v58 = vperm.slane %v2098_v53, %v8153_v18  ;;  %vm2206_vm1 = vcmp.le.s32.totalorder %v2205_v20, %v2202_v19  ;;  %v2203_v12 = vadd.s32 8, %v2202_v19 }
 0x1b6   : > { %v2124_v43 = vsel %vm1597_vm0, %v2123_v40, %v2066_v33  ;;  %v2129_v50 = vrot.slane %v2117_v36, 4  ;;  %v2105_v0 = vrot.slane %v2096_v56, 4 }
 0x1b7   : > { %v2128_v49 = vperm.slane %v2124_v43, %v8125_v28  ;;  %v2103_v63 = vrot.slane %v2102_v58, 4  ;;  %vm2207_vm3 = vcmp.le.s32.totalorder %v2205_v20, %v2203_v12 }
 0x1b8   : > { %v2130_v54 = vsel %vm1597_vm0, %v2129_v50, %v2111_v47  ;;  %v2106_v4 = vsel %vm1597_vm0, %v2102_v58, %v2105_v0 }
 0x1b9   : > { %v2135_v51 = vrot.slane %v2128_v49, 4  ;;  %v2134_v59 = vperm.slane %v2130_v54, %v8153_v18  ;;  %v2104_v3 = vsel %vm1597_vm0, %v2103_v63, %v2096_v56  ;;  %v2147_v9 = vpack.c.bf16 %v2106_v4, %v2106_v4 }
 0x1ba   : > { %v2145_v8 = vpack.c.bf16 %v2104_v3, %v2104_v3 }
 0x1bb   : > { %v2136_v55 = vsel %vm1597_vm0, %v2135_v51, %v2122_v46  ;;  %v2143_v1 = vrot.slane %v2134_v59, 4  ;;  %v2352_v60 = vunpack.c.l.b16 %v2147_v9 }
 0x1bc   : > { %v2140_v62 = vperm.slane %v2136_v55, %v8153_v18  ;;  %v2324_v13 = vunpack.c.l.b16 %v2145_v8 }
 0x1be   : > { %v2141_v2 = vrot.slane %v2140_v62, 4  ;;  %v2144_v5 = vsel %vm1597_vm0, %v2140_v62, %v2143_v1 }
 0x1bf   : > { %v2148_v10 = vpack.c.bf16 %v2144_v5, %v2144_v5 }
 0x1c0   : > { %v2142_v7 = vsel %vm1597_vm0, %v2141_v2, %v2134_v59 }
 0x1c1   : > { %v2146_v11 = vpack.c.bf16 %v2142_v7, %v2142_v7  ;;  %v2353_v15 = vunpack.c.l.b16 %v2148_v10 }
 0x1c3   : > { %v2325_v14 = vunpack.c.l.b16 %v2146_v11  ;;  %v2354_v6 = vpack.c.b16 %v2353_v15, %v2352_v60 }
 0x1c5   : > { %v2326_v17 = vpack.c.b16 %v2325_v14, %v2324_v13  ;;  %2366 = vmatpush.bf16.msrb.mxu3 %v2354_v6 }
 0x1c7   : > { %2338 = vmatpush.bf16.msrb.mxu2 %v2326_v17 }
 0x1dc   : > { %v2196_v16 = vpop.f32.mrf.mxu1 }
 0x1dd   : > { %v2214_v21 = vsel %vm2206_vm1, %v2196_v16, -1e+09 }
 0x1de   : > { %v2170_v39 = vpop.f32.mrf.mxu0  ;;  %v2223_v57 = vsel %vm2216_vm2, %v2214_v21, -inf }
 0x1df   : > { %v2212_v22 = vsel %vm2206_vm1, %v2170_v39, -1e+09  ;;  %2224 = vmax.xlane.f32.xlu1 %v2223_v57 }
 0x1e0   : > { %v2217_v23 = vsel %vm2216_vm2, %v2212_v22, -inf }
 0x1e1   : > { %2218 = vmax.xlane.f32.xlu0 %v2217_v23 }
 0x1e4   : > { %v2198_v24 = vpop.f32.mrf.mxu1 }
 0x1e5   : > { %v2215_v26 = vsel %vm2207_vm3, %v2198_v24, -1e+09 }
 0x1e6   : > { %v2172_v30 = vpop.f32.mrf.mxu0  ;;  %v2226_v31 = vsel %vm2216_vm2, %v2215_v26, -inf }
 0x1e7   : > { %v2213_v29 = vsel %vm2207_vm3, %v2172_v30, -1e+09  ;;  %2227 = vmax.xlane.f32.xlu1 %v2226_v31 }
 0x1e8   : > { %v2220_v61 = vsel %vm2216_vm2, %v2213_v29, -inf }
 0x1e9   : > { %2221 = vmax.xlane.f32.xlu0 %v2220_v61 }
 0x252   : > { %v2225_v38 = vpop.xlane.xlu1 %2224 }
 0x253   : > { %v2231_v45 = vsub.f32 %v2214_v21, %v2225_v38 }
 0x254   : > { %v2219_v32 = vpop.xlane.xlu0 %2218 }
 0x255   : > { %v2237_v33 = vmul.f32 1.442695, %v2231_v45  ;;  %v2229_v34 = vsub.f32 %v2212_v22, %v2219_v32 }
 0x257   : > { %7416 = vpow2.f32 %v2237_v33  ;;  %v2233_v35 = vmul.f32 1.442695, %v2229_v34 }
 0x259   : > { %7418 = vpow2.f32 %v2233_v35 }
 0x25a   : > { %v2228_v25 = vpop.xlane.xlu1 %2227 }
 0x25b   : > { %v2232_v36 = vsub.f32 %v2215_v26, %v2228_v25 }
 0x25c   : > { %v2222_v37 = vpop.xlane.xlu0 %2221 }
 0x25d   : > { %v8382_v40 = vpop.eup %7416  ;;  %v2239_v27 = vmul.f32 1.442695, %v2232_v36  ;;  %v2230_v41 = vsub.f32 %v2213_v29, %v2222_v37 }
 0x25e   : > { %v2247_v44 = vsel %vm2216_vm2, %v8382_v40, 0.0 }
 0x25f   : > { %v8386_v48 = vpop.eup %7418  ;;  %7420 = vpow2.f32 %v2239_v27  ;;  %v2235_v43 = vmul.f32 1.442695, %v2230_v41  ;;  %2248 = vadd.xlane.f32.xlu0 %v2247_v44 }
 0x260   : > { %v2241_v47 = vsel %vm2216_vm2, %v8386_v48, 0.0 }
 0x261   : > { %7422 = vpow2.f32 %v2235_v43  ;;  %2242 = vadd.xlane.f32.xlu2 %v2241_v47 }
 0x265   : > { %v8390_v46 = vpop.eup %7420 }
 0x266   : > { %v2250_v49 = vsel %vm2216_vm2, %v8390_v46, 0.0 }
 0x267   : > { %v8394_v50 = vpop.eup %7422  ;;  %2251 = vadd.xlane.f32.xlu1 %v2250_v49  ;;  %v7060_v49 = vld [vmem:[%s7865_s20 + $0xf4] sm:$0xf0] }
 0x268   : > { %v2244_v51 = vsel %vm2216_vm2, %v8394_v50, 0.0 }
 0x269   : > { %2245 = vadd.xlane.f32.xlu2 %v2244_v51 }
 0x2d2   : > { %v2249_v52 = vpop.xlane.xlu0 %2248 }
 0x2d3   : > { %7424 = vrcp.f32 %v2249_v52  ;;  %vm2288_vm5 = vweird.f32 %v2249_v52  ;;  %v2294_v2 = vand.u32 2147483648, %v2249_v52  ;;  %v2292_v4 = vand.u32 2147483647, %v2249_v52 }
 0x2d4   : > { %v2243_v53 = vpop.xlane.xlu2 %2242 }
 0x2d5   : > { %7426 = vrcp.f32 %v2243_v53  ;;  %vm2258_vm8 = vweird.f32 %v2243_v53  ;;  %v2264_v8 = vand.u32 2147483648, %v2243_v53  ;;  %v2262_v11 = vand.u32 2147483647, %v2243_v53 }
 0x2d6   : > { %v2295_v15 = vor.u32 1.1754944e-38, %v2294_v2  ;;  %vm2293_vm10 = vcmp.eq.f32.partialorder %v2292_v4, 8.507059e+37 }
 0x2d7   : > { %v2265_v19 = vor.u32 1.1754944e-38, %v2264_v8  ;;  %vm2263_vm11 = vcmp.eq.f32.partialorder %v2262_v11, 8.507059e+37  ;;  %v7041_v8 = vld [vmem:[%s7865_s20 + $0x64] sm:$0xf] }
 0x2d9   : > { %v7425_v54 = vpop.eup %7424 }
 0x2da   : > { %v2284_v55 = vmul.f32 %v7425_v54, %v2249_v52  ;;  %v2252_v56 = vpop.xlane.xlu1 %2251  ;;  %vm2289_vm4 = vweird.f32 %v7425_v54  ;;  %v5897_v52 = vld [vmem:[%s7865_s20 + $0xf8] sm:$0xf0] }
 0x2db   : > { %v7427_v58 = vpop.eup %7426  ;;  %7428 = vrcp.f32 %v2252_v56  ;;  %vm2290_vm7 = vmor %vm2288_vm5, %vm2289_vm4  ;;  %v2307_v20 = vand.u32 2147483647, %v2252_v56  ;;  %v2309_v16 = vand.u32 2147483648, %v2252_v56  ;;  %vm2303_vm13 = vweird.f32 %v2252_v56 }
 0x2dc   : > { %v2285_v59 = vsub.f32 1.0, %v2284_v55  ;;  %v2254_v62 = vmul.f32 %v7427_v58, %v2243_v53  ;;  %v2246_v63 = vpop.xlane.xlu2 %2245  ;;  %vm2259_vm6 = vweird.f32 %v7427_v58  ;;  %v5831_v53 = vld [vmem:[%s7865_s20 + $0x70] sm:$0xf] }
 0x2dd   : > { %7430 = vrcp.f32 %v2246_v63  ;;  %vm2260_vm9 = vmor %vm2258_vm8, %vm2259_vm6  ;;  %v2277_v12 = vand.u32 2147483647, %v2246_v63  ;;  %v2279_v22 = vand.u32 2147483648, %v2246_v63  ;;  %vm2308_vm1 = vcmp.eq.f32.partialorder %v2307_v20, 8.507059e+37 }
 0x2de   : > { %v2286_v0 = vmul.f32 %v7425_v54, %v2285_v59  ;;  %v2255_v1 = vsub.f32 1.0, %v2254_v62  ;;  %v2310_v30 = vor.u32 1.1754944e-38, %v2309_v16  ;;  %vm2273_vm3 = vweird.f32 %v2246_v63  ;;  %v5833_v59 = vld [vmem:[%s7865_s20 + $0x78] sm:$0xf0]  ;;  %v7039_v16 = vld [vmem:[%s7865_s20 + $0x54] sm:$0xf] }
 0x2df   : > { %v2280_v45 = vor.u32 1.1754944e-38, %v2279_v22  ;;  %vm2278_vm5 = vcmp.eq.f32.partialorder %v2277_v12, 8.507059e+37  ;;  %v7054_v22 = vld [vmem:[%s7865_s20 + $0xc4] sm:$0xf0] }
 0x2e0   : > { %v2287_v3 = vadd.f32 %v7425_v54, %v2286_v0  ;;  %v2256_v5 = vmul.f32 %v7427_v58, %v2255_v1  ;;  %v7058_v0 = vld [vmem:[%s7865_s20 + $0xe4] sm:$0xf0]  ;;  %v7057_v1 = vld [vmem:[%s7865_s20 + $0xe4] sm:$0xf] }
 0x2e1   : > { %v7429_v7 = vpop.eup %7428 }
 0x2e2   : > { %v2291_v9 = vsel %vm2290_vm7, %v7425_v54, %v2287_v3  ;;  %v2257_v10 = vadd.f32 %v7427_v58, %v2256_v5  ;;  %v2299_v13 = vmul.f32 %v7429_v7, %v2252_v56  ;;  %vm2304_vm12 = vweird.f32 %v7429_v7  ;;  %v7044_v54 = vld [vmem:[%s7865_s20 + $0x74] sm:$0xf0]  ;;  %v5889_v3 = vld [vmem:[%s7865_s20 + $0xe8] sm:$0xf0]  ;;  %v5823_v5 = vld [vmem:[%s7865_s20 + $0x60] sm:$0xf] }
 0x2e3   : > { %v7431_v60 = vpop.eup %7430  ;;  %v2296_v42 = vsel %vm2293_vm10, %v2295_v15, %v2291_v9  ;;  %vm2305_vm15 = vmor %vm2303_vm13, %vm2304_vm12  ;;  %v5832_v56 = vor.u32 %v7044_v54, %v5831_v53  ;;  %v5892_v4 = vor.u32 %v7057_v1, %v5889_v3  ;;  %v7055_v15 = vld [vmem:[%s7865_s20 + $0xd4] sm:$0xf]  ;;  %v7036_v53 = vld [vmem:[%s7865_s20 + $0x34] sm:$0xf0] }
 0x2e4   : > { %v2261_v14 = vsel %vm2260_vm9, %v7427_v58, %v2257_v10  ;;  %v2300_v6 = vsub.f32 1.0, %v2299_v13  ;;  %v2269_v17 = vmul.f32 %v7431_v60, %v2246_v63  ;;  %v2297_v23 = vmul.f32 %v8382_v40, %v2296_v42  ;;  %v7043_v58 = vld [vmem:[%s7865_s20 + $0x74] sm:$0xf]  ;;  %v5887_v63 = vld [vmem:[%s7865_s20 + $0xe0] sm:$0xf] }
 0x2e5   : > { %v2266_v57 = vsel %vm2263_vm11, %v2265_v19, %v2261_v14  ;;  %vm2274_vm14 = vweird.f32 %v7431_v60  ;;  %v5836_v62 = vor.u32 %v7043_v58, %v5833_v59  ;;  %2756 = vmatpush.bf16.msra.mxu0 %v5832_v56  ;;  %v5888_v2 = vor.u32 %v7058_v0, %v5887_v63  ;;  %v5825_v10 = vld [vmem:[%s7865_s20 + $0x68] sm:$0xf0]  ;;  %v5879_v13 = vld [vmem:[%s7865_s20 + $0xd0] sm:$0xf]  ;;  %v7040_v42 = vld [vmem:[%s7865_s20 + $0x54] sm:$0xf0] }
 0x2e6   : > { %v2301_v21 = vmul.f32 %v7429_v7, %v2300_v6  ;;  %v2270_v39 = vsub.f32 1.0, %v2269_v17  ;;  %v2267_v31 = vmul.f32 %v8386_v48, %v2266_v57  ;;  %vm2275_vm4 = vmor %vm2273_vm3, %vm2274_vm14  ;;  %v2315_v32 = vpack.c.bf16 %v2297_v23, %v2297_v23  ;;  %v5881_v6 = vld [vmem:[%s7865_s20 + $0xd8] sm:$0xf0]  ;;  %v5815_v17 = vld [vmem:[%s7865_s20 + $0x50] sm:$0xf] }
 0x2e7   : > { %2784 = vmatpush.bf16.msra.mxu2 %v5836_v62  ;;  %v5828_v11 = vor.u32 %v7041_v8, %v5825_v10  ;;  %v5884_v19 = vor.u32 %v7055_v15, %v5881_v6  ;;  %v5816_v20 = vor.u32 %v7040_v42, %v5815_v17  ;;  %v7053_v23 = vld [vmem:[%s7865_s20 + $0xc4] sm:$0xf]  ;;  %v7035_v54 = vld [vmem:[%s7865_s20 + $0x34] sm:$0xf]  ;;  %v5801_v62 = vld [vmem:[%s7865_s20 + $0x38] sm:$0xf0] }
 0x2e8   : > { %v2302_v24 = vadd.f32 %v7429_v7, %v2301_v21  ;;  %v2271_v26 = vmul.f32 %v7431_v60, %v2270_v39  ;;  %v2313_v25 = vpack.c.bf16 %v2267_v31, %v2267_v31  ;;  %v2347_v40 = vunpack.c.l.b16 %v2315_v32  ;;  %v5817_v21 = vld [vmem:[%s7865_s20 + $0x58] sm:$0xf0]  ;;  %v5871_v39 = vld [vmem:[%s7865_s20 + $0xc0] sm:$0xf]  ;;  %v7049_v3 = vld [vmem:[%s7865_s20 + $0xa4] sm:$0xf] }
 0x2e9   : > { %v5820_v12 = vor.u32 %v7039_v16, %v5817_v21  ;;  %v5872_v31 = vor.u32 %v7054_v22, %v5871_v39  ;;  %v5855_v63 = vld [vmem:[%s7865_s20 + $0xa0] sm:$0xf]  ;;  %v5804_v1 = vor.u32 %v7035_v54, %v5801_v62  ;;  %v7034_v39 = vld [vmem:[%s7865_s20 + $0x24] sm:$0xf0] }
 0x2ea   : > { %v2306_v29 = vsel %vm2305_vm15, %v7429_v7, %v2302_v24  ;;  %v2272_v61 = vadd.f32 %v7431_v60, %v2271_v26  ;;  %v2319_v44 = vunpack.c.l.b16 %v2313_v25  ;;  %v7042_v7 = vld [vmem:[%s7865_s20 + $0x64] sm:$0xf0]  ;;  %v5873_v24 = vld [vmem:[%s7865_s20 + $0xc8] sm:$0xf0]  ;;  %v5791_v21 = vld [vmem:[%s7865_s20 + $0x20] sm:$0xf] }
 0x2eb   : > { %v2311_v38 = vsel %vm2308_vm1, %v2310_v30, %v2306_v29  ;;  %v5824_v9 = vor.u32 %v7042_v7, %v5823_v5  ;;  %2785 = vmatpush.bf16.msra.mxu2 %v5828_v11  ;;  %v5876_v29 = vor.u32 %v7053_v23, %v5873_v24  ;;  %v5839_v62 = vld [vmem:[%s7865_s20 + $0x80] sm:$0xf] }
 0x2ec   : > { %v2312_v33 = vmul.f32 %v8390_v46, %v2311_v38  ;;  %v2276_v34 = vsel %vm2275_vm4, %v7431_v60, %v2272_v61  ;;  %v5895_v46 = vld [vmem:[%s7865_s20 + $0xf0] sm:$0xf]  ;;  %v7056_v60 = vld [vmem:[%s7865_s20 + $0xd4] sm:$0xf0]  ;;  %v5807_v61 = vld [vmem:[%s7865_s20 + $0x40] sm:$0xf] }
 0x2ed   : > { %v2281_v35 = vsel %vm2278_vm5, %v2280_v45, %v2276_v34  ;;  %v5896_v51 = vor.u32 %v7060_v49, %v5895_v46  ;;  %2757 = vmatpush.bf16.msra.mxu0 %v5824_v9  ;;  %v5880_v14 = vor.u32 %v7056_v60, %v5879_v13  ;;  %v7038_v38 = vld [vmem:[%s7865_s20 + $0x44] sm:$0xf0]  ;;  %v5809_v34 = vld [vmem:[%s7865_s20 + $0x48] sm:$0xf0]  ;;  %v5799_v46 = vld [vmem:[%s7865_s20 + $0x30] sm:$0xf] }
 0x2ee   : > { %v2316_v36 = vpack.c.bf16 %v2312_v33, %v2312_v33  ;;  %v2282_v37 = vmul.f32 %v8394_v50, %v2281_v35  ;;  %v7059_v50 = vld [vmem:[%s7865_s20 + $0xf4] sm:$0xf]  ;;  %v5808_v32 = vor.u32 %v7038_v38, %v5807_v61  ;;  %v7037_v33 = vld [vmem:[%s7865_s20 + $0x44] sm:$0xf]  ;;  %v5863_v35 = vld [vmem:[%s7865_s20 + $0xb0] sm:$0xf]  ;;  %v5800_v59 = vor.u32 %v7036_v53, %v5799_v46 }
 0x2ef   : > { %v5900_v55 = vor.u32 %v7059_v50, %v5897_v52  ;;  %2770 = vmatpush.bf16.msra.mxu1 %v5896_v51  ;;  %2786 = vmatpush.bf16.msra.mxu2 %v5820_v12  ;;  %v5792_v38 = vor.u32 %v7034_v39, %v5791_v21  ;;  %v7029_v39 = vld [vmem:[%s7865_s20 + $0x4] sm:$0xf] }
 0x2f0   : > { %v2348_v27 = vunpack.c.l.b16 %v2316_v36  ;;  %v2314_v41 = vpack.c.bf16 %v2282_v37, %v2282_v37 }
 0x2f1   : > { %2798 = vmatpush.bf16.msra.mxu3 %v5900_v55  ;;  %2758 = vmatpush.bf16.msra.mxu0 %v5816_v20 }
 0x2f2   : > { %v2320_v48 = vunpack.c.l.b16 %v2314_v41  ;;  %v2349_v43 = vpack.c.b16 %v2348_v27, %v2347_v40  ;;  %v7052_v27 = vld [vmem:[%s7865_s20 + $0xb4] sm:$0xf0] }
 0x2f3   : > { %2771 = vmatpush.bf16.msra.mxu1 %v5888_v2  ;;  %v7050_v2 = vld [vmem:[%s7865_s20 + $0xa4] sm:$0xf0] }
 0x2f4   : > { %5772 = vmatmul.msk.bf16.vlgmr.msrb.gmra.mxu3 %vm2216_vm2, %v2349_v43  ;;  %v2321_v47 = vpack.c.b16 %v2320_v48, %v2319_v44  ;;  %v5812_v44 = vor.u32 %v7037_v33, %v5809_v34  ;;  %v5864_v48 = vor.u32 %v7052_v27, %v5863_v35  ;;  %v7051_v43 = vld [vmem:[%s7865_s20 + $0xb4] sm:$0xf]  ;;  %v5856_v15 = vor.u32 %v7050_v2, %v5855_v63 }
 0x2f5   : > { %2799 = vmatpush.bf16.msra.mxu3 %v5892_v4  ;;  %2759 = vmatpush.bf16.msra.mxu0 %v5808_v32  ;;  %v5857_v4 = vld [vmem:[%s7865_s20 + $0xa8] sm:$0xf0] }
 0x2f6   : > { %5771 = vmatmul.msk.bf16.vlgmr.msrb.gmra.mxu2 %vm2216_vm2, %v2321_v47  ;;  %v5865_v47 = vld [vmem:[%s7865_s20 + $0xb8] sm:$0xf0]  ;;  %v5860_v42 = vor.u32 %v7049_v3, %v5857_v4  ;;  %v5793_v32 = vld [vmem:[%s7865_s20 + $0x28] sm:$0xf0]  ;;  %v7046_v3 = vld [vmem:[%s7865_s20 + $0x84] sm:$0xf0] }
 0x2f7   : > { %2772 = vmatpush.bf16.msra.mxu1 %v5880_v14  ;;  %v5868_v52 = vor.u32 %v7051_v43, %v5865_v47  ;;  %2787 = vmatpush.bf16.msra.mxu2 %v5812_v44  ;;  %v7047_v44 = vld [vmem:[%s7865_s20 + $0x94] sm:$0xf]  ;;  %v5841_v4 = vld [vmem:[%s7865_s20 + $0x88] sm:$0xf0] }
 0x2f9   : > { %2800 = vmatpush.bf16.msra.mxu3 %v5884_v19  ;;  %2760 = vmatpush.bf16.msra.mxu0 %v5800_v59  ;;  %v5785_v59 = vld [vmem:[%s7865_s20 + $0x18] sm:$0xf0] }
 0x2fb   : > { %2773 = vmatpush.bf16.msra.mxu1 %v5872_v31  ;;  %2788 = vmatpush.bf16.msra.mxu2 %v5804_v1 }
 0x2fd   : > { %2801 = vmatpush.bf16.msra.mxu3 %v5876_v29  ;;  %2761 = vmatpush.bf16.msra.mxu0 %v5792_v38 }
 0x2ff   : > { %2774 = vmatpush.bf16.msra.mxu1 %v5864_v48  ;;  %v5849_v48 = vld [vmem:[%s7865_s20 + $0x98] sm:$0xf0] }
 0x301   : > { %2802 = vmatpush.bf16.msra.mxu3 %v5868_v52 }
 0x303   : > { %2775 = vmatpush.bf16.msra.mxu1 %v5856_v15 }
 0x305   : > { %2803 = vmatpush.bf16.msra.mxu3 %v5860_v42 }
 0x377   : > { %v2368_v57 = vpop.f32.mrf.mxu3 }
 0x378   : > { %v2383_v26 = vrot.slane %v2368_v57, 4  ;;  %v2388_v30 = vperm.slane %v2368_v57, %v8125_v28 }
 0x379   : > { %v2340_v45 = vpop.f32.mrf.mxu2 }
 0x37a   : > { %v2384_v25 = vsel %vm1597_vm0, 0.0, %v2383_v26  ;;  %v2393_v36 = vrot.slane %v2388_v30, 4  ;;  %v2373_v37 = vrot.slane %v2340_v45, 4  ;;  %v2378_v40 = vperm.slane %v2340_v45, %v8125_v28  ;;  %v7033_v45 = vld [vmem:[%s7865_s20 + $0x24] sm:$0xf] }
 0x37b   : > { %v2392_v41 = vperm.slane %v2384_v25, %v8125_v28  ;;  %v5847_v25 = vld [vmem:[%s7865_s20 + $0x90] sm:$0xf] }
 0x37c   : > { %v2374_v49 = vsel %vm1597_vm0, 0.0, %v2373_v37  ;;  %v2394_v50 = vsel %vm1597_vm0, %v2393_v36, %v2378_v40  ;;  %v2395_v51 = vrot.slane %v2378_v40, 4  ;;  %v7048_v36 = vld [vmem:[%s7865_s20 + $0x94] sm:$0xf0] }
 0x37d   : > { %v2405_v55 = vrot.slane %v2392_v41, 4  ;;  %v2382_v56 = vperm.slane %v2374_v49, %v8125_v28  ;;  %v8451_v58 = vperm.slane %v2394_v50, %v8153_v18  ;;  %v5783_v50 = vld [vmem:[%s7865_s20 + $0x10] sm:$0xf] }
 0x37e   : > { %v2396_v0 = vsel %vm1597_vm0, %v2388_v30, %v2395_v51  ;;  %v7032_v51 = vld [vmem:[%s7865_s20 + $0x14] sm:$0xf0] }
 0x37f   : > { %v2404_v5 = vperm.slane %v2396_v0, %v8153_v18  ;;  %v2406_v7 = vsel %vm1597_vm0, %v2405_v55, %v2382_v56  ;;  %v2407_v8 = vrot.slane %v2382_v56, 4  ;;  %v2417_v9 = vrot.slane %v8451_v58, 4  ;;  %v2370_v10 = vpop.f32.mrf.mxu3  ;;  %v7031_v56 = vld [vmem:[%s7865_s20 + $0x14] sm:$0xf] }
 0x380   : > { %v2412_v11 = vperm.slane %v2406_v7, %v8153_v18  ;;  %v2435_v13 = vrot.slane %v2370_v10, 4  ;;  %v2440_v60 = vperm.slane %v2370_v10, %v8125_v28  ;;  %v5796_v55 = vor.u32 %v7033_v45, %v5793_v32  ;;  %v5775_v10 = vld [vmem:[%s7865_s20] sm:$0xf] }
 0x381   : > { %v2408_v14 = vsel %vm1597_vm0, %v2392_v41, %v2407_v8  ;;  %v2419_v6 = vrot.slane %v2404_v5, 4  ;;  %v2342_v17 = vpop.f32.mrf.mxu2  ;;  %v2418_v24 = vsel %vm1597_vm0, 0.0, %v2417_v9  ;;  %v5848_v9 = vor.u32 %v7048_v36, %v5847_v25 }
 0x382   : > { %v2416_v19 = vperm.slane %v2408_v14, %v8153_v18  ;;  %v2421_v20 = vrot.slane %v2412_v11, 4  ;;  %v2436_v16 = vsel %vm1597_vm0, 0.0, %v2435_v13  ;;  %v2445_v22 = vrot.slane %v2440_v60, 4  ;;  %2789 = vmatpush.bf16.msra.mxu2 %v5796_v55  ;;  %v7030_v13 = vld [vmem:[%s7865_s20 + $0x4] sm:$0xf0] }
 0x383   : > { %v2420_v57 = vsel %vm1597_vm0, 0.0, %v2419_v6  ;;  %v2444_v12 = vperm.slane %v2436_v16, %v8125_v28  ;;  %v2425_v23 = vrot.slane %v2342_v17, 4  ;;  %v2430_v61 = vperm.slane %v2342_v17, %v8125_v28  ;;  %2776 = vmatpush.bf16.msra.mxu1 %v5848_v9 }
 0x384   : > { %v2423_v26 = vrot.slane %v2416_v19, 4  ;;  %v2482_v30 = vrot.slane %v2420_v57, 4  ;;  %v2422_v37 = vsel %vm1597_vm0, 0.0, %v2421_v20  ;;  %v2477_v52 = vsel %vm1597_vm0, %v2419_v6, %v8451_v58  ;;  %v7045_v58 = vld [vmem:[%s7865_s20 + $0x84] sm:$0xf] }
 0x385   : > { %v2457_v31 = vrot.slane %v2444_v12, 4  ;;  %v2426_v29 = vsel %vm1597_vm0, 0.0, %v2425_v23  ;;  %v2446_v41 = vsel %vm1597_vm0, %v2445_v22, %v2430_v61  ;;  %v2447_v43 = vrot.slane %v2430_v61, 4  ;;  %v5777_v57 = vld [vmem:[%s7865_s20 + $0x8] sm:$0xf0] }
 0x386   : > { %v2424_v33 = vsel %vm1597_vm0, 0.0, %v2423_v26  ;;  %v2483_v34 = vsel %vm1597_vm0, %v2482_v30, %v2418_v24  ;;  %v2434_v35 = vperm.slane %v2426_v29, %v8125_v28  ;;  %v2452_v47 = vperm.slane %v2446_v41, %v8153_v18 }
 0x387   : > { %v2487_v40 = vperm.slane %v2483_v34, %v8125_v28  ;;  %v2493_v27 = vrot.slane %v2424_v33, 4  ;;  %v2488_v63 = vsel %vm1597_vm0, %v2423_v26, %v2412_v11  ;;  %v2448_v1 = vsel %vm1597_vm0, %v2440_v60, %v2447_v43 }
 0x388   : > { %v2458_v46 = vsel %vm1597_vm0, %v2457_v31, %v2434_v35  ;;  %v2459_v49 = vrot.slane %v2434_v35, 4  ;;  %v2456_v7 = vperm.slane %v2448_v1, %v8153_v18  ;;  %v2469_v11 = vrot.slane %v2452_v47, 4 }
 0x389   : > { %v2494_v53 = vsel %vm1597_vm0, %v2493_v27, %v2422_v37  ;;  %v2464_v54 = vperm.slane %v2458_v46, %v8153_v18  ;;  %v2499_v5 = vrot.slane %v2487_v40, 4  ;;  %v5852_v14 = vor.u32 %v7047_v44, %v5849_v48 }
 0x38a   : > { %v2498_v0 = vperm.slane %v2494_v53, %v8125_v28  ;;  %v2460_v2 = vsel %vm1597_vm0, %v2444_v12, %v2459_v49  ;;  %v5784_v60 = vor.u32 %v7032_v51, %v5783_v50  ;;  %v2471_v17 = vrot.slane %v2456_v7, 4 }
 0x38b   : > { %v2468_v8 = vperm.slane %v2460_v2, %v8153_v18  ;;  %v2473_v15 = vrot.slane %v2464_v54, 4  ;;  %v5788_v19 = vor.u32 %v7031_v56, %v5785_v59  ;;  %2804 = vmatpush.bf16.msra.mxu3 %v5852_v14  ;;  %v5840_v20 = vor.u32 %v7046_v3, %v5839_v62  ;;  %v7446_v14 = vld [vmem:[#allocation2 + $0x10] sm:$0xff] }
 0x38c   : > { %v2505_v6 = vrot.slane %v2498_v0, 4  ;;  %2762 = vmatpush.bf16.msra.mxu0 %v5784_v60  ;;  %v5844_v16 = vor.u32 %v7045_v58, %v5841_v4  ;;  %v5776_v21 = vor.u32 %v7030_v13, %v5775_v10  ;;  %v2481_v12 = vperm.slane %v2477_v52, %v8125_v28 }
 0x38d   : > { %v2475_v42 = vrot.slane %v2468_v8, 4  ;;  %v2492_v22 = vperm.slane %v2488_v63, %v8125_v28  ;;  %v2472_v23 = vsel %vm1597_vm0, 0.0, %v2471_v17  ;;  %2790 = vmatpush.bf16.msra.mxu2 %v5788_v19  ;;  %v2470_v26 = vsel %vm1597_vm0, 0.0, %v2469_v11  ;;  %2777 = vmatpush.bf16.msra.mxu1 %v5840_v20 }
 0x38e   : > { %v2474_v30 = vsel %vm1597_vm0, 0.0, %v2473_v15  ;;  %v2520_v31 = vrot.slane %v2472_v23, 4  ;;  %v2515_v61 = vsel %vm1597_vm0, %v2471_v17, %v2452_v47  ;;  %v5780_v38 = vor.u32 %v7029_v39, %v5777_v57  ;;  %v7449_v23 = vld [vmem:[#allocation2 + $0x8] sm:$0xff] }
 0x38f   : > { %v2476_v24 = vsel %vm1597_vm0, 0.0, %v2475_v42  ;;  %v2500_v45 = vsel %vm1597_vm0, %v2499_v5, %v2481_v12  ;;  %v2506_v32 = vsel %vm1597_vm0, %v2505_v6, %v2492_v22  ;;  %v2526_v34 = vsel %vm1597_vm0, %v2475_v42, %v2464_v54  ;;  %2805 = vmatpush.bf16.msra.mxu3 %v5844_v16  ;;  %v7447_v6 = vld [vmem:[#allocation2] sm:$0xff]  ;;  %v7448_v12 = vld [vmem:[#allocation2 + $0x18] sm:$0xff] }
 0x390   : > { %v2531_v29 = vrot.slane %v2476_v24, 4  ;;  %v2521_v33 = vsel %vm1597_vm0, %v2520_v31, %v2470_v26  ;;  %2763 = vmatpush.bf16.msra.mxu0 %v5776_v21  ;;  %v2504_v37 = vperm.slane %v2500_v45, %v8153_v18  ;;  %v2510_v40 = vperm.slane %v2506_v32, %v8153_v18  ;;  %v7121_v45 = vld [vmem:[%s7871_s28 + $0x1dc] sm:$0xf0] }
 0x391   : > { %v2525_v25 = vperm.slane %v2521_v33, %v8125_v28  ;;  %2791 = vmatpush.bf16.msra.mxu2 %v5780_v38  ;;  %v2519_v27 = vperm.slane %v2515_v61, %v8125_v28  ;;  %v2530_v41 = vperm.slane %v2526_v34, %v8125_v28  ;;  %v6127_v38 = vld [vmem:[%s7871_s28 + $0x1c0] sm:$0xf] }
 0x392   : > { %v2532_v35 = vsel %vm1597_vm0, %v2531_v29, %v2474_v30  ;;  %v2513_v46 = vrot.slane %v2504_v37, 4  ;;  %v2511_v51 = vrot.slane %v2510_v40, 4  ;;  %v7658_v30 = vmov 256.0   ;;  %v6383_v32 = vld [vmem:[%s7871_s28 + $0x3c0] sm:$0xf] }
 0x393   : > { %v2536_v36 = vperm.slane %v2532_v35, %v8125_v28  ;;  %v2537_v44 = vrot.slane %v2525_v25, 4  ;;  %7432 = vrcp.f32 %v7658_v30  ;;  %v6128_v33 = vor.u32 %v7121_v45, %v6127_v38  ;;  %v7185_v34 = vld [vmem:[%s7871_s28 + $0x3dc] sm:$0xf0]  ;;  %v7117_v35 = vld [vmem:[%s7871_s28 + $0x1c4] sm:$0xf] }
 0x394   : > { %v2514_v54 = vsel %vm1597_vm0, %v2510_v40, %v2513_v46  ;;  %v2512_v28 = vsel %vm1597_vm0, %v2511_v51, %v2504_v37  ;;  %v6129_v25 = vld [vmem:[%s7871_s28 + $0x1e0] sm:$0xf0] }
 0x395   : > { %v2543_v48 = vrot.slane %v2536_v36, 4  ;;  %v2538_v43 = vsel %vm1597_vm0, %v2537_v44, %v2519_v27  ;;  %v6384_v36 = vor.u32 %v7185_v34, %v6383_v32  ;;  %v6132_v37 = vor.u32 %v7117_v35, %v6129_v25  ;;  %v7181_v40 = vld [vmem:[%s7871_s28 + $0x3c4] sm:$0xf]  ;;  %3692 = vmatpush.bf16.msrb.mxu0 %v6128_v33 }
 0x396   : > { %v2542_v49 = vperm.slane %v2538_v43, %v8153_v18  ;;  %v6385_v27 = vld [vmem:[%s7871_s28 + $0x3e0] sm:$0xf0]  ;;  %v6351_v43 = vld [vmem:[%s7871_s28 + $0x380] sm:$0xf] }
 0x397   : > { %v2544_v47 = vsel %vm1597_vm0, %v2543_v48, %v2530_v41  ;;  %v6095_v41 = vld [vmem:[%s7871_s28 + $0x180] sm:$0xf]  ;;  %v6388_v44 = vor.u32 %v7181_v40, %v6385_v27  ;;  %3706 = vmatpush.bf16.msrb.mxu1 %v6384_v36  ;;  %3720 = vmatpush.bf16.msrb.mxu2 %v6132_v37  ;;  %v6097_v51 = vld [vmem:[%s7871_s28 + $0x1a0] sm:$0xf0] }
 0x398   : > { %v2548_v50 = vperm.slane %v2544_v47, %v8153_v18  ;;  %v2551_v52 = vrot.slane %v2542_v49, 4  ;;  %v2587_v18 = vld [vmem:[%s9329_s4] sm:$0x3]  ;;  %v6001_v30 = vld [vmem:[%s7871_s28 + $0xe0] sm:$0xf0] }
 0x399   : > { %v2588_v63 = vunpack.c.l.bf16 %v2587_v18  ;;  %v8553_v31 = vpop.eup %7432  ;;  %v7113_v48 = vld [vmem:[%s7871_s28 + $0x19c] sm:$0xf0]  ;;  %3734 = vmatpush.bf16.msrb.mxu3 %v6388_v44 }
 0x39a   : > { %v2549_v53 = vrot.slane %v2548_v50, 4  ;;  %v2552_v55 = vsel %vm1597_vm0, %v2548_v50, %v2551_v52  ;;  %v2825_v29 = vmul.f32 256.0, %v8553_v31  ;;  %v7177_v47 = vld [vmem:[%s7871_s28 + $0x39c] sm:$0xf0]  ;;  %v6096_v46 = vor.u32 %v7113_v48, %v6095_v41  ;;  %v7109_v50 = vld [vmem:[%s7871_s28 + $0x184] sm:$0xf] }
 0x39b   : > { %v2554_v59 = vpack.c.bf16 %v2552_v55, %v2514_v54  ;;  %v2590_v0 = vperm.slane %v2588_v63, 0  ;;  %v2591_v2 = vperm.slane %v2588_v63, 2  ;;  %v7173_v52 = vld [vmem:[%s7871_s28 + $0x384] sm:$0xf]  ;;  %v6100_v54 = vor.u32 %v7109_v50, %v6097_v51  ;;  %v7169_v18 = vld [vmem:[%s7871_s28 + $0x35c] sm:$0xf0] }
 0x39c   : > { %v2550_v56 = vsel %vm1597_vm0, %v2549_v53, %v2542_v49  ;;  %v2826_v61 = vsub.f32 1.0, %v2825_v29  ;;  %v6352_v49 = vor.u32 %v7177_v47, %v6351_v43  ;;  %v6353_v55 = vld [vmem:[%s7871_s28 + $0x3a0] sm:$0xf0]  ;;  %3693 = vmatpush.bf16.msrb.mxu0 %v6096_v46  ;;  %vm2829_vm0 = vweird.f32 %v8553_v31  ;;  %v5967_v47 = vld [vmem:[%s7871_s28 + $0x80] sm:$0xf] }
 0x39d   : > { %v2553_v62 = vpack.c.bf16 %v2550_v56, %v2512_v28  ;;  %2778 = vmatmul.bf16.vlgmr.msra.gmra.mxu1 %v2554_v59  ;;  %2806 = vmatmul.bf16.vlgmr.msra.gmra.mxu3 %v2554_v59  ;;  %v2594_v1 = vperm.slane %v2590_v0, 0  ;;  %v2595_v4 = vperm.slane %v2591_v2, 0  ;;  %v6063_v28 = vld [vmem:[%s7871_s28 + $0x140] sm:$0xf]  ;;  %v6356_v59 = vor.u32 %v7173_v52, %v6353_v55  ;;  %v7101_v63 = vld [vmem:[%s7871_s28 + $0x144] sm:$0xf] }
 0x39e   : > { %v2827_v53 = vmul.f32 %v8553_v31, %v2826_v61  ;;  %v7105_v56 = vld [vmem:[%s7871_s28 + $0x15c] sm:$0xf0]  ;;  %v7165_v2 = vld [vmem:[%s7871_s28 + $0x344] sm:$0xf]  ;;  %3707 = vmatpush.bf16.msrb.mxu1 %v6352_v49  ;;  %3721 = vmatpush.bf16.msrb.mxu2 %v6100_v54 }
 0x39f   : > { %2764 = vmatmul.bf16.vlgmr.msra.gmra.mxu0 %v2553_v62  ;;  %2792 = vmatmul.bf16.vlgmr.msra.gmra.mxu2 %v2553_v62  ;;  %v6319_v62 = vld [vmem:[%s7871_s28 + $0x340] sm:$0xf]  ;;  %v6064_v0 = vor.u32 %v7105_v56, %v6063_v28  ;;  %v7149_v29 = vld [vmem:[%s7871_s28 + $0x2c4] sm:$0xf] }
 0x3a0   : > { %3735 = vmatpush.bf16.msrb.mxu3 %v6356_v59  ;;  %v6257_v61 = vld [vmem:[%s7871_s28 + $0x2e0] sm:$0xf0]  ;;  %v7081_v46 = vld [vmem:[%s7871_s28 + $0x9c] sm:$0xf0] }
 0x3a1   : > { %3694 = vmatpush.bf16.msrb.mxu0 %v6064_v0  ;;  %v6260_v35 = vor.u32 %v7149_v29, %v6257_v61  ;;  %v6223_v49 = vld [vmem:[%s7871_s28 + $0x280] sm:$0xf]  ;;  %v7077_v51 = vld [vmem:[%s7871_s28 + $0x84] sm:$0xf]  ;;  %v6137_v29 = vld [vmem:[%s7871_s28 + $0x1e8] sm:$0xf0] }
 0x3a2   : > { %v7145_v50 = vld [vmem:[%s7871_s28 + $0x29c] sm:$0xf0]  ;;  %v7141_v54 = vld [vmem:[%s7871_s28 + $0x284] sm:$0xf]  ;;  %v7182_v61 = vld [vmem:[%s7871_s28 + $0x3cc] sm:$0xf] }
 0x3a3   : > { %v6224_v52 = vor.u32 %v7145_v50, %v6223_v49  ;;  %v6225_v55 = vld [vmem:[%s7871_s28 + $0x2a0] sm:$0xf0]  ;;  %v5935_v56 = vld [vmem:[%s7871_s28 + $0x40] sm:$0xf]  ;;  %v7106_v49 = vld [vmem:[%s7871_s28 + $0x164] sm:$0xf0] }
 0x3a4   : > { %v6228_v28 = vor.u32 %v7141_v54, %v6225_v55  ;;  %v7073_v59 = vld [vmem:[%s7871_s28 + $0x5c] sm:$0xf0]  ;;  %v7069_v0 = vld [vmem:[%s7871_s28 + $0x44] sm:$0xf] }
 0x41a   : > { %v2779_v5 = vpop.f32.mrf.mxu1 }
 0x41c   : > { %v2765_v3 = vpop.f32.mrf.mxu0 }
 0x41d   : > { %v2766_v58 = vadd.f32 %v2765_v3, %v2594_v1  ;;  %v6321_v3 = vld [vmem:[%s7871_s28 + $0x360] sm:$0xf0] }
 0x41f   : > { %v2780_v9 = vadd.f32 %v2779_v5, %v2766_v58  ;;  %v6320_v58 = vor.u32 %v7169_v18, %v6319_v62  ;;  %v6031_v5 = vld [vmem:[%s7871_s28 + $0x100] sm:$0xf]  ;;  %v5936_v18 = vor.u32 %v7073_v59, %v5935_v56  ;;  %v7166_v56 = vld [vmem:[%s7871_s28 + $0x34c] sm:$0xf] }
 0x420   : > { %v2807_v7 = vpop.f32.mrf.mxu3  ;;  %v6191_v62 = vld [vmem:[%s7871_s28 + $0x240] sm:$0xf]  ;;  %v6329_v59 = vld [vmem:[%s7871_s28 + $0x368] sm:$0xf0] }
 0x421   : > { %v8541_v60 = vadd.f32 %v7446_v14, %v2780_v9  ;;  %v2828_v9 = vadd.f32 %v8553_v31, %v2827_v53  ;;  %v7157_v14 = vld [vmem:[%s7871_s28 + $0x304] sm:$0xf]  ;;  %3708 = vmatpush.bf16.msrb.mxu1 %v6320_v58 }
 0x422   : > { %v2793_v8 = vpop.f32.mrf.mxu2  ;;  %v2781_v19 = vpop.f32.mrf.mxu1  ;;  %v7133_v58 = vld [vmem:[%s7871_s28 + $0x244] sm:$0xf] }
 0x423   : > { %v2794_v10 = vadd.f32 %v2793_v8, %v2595_v4  ;;  %v6287_v8 = vld [vmem:[%s7871_s28 + $0x300] sm:$0xf] }
 0x424   : > { %v2767_v13 = vpop.f32.mrf.mxu0 }
 0x425   : > { %v2808_v11 = vadd.f32 %v2807_v7, %v2794_v10  ;;  %v2768_v15 = vadd.f32 %v2767_v13, %v2594_v1  ;;  %v6065_v1 = vld [vmem:[%s7871_s28 + $0x160] sm:$0xf0]  ;;  %v7097_v7 = vld [vmem:[%s7871_s28 + $0x11c] sm:$0xf0]  ;;  %v6324_v10 = vor.u32 %v7165_v2, %v6321_v3 }
 0x426   : > { %v7161_v13 = vld [vmem:[%s7871_s28 + $0x31c] sm:$0xf0] }
 0x427   : > { %v8543_v17 = vadd.f32 %v7447_v6, %v2808_v11  ;;  %v2782_v16 = vadd.f32 %v2781_v19, %v2768_v15  ;;  %v7093_v11 = vld [vmem:[%s7871_s28 + $0x104] sm:$0xf]  ;;  %v6288_v19 = vor.u32 %v7161_v13, %v6287_v8  ;;  %3736 = vmatpush.bf16.msrb.mxu3 %v6324_v10  ;;  %v7065_v8 = vld [vmem:[%s7871_s28 + $0x1c] sm:$0xf0] }
 0x428   : > { %v2809_v39 = vpop.f32.mrf.mxu3  ;;  %v6033_v15 = vld [vmem:[%s7871_s28 + $0x120] sm:$0xf0]  ;;  %v7129_v13 = vld [vmem:[%s7871_s28 + $0x21c] sm:$0xf0] }
 0x429   : > { %v2818_v42 = vadd.f32 %v8543_v17, %v8541_v60  ;;  %v8547_v22 = vadd.f32 %v7448_v12, %v2782_v16  ;;  %v6289_v6 = vld [vmem:[%s7871_s28 + $0x320] sm:$0xf0]  ;;  %v5999_v16 = vld [vmem:[%s7871_s28 + $0xc0] sm:$0xf]  ;;  %3709 = vmatpush.bf16.msrb.mxu1 %v6288_v19 }
 0x42a   : > { %v2795_v20 = vpop.f32.mrf.mxu2  ;;  %v6292_v12 = vor.u32 %v7157_v14, %v6289_v6  ;;  %v6161_v19 = vld [vmem:[%s7871_s28 + $0x220] sm:$0xf0] }
 0x42b   : > { %v2796_v21 = vadd.f32 %v2795_v20, %v2595_v4  ;;  %2819 = vadd.xlane.f32.xlu2 %v2818_v42  ;;  %v6068_v4 = vor.u32 %v7101_v63, %v6065_v1  ;;  %v6032_v42 = vor.u32 %v7097_v7, %v6031_v5  ;;  %v6036_v20 = vor.u32 %v7093_v11, %v6033_v15  ;;  %v7137_v63 = vld [vmem:[%s7871_s28 + $0x25c] sm:$0xf0]  ;;  %v5937_v1 = vld [vmem:[%s7871_s28 + $0x60] sm:$0xf0] }
 0x42c   : > { %3737 = vmatpush.bf16.msrb.mxu3 %v6292_v12  ;;  %v6192_v2 = vor.u32 %v7137_v63, %v6191_v62  ;;  %v5940_v3 = vor.u32 %v7069_v0, %v5937_v1  ;;  %v5903_v7 = vld [vmem:[%s7871_s28] sm:$0xf]  ;;  %v7061_v11 = vld [vmem:[%s7871_s28 + $0x4] sm:$0xf]  ;;  %v7186_v12 = vld [vmem:[%s7871_s28 + $0x3e4] sm:$0xf0]  ;;  %v6332_v62 = vor.u32 %v7166_v56, %v6329_v59 }
 0x42d   : > { %v2810_v57 = vadd.f32 %v2809_v39, %v2796_v21  ;;  %3722 = vmatpush.bf16.msrb.mxu2 %v6068_v4  ;;  %v7089_v21 = vld [vmem:[%s7871_s28 + $0xdc] sm:$0xf0]  ;;  %3695 = vmatpush.bf16.msrb.mxu0 %v6032_v42  ;;  %v6193_v4 = vld [vmem:[%s7871_s28 + $0x260] sm:$0xf0]  ;;  %v5904_v10 = vor.u32 %v7065_v8, %v5903_v7  ;;  %v6039_v63 = vld [vmem:[%s7871_s28 + $0x108] sm:$0xf] }
 0x42e   : > { %v6255_v39 = vld [vmem:[%s7871_s28 + $0x2c0] sm:$0xf]  ;;  %v6000_v45 = vor.u32 %v7089_v21, %v5999_v16  ;;  %v6196_v5 = vor.u32 %v7133_v58, %v6193_v4  ;;  %v5905_v15 = vld [vmem:[%s7871_s28 + $0x20] sm:$0xf0]  ;;  %v7122_v21 = vld [vmem:[%s7871_s28 + $0x1e4] sm:$0xf0] }
 0x42f   : > { %v8549_v24 = vadd.f32 %v7449_v23, %v2810_v57  ;;  %v8595_v57 = vsel %vm2829_vm0, %v8553_v31, %v2828_v9  ;;  %v7153_v23 = vld [vmem:[%s7871_s28 + $0x2dc] sm:$0xf0]  ;;  %v5908_v6 = vor.u32 %v7061_v11, %v5905_v15  ;;  %v7125_v42 = vld [vmem:[%s7871_s28 + $0x204] sm:$0xf]  ;;  %v7098_v0 = vld [vmem:[%s7871_s28 + $0x124] sm:$0xf0] }
 0x430   : > { %v6256_v33 = vor.u32 %v7153_v23, %v6255_v39  ;;  %3738 = vmatpush.bf16.msrb.mxu3 %v6260_v35  ;;  %v6159_v9 = vld [vmem:[%s7871_s28 + $0x200] sm:$0xf]  ;;  %v6164_v16 = vor.u32 %v7125_v42, %v6161_v19  ;;  %v6391_v39 = vld [vmem:[%s7871_s28 + $0x3c8] sm:$0xf]  ;;  %v6040_v1 = vor.u32 %v7098_v0, %v6039_v63  ;;  %v7094_v58 = vld [vmem:[%s7871_s28 + $0x10c] sm:$0xf] }
 0x431   : > { %v2821_v26 = vadd.f32 %v8549_v24, %v8547_v22  ;;  %3723 = vmatpush.bf16.msrb.mxu2 %v6036_v20  ;;  %3696 = vmatpush.bf16.msrb.mxu0 %v6000_v45  ;;  %v6160_v14 = vor.u32 %v7129_v13, %v6159_v9  ;;  %v6135_v20 = vld [vmem:[%s7871_s28 + $0x1c8] sm:$0xf]  ;;  %v6393_v45 = vld [vmem:[%s7871_s28 + $0x3e8] sm:$0xf0] }
 0x432   : > { %3710 = vmatpush.bf16.msrb.mxu1 %v6256_v33  ;;  %v6136_v23 = vor.u32 %v7122_v21, %v6135_v20  ;;  %v7114_v33 = vld [vmem:[%s7871_s28 + $0x1a4] sm:$0xf0]  ;;  %v7158_v7 = vld [vmem:[%s7871_s28 + $0x30c] sm:$0xf] }
 0x433   : > { %2822 = vadd.xlane.f32.xlu0 %v2821_v26  ;;  %v7085_v26 = vld [vmem:[%s7871_s28 + $0xc4] sm:$0xf]  ;;  %v6297_v8 = vld [vmem:[%s7871_s28 + $0x328] sm:$0xf0]  ;;  %v6007_v13 = vld [vmem:[%s7871_s28 + $0xc8] sm:$0xf] }
 0x434   : > { %v6004_v34 = vor.u32 %v7085_v26, %v6001_v30  ;;  %3739 = vmatpush.bf16.msrb.mxu3 %v6228_v28  ;;  %v6392_v26 = vor.u32 %v7186_v12, %v6391_v39  ;;  %v7118_v30 = vld [vmem:[%s7871_s28 + $0x1cc] sm:$0xf]  ;;  %v7090_v11 = vld [vmem:[%s7871_s28 + $0xe4] sm:$0xf0] }
 0x435   : > { %v6263_v15 = vld [vmem:[%s7871_s28 + $0x2c8] sm:$0xf]  ;;  %v6009_v42 = vld [vmem:[%s7871_s28 + $0xe8] sm:$0xf0]  ;;  %v6008_v20 = vor.u32 %v7090_v11, %v6007_v13 }
 0x436   : > { %3724 = vmatpush.bf16.msrb.mxu2 %v6004_v34  ;;  %3711 = vmatpush.bf16.msrb.mxu1 %v6224_v52  ;;  %v6396_v34 = vor.u32 %v7182_v61, %v6393_v45  ;;  %v7102_v52 = vld [vmem:[%s7871_s28 + $0x14c] sm:$0xf]  ;;  %v5975_v12 = vld [vmem:[%s7871_s28 + $0x88] sm:$0xf] }
 0x437   : > { %v7150_v21 = vld [vmem:[%s7871_s28 + $0x2cc] sm:$0xf]  ;;  %v7146_v61 = vld [vmem:[%s7871_s28 + $0x2a4] sm:$0xf0] }
 0x438   : > { %3740 = vmatpush.bf16.msrb.mxu3 %v6196_v5  ;;  %v6041_v5 = vld [vmem:[%s7871_s28 + $0x128] sm:$0xf0]  ;;  %v6167_v59 = vld [vmem:[%s7871_s28 + $0x208] sm:$0xf] }
 0x439   : > { %v6044_v9 = vor.u32 %v7094_v58, %v6041_v5  ;;  %v6265_v39 = vld [vmem:[%s7871_s28 + $0x2e8] sm:$0xf0] }
 0x43a   : > { %3712 = vmatpush.bf16.msrb.mxu1 %v6192_v2  ;;  %v6295_v2 = vld [vmem:[%s7871_s28 + $0x308] sm:$0xf]  ;;  %v7078_v45 = vld [vmem:[%s7871_s28 + $0x8c] sm:$0xf] }
 0x43b   : > { %v6169_v5 = vld [vmem:[%s7871_s28 + $0x228] sm:$0xf0] }
 0x43c   : > { %3741 = vmatpush.bf16.msrb.mxu3 %v6164_v16 }
 0x43e   : > { %3713 = vmatpush.bf16.msrb.mxu1 %v6160_v14  ;;  %v7154_v14 = vld [vmem:[%s7871_s28 + $0x2e4] sm:$0xf0] }
 0x43f   : > { %v6264_v16 = vor.u32 %v7154_v14, %v6263_v15  ;;  %v2816_v15 = vld [vmem:[%s9331_s24] sm:$0x3] }
 0x440   : > { %3790 = vmatpush.bf16.msra.mxu3 %v6396_v34 }
 0x442   : > { %3762 = vmatpush.bf16.msra.mxu1 %v6392_v26 }
 0x49e   : > { %v2820_v38 = vpop.xlane.xlu2 %2819 }
 0x49f   : > { %v2831_v32 = vmul.f32 %v8595_v57, %v2820_v38  ;;  %v6140_v38 = vor.u32 %v7118_v30, %v6137_v29  ;;  %v7082_v30 = vld [vmem:[%s7871_s28 + $0xa4] sm:$0xf0] }
 0x4a0   : > { %v6231_v29 = vld [vmem:[%s7871_s28 + $0x288] sm:$0xf] }
 0x4a1   : > { %v8604_v31 = vsub.f32 %v8541_v60, %v2831_v32  ;;  %v8607_v25 = vsub.f32 %v8543_v17, %v2831_v32  ;;  %v6103_v32 = vld [vmem:[%s7871_s28 + $0x188] sm:$0xf] }
 0x4a2   : > { %v6104_v35 = vor.u32 %v7114_v33, %v6103_v32  ;;  %v5977_v32 = vld [vmem:[%s7871_s28 + $0xa8] sm:$0xf0] }
 0x4a3   : > { %v2837_v36 = vmul.f32 %v8604_v31, %v8604_v31  ;;  %v2838_v37 = vmul.f32 %v8607_v25, %v8607_v25 }
 0x4a5   : > { %v2841_v60 = vadd.f32 %v2838_v37, %v2837_v36  ;;  %v6359_v36 = vld [vmem:[%s7871_s28 + $0x388] sm:$0xf] }
 0x4a6   : > { %v2823_v40 = vpop.xlane.xlu0 %2822  ;;  %v7178_v37 = vld [vmem:[%s7871_s28 + $0x3a4] sm:$0xf0] }
 0x4a7   : > { %v2832_v17 = vmul.f32 %v8595_v57, %v2823_v40  ;;  %2842 = vadd.xlane.f32.xlu1 %v2841_v60  ;;  %v7110_v60 = vld [vmem:[%s7871_s28 + $0x18c] sm:$0xf]  ;;  %v6360_v40 = vor.u32 %v7178_v37, %v6359_v36 }
 0x4a8   : > { %v6233_v36 = vld [vmem:[%s7871_s28 + $0x2a8] sm:$0xf0] }
 0x4a9   : > { %v8615_v27 = vsub.f32 %v8547_v22, %v2832_v17  ;;  %v8618_v41 = vsub.f32 %v8549_v24, %v2832_v17  ;;  %v5968_v22 = vor.u32 %v7081_v46, %v5967_v47  ;;  %v5969_v24 = vld [vmem:[%s7871_s28 + $0xa0] sm:$0xf0]  ;;  %v6105_v17 = vld [vmem:[%s7871_s28 + $0x1a8] sm:$0xf0]  ;;  %v6071_v46 = vld [vmem:[%s7871_s28 + $0x148] sm:$0xf]  ;;  %3763 = vmatpush.bf16.msra.mxu1 %v6360_v40  ;;  %v6232_v40 = vor.u32 %v7146_v61, %v6231_v29 }
 0x4aa   : > { %v5972_v53 = vor.u32 %v7077_v51, %v5969_v24  ;;  %v6072_v51 = vor.u32 %v7106_v49, %v6071_v46  ;;  %v7170_v24 = vld [vmem:[%s7871_s28 + $0x364] sm:$0xf0] }
 0x4ab   : > { %v2839_v44 = vmul.f32 %v8615_v27, %v8615_v27  ;;  %v2840_v48 = vmul.f32 %v8618_v41, %v8618_v41  ;;  %3697 = vmatpush.bf16.msrb.mxu0 %v5968_v22  ;;  %v6327_v22 = vld [vmem:[%s7871_s28 + $0x348] sm:$0xf] }
 0x4ac   : > { %3725 = vmatpush.bf16.msrb.mxu2 %v5972_v53  ;;  %v6073_v53 = vld [vmem:[%s7871_s28 + $0x168] sm:$0xf0]  ;;  %v6328_v55 = vor.u32 %v7170_v24, %v6327_v22 }
 0x4ad   : > { %v2844_v43 = vadd.f32 %v2840_v48, %v2839_v44  ;;  %v7174_v44 = vld [vmem:[%s7871_s28 + $0x38c] sm:$0xf]  ;;  %v6076_v28 = vor.u32 %v7102_v52, %v6073_v53 }
 0x4ae   : > { %v6361_v48 = vld [vmem:[%s7871_s28 + $0x3a8] sm:$0xf0]  ;;  %3764 = vmatpush.bf16.msra.mxu1 %v6328_v55  ;;  %v5911_v55 = vld [vmem:[%s7871_s28 + $0x8] sm:$0xf] }
 0x4af   : > { %2845 = vadd.xlane.f32.xlu2 %v2844_v43  ;;  %3698 = vmatpush.bf16.msrb.mxu0 %v5936_v18  ;;  %v6108_v43 = vor.u32 %v7110_v60, %v6105_v17  ;;  %v6364_v47 = vor.u32 %v7174_v44, %v6361_v48  ;;  %v5976_v60 = vor.u32 %v7082_v30, %v5975_v12  ;;  %v5943_v17 = vld [vmem:[%s7871_s28 + $0x48] sm:$0xf]  ;;  %v7070_v22 = vld [vmem:[%s7871_s28 + $0x4c] sm:$0xf] }
 0x4b0   : > { %3726 = vmatpush.bf16.msrb.mxu2 %v5940_v3  ;;  %v7162_v3 = vld [vmem:[%s7871_s28 + $0x324] sm:$0xf0]  ;;  %v5980_v44 = vor.u32 %v7078_v45, %v5977_v32  ;;  %v6201_v24 = vld [vmem:[%s7871_s28 + $0x268] sm:$0xf0]  ;;  %v6143_v45 = vld [vmem:[%s7871_s28 + $0x1d0] sm:$0xf] }
 0x4b1   : > { %3791 = vmatpush.bf16.msra.mxu3 %v6364_v47  ;;  %v6296_v4 = vor.u32 %v7162_v3, %v6295_v2  ;;  %v7074_v48 = vld [vmem:[%s7871_s28 + $0x64] sm:$0xf0]  ;;  %v5913_v2 = vld [vmem:[%s7871_s28 + $0x28] sm:$0xf0]  ;;  %v7123_v32 = vld [vmem:[%s7871_s28 + $0x1ec] sm:$0xf0] }
 0x4b2   : > { %v7138_v47 = vld [vmem:[%s7871_s28 + $0x264] sm:$0xf0]  ;;  %v5944_v53 = vor.u32 %v7074_v48, %v5943_v17  ;;  %v6401_v17 = vld [vmem:[%s7871_s28 + $0x3f0] sm:$0xf0] }
 0x4b3   : > { %3699 = vmatpush.bf16.msrb.mxu0 %v5904_v10  ;;  %v6300_v10 = vor.u32 %v7158_v7, %v6297_v8  ;;  %3765 = vmatpush.bf16.msra.mxu1 %v6296_v4  ;;  %v7126_v4 = vld [vmem:[%s7871_s28 + $0x20c] sm:$0xf] }
 0x4b4   : > { %3727 = vmatpush.bf16.msrb.mxu2 %v5908_v6  ;;  %v7086_v6 = vld [vmem:[%s7871_s28 + $0xcc] sm:$0xf]  ;;  %v6172_v11 = vor.u32 %v7126_v4, %v6169_v5  ;;  %v7167_v4 = vld [vmem:[%s7871_s28 + $0x354] sm:$0xf] }
 0x4b5   : > { %3792 = vmatpush.bf16.msra.mxu3 %v6332_v62  ;;  %v6012_v26 = vor.u32 %v7086_v6, %v6009_v42  ;;  %v7130_v62 = vld [vmem:[%s7871_s28 + $0x224] sm:$0xf0]  ;;  %v6337_v5 = vld [vmem:[%s7871_s28 + $0x370] sm:$0xf0] }
 0x4b7   : > { %3748 = vmatpush.bf16.msra.mxu0 %v6136_v23  ;;  %3766 = vmatpush.bf16.msra.mxu1 %v6264_v16 }
 0x4b8   : > { %3776 = vmatpush.bf16.msra.mxu2 %v6140_v38  ;;  %v6268_v38 = vor.u32 %v7150_v21, %v6265_v39 }
 0x4b9   : > { %3793 = vmatpush.bf16.msra.mxu3 %v6300_v10 }
 0x4bb   : > { %3749 = vmatpush.bf16.msra.mxu0 %v6104_v35  ;;  %v7142_v35 = vld [vmem:[%s7871_s28 + $0x28c] sm:$0xf]  ;;  %3767 = vmatpush.bf16.msra.mxu1 %v6232_v40  ;;  %v7183_v40 = vld [vmem:[%s7871_s28 + $0x3d4] sm:$0xf] }
 0x4bc   : > { %3777 = vmatpush.bf16.msra.mxu2 %v6108_v43  ;;  %v6199_v43 = vld [vmem:[%s7871_s28 + $0x248] sm:$0xf]  ;;  %v6236_v49 = vor.u32 %v7142_v35, %v6233_v36  ;;  %v7119_v35 = vld [vmem:[%s7871_s28 + $0x1d4] sm:$0xf] }
 0x4bd   : > { %3794 = vmatpush.bf16.msra.mxu3 %v6268_v38 }
 0x4bf   : > { %3750 = vmatpush.bf16.msra.mxu0 %v6072_v51  ;;  %v7134_v51 = vld [vmem:[%s7871_s28 + $0x24c] sm:$0xf] }
 0x4c0   : > { %3778 = vmatpush.bf16.msra.mxu2 %v6076_v28  ;;  %v7066_v28 = vld [vmem:[%s7871_s28 + $0x24] sm:$0xf0]  ;;  %v6204_v0 = vor.u32 %v7134_v51, %v6201_v24  ;;  %v6367_v51 = vld [vmem:[%s7871_s28 + $0x390] sm:$0xf] }
 0x4c1   : > { %3795 = vmatpush.bf16.msra.mxu3 %v6236_v49  ;;  %v5912_v58 = vor.u32 %v7066_v28, %v5911_v55  ;;  %v7115_v49 = vld [vmem:[%s7871_s28 + $0x1ac] sm:$0xf0]  ;;  %v6369_v55 = vld [vmem:[%s7871_s28 + $0x3b0] sm:$0xf0] }
 0x4c2   : > { %v7179_v24 = vld [vmem:[%s7871_s28 + $0x3ac] sm:$0xf0] }
 0x4c3   : > { %3751 = vmatpush.bf16.msra.mxu0 %v6040_v1  ;;  %v7062_v1 = vld [vmem:[%s7871_s28 + $0xc] sm:$0xf] }
 0x4c4   : > { %3779 = vmatpush.bf16.msra.mxu2 %v6044_v9  ;;  %v6168_v9 = vor.u32 %v7130_v62, %v6167_v59  ;;  %v5916_v10 = vor.u32 %v7062_v1, %v5913_v2  ;;  %v6079_v59 = vld [vmem:[%s7871_s28 + $0x150] sm:$0xf] }
 0x4c5   : > { %3796 = vmatpush.bf16.msra.mxu3 %v6204_v0  ;;  %v7107_v62 = vld [vmem:[%s7871_s28 + $0x16c] sm:$0xf0] }
 0x4c6   : > { %v6335_v1 = vld [vmem:[%s7871_s28 + $0x350] sm:$0xf] }
 0x4c7   : > { %3752 = vmatpush.bf16.msra.mxu0 %v6008_v20  ;;  %v2877_v20 = vperm.slane %v2816_v15, 1  ;;  %v7171_v2 = vld [vmem:[%s7871_s28 + $0x36c] sm:$0xf0] }
 0x4c8   : > { %3780 = vmatpush.bf16.msra.mxu2 %v6012_v26 }
 0x4c9   : > { %3797 = vmatpush.bf16.msra.mxu3 %v6172_v11  ;;  %v6340_v11 = vor.u32 %v7167_v4, %v6337_v5  ;;  %v7063_v5 = vld [vmem:[%s7871_s28 + $0x14] sm:$0xf] }
 0x4cb   : > { %3753 = vmatpush.bf16.msra.mxu0 %v5976_v60 }
 0x4cc   : > { %3781 = vmatpush.bf16.msra.mxu2 %v5980_v44 }
 0x4cf   : > { %3754 = vmatpush.bf16.msra.mxu0 %v5944_v53  ;;  %v6113_v53 = vld [vmem:[%s7871_s28 + $0x1b0] sm:$0xf0] }
 0x4d3   : > { %3755 = vmatpush.bf16.msra.mxu0 %v5912_v58  ;;  %v6081_v58 = vld [vmem:[%s7871_s28 + $0x170] sm:$0xf0] }
 0x51a   : > { %v2843_v50 = vpop.xlane.xlu1 %2842 }
 0x51b   : > { %v2847_v54 = vmul.f32 %v2843_v50, %v8595_v57  ;;  %v5945_v50 = vld [vmem:[%s7871_s28 + $0x68] sm:$0xf0] }
 0x51c   : > { %v5948_v56 = vor.u32 %v7070_v22, %v5945_v50  ;;  %v6404_v50 = vor.u32 %v7183_v40, %v6401_v17  ;;  %v7147_v40 = vld [vmem:[%s7871_s28 + $0x2ac] sm:$0xf0]  ;;  %v7079_v17 = vld [vmem:[%s7871_s28 + $0x94] sm:$0xf] }
 0x51d   : > { %v8673_v18 = vadd.f32 1e-05, %v2847_v54  ;;  %v6200_v54 = vor.u32 %v7138_v47, %v6199_v43  ;;  %v6144_v43 = vor.u32 %v7123_v32, %v6143_v45  ;;  %v5983_v32 = vld [vmem:[%s7871_s28 + $0x90] sm:$0xf] }
 0x51e   : > { %3782 = vmatpush.bf16.msra.mxu2 %v5948_v56  ;;  %v6368_v56 = vor.u32 %v7179_v24, %v6367_v51  ;;  %v7075_v51 = vld [vmem:[%s7871_s28 + $0x6c] sm:$0xf0] }
 0x51f   : > { %7434 = vrsqrt.f32 %v8673_v18  ;;  %3768 = vmatpush.bf16.msra.mxu1 %v6200_v54  ;;  %vm2857_vm6 = vweird.f32 %v8673_v18  ;;  %v7175_v54 = vld [vmem:[%s7871_s28 + $0x394] sm:$0xf] }
 0x520   : > { %v6372_v0 = vor.u32 %v7175_v54, %v6369_v55  ;;  %v7139_v54 = vld [vmem:[%s7871_s28 + $0x26c] sm:$0xf0]  ;;  %v7071_v55 = vld [vmem:[%s7871_s28 + $0x54] sm:$0xf] }
 0x522   : > { %v2846_v19 = vpop.xlane.xlu2 %2845  ;;  %3783 = vmatpush.bf16.msra.mxu2 %v5916_v10  ;;  %v7099_v10 = vld [vmem:[%s7871_s28 + $0x12c] sm:$0xf0] }
 0x523   : > { %v2848_v23 = vmul.f32 %v2846_v19, %v8595_v57  ;;  %3769 = vmatpush.bf16.msra.mxu1 %v6168_v9  ;;  %v2876_v19 = vperm.slane %v2816_v15, 0  ;;  %v6047_v9 = vld [vmem:[%s7871_s28 + $0x110] sm:$0xf] }
 0x524   : > { %v6303_v15 = vld [vmem:[%s7871_s28 + $0x310] sm:$0xf] }
 0x525   : > { %v7435_v33 = vpop.eup %7434  ;;  %v8699_v34 = vadd.f32 1e-05, %v2848_v23 }
 0x526   : > { %v2852_v37 = vmul.f32 %v7435_v33, %v8673_v18  ;;  %vm2858_vm2 = vweird.f32 %v7435_v33  ;;  %v2817_v18 = vld [vmem:[%s786_s7] sm:$0x3] }
 0x527   : > { %7436 = vrsqrt.f32 %v8699_v34  ;;  %vm2859_vm7 = vmor %vm2857_vm6, %vm2858_vm2  ;;  %vm2867_vm9 = vweird.f32 %v8699_v34  ;;  %v2885_v12 = vperm.slane %v2817_v18, 0  ;;  %v2886_v23 = vperm.slane %v2817_v18, 1  ;;  %v7159_v18 = vld [vmem:[%s7871_s28 + $0x314] sm:$0xf] }
 0x528   : > { %v2853_v46 = vmul.f32 %v7435_v33, %v2852_v37 }
 0x52a   : > { %v2854_v52 = vmul.f32 0.5, %v2853_v46  ;;  %v6111_v46 = vld [vmem:[%s7871_s28 + $0x190] sm:$0xf] }
 0x52b   : > { %v6112_v28 = vor.u32 %v7115_v49, %v6111_v46  ;;  %v6241_v46 = vld [vmem:[%s7871_s28 + $0x2b0] sm:$0xf0] }
 0x52c   : > { %v2855_v63 = vsub.f32 1.5, %v2854_v52  ;;  %v7111_v52 = vld [vmem:[%s7871_s28 + $0x194] sm:$0xf] }
 0x52d   : > { %v7437_v3 = vpop.eup %7436 }
 0x52e   : > { %v2856_v7 = vmul.f32 %v7435_v33, %v2855_v63  ;;  %v2862_v8 = vmul.f32 %v7437_v3, %v8699_v34  ;;  %vm2868_vm8 = vweird.f32 %v7437_v3  ;;  %v7187_v34 = vld [vmem:[%s7871_s28 + $0x3ec] sm:$0xf0]  ;;  %v6116_v63 = vor.u32 %v7111_v52, %v6113_v53 }
 0x52f   : > { %vm2869_vm10 = vmor %vm2867_vm9, %vm2868_vm8  ;;  %v6207_v53 = vld [vmem:[%s7871_s28 + $0x250] sm:$0xf] }
 0x530   : > { %v2863_v13 = vmul.f32 %v7437_v3, %v2862_v8  ;;  %v2860_v14 = vsel %vm2859_vm7, %v7435_v33, %v2856_v7  ;;  %v6399_v33 = vld [vmem:[%s7871_s28 + $0x3d0] sm:$0xf]  ;;  %v6080_v7 = vor.u32 %v7107_v62, %v6079_v59  ;;  %v6336_v8 = vor.u32 %v7171_v2, %v6335_v1  ;;  %v6209_v59 = vld [vmem:[%s7871_s28 + $0x270] sm:$0xf0] }
 0x531   : > { %v2871_v16 = vmul.f32 %v2860_v14, %v8604_v31  ;;  %v2872_v21 = vmul.f32 %v2860_v14, %v8607_v25  ;;  %v6400_v47 = vor.u32 %v7187_v34, %v6399_v33  ;;  %v7163_v14 = vld [vmem:[%s7871_s28 + $0x32c] sm:$0xf0] }
 0x532   : > { %v2864_v6 = vmul.f32 0.5, %v2863_v13  ;;  %v7083_v33 = vld [vmem:[%s7871_s28 + $0xac] sm:$0xf0] }
 0x533   : > { %v2880_v30 = vmul.f32 %v2876_v19, %v2871_v16  ;;  %v2881_v29 = vmul.f32 %v2877_v20, %v2872_v21  ;;  %v6304_v16 = vor.u32 %v7163_v14, %v6303_v15  ;;  %v6015_v21 = vld [vmem:[%s7871_s28 + $0xd0] sm:$0xf]  ;;  %v5984_v49 = vor.u32 %v7083_v33, %v5983_v32  ;;  %v7188_v15 = vld [vmem:[%s7871_s28 + $0x3f4] sm:$0xf0]  ;;  %v7120_v14 = vld [vmem:[%s7871_s28 + $0x1dc] sm:$0xf] }
 0x534   : > { %v2865_v42 = vsub.f32 1.5, %v2864_v6  ;;  %v7095_v6 = vld [vmem:[%s7871_s28 + $0x114] sm:$0xf]  ;;  %v5919_v62 = vld [vmem:[%s7871_s28 + $0x10] sm:$0xf] }
 0x535   : > { %v8743_v36 = vadd.f32 %v2885_v12, %v2880_v30  ;;  %v8745_v37 = vadd.f32 %v2886_v23, %v2881_v29  ;;  %v7155_v30 = vld [vmem:[%s7871_s28 + $0x2ec] sm:$0xf0]  ;;  %v7087_v29 = vld [vmem:[%s7871_s28 + $0xd4] sm:$0xf]  ;;  %v6377_v32 = vld [vmem:[%s7871_s28 + $0x3b8] sm:$0xf0] }
 0x536   : > { %v2866_v39 = vmul.f32 %v7437_v3, %v2865_v42  ;;  %v6049_v42 = vld [vmem:[%s7871_s28 + $0x130] sm:$0xf0]  ;;  %v7067_v1 = vld [vmem:[%s7871_s28 + $0x2c] sm:$0xf0] }
 0x537   : > { %v6175_v2 = vld [vmem:[%s7871_s28 + $0x210] sm:$0xf] }
 0x538   : > { %v2870_v26 = vsel %vm2869_vm10, %v7437_v3, %v2866_v39  ;;  %v7103_v3 = vld [vmem:[%s7871_s28 + $0x154] sm:$0xf]  ;;  %v7091_v39 = vld [vmem:[%s7871_s28 + $0xec] sm:$0xf0] }
 0x539   : > { %v2873_v61 = vmul.f32 %v2870_v26, %v8615_v27  ;;  %v2874_v31 = vmul.f32 %v2870_v26, %v8618_v41  ;;  %v6145_v41 = vld [vmem:[%s7871_s28 + $0x1f0] sm:$0xf0]  ;;  %v6084_v13 = vor.u32 %v7103_v3, %v6081_v58  ;;  %v6271_v26 = vld [vmem:[%s7871_s28 + $0x2d0] sm:$0xf] }
 0x53a   : > { %v6148_v22 = vor.u32 %v7119_v35, %v6145_v41  ;;  %v6272_v45 = vor.u32 %v7155_v30, %v6271_v26  ;;  %v6239_v41 = vld [vmem:[%s7871_s28 + $0x290] sm:$0xf]  ;;  %v7116_v26 = vld [vmem:[%s7871_s28 + $0x1b4] sm:$0xf0] }
 0x53b   : > { %v2882_v38 = vmul.f32 %v2876_v19, %v2873_v61  ;;  %v2883_v25 = vmul.f32 %v2877_v20, %v2874_v31  ;;  %v6305_v19 = vld [vmem:[%s7871_s28 + $0x330] sm:$0xf0]  ;;  %v6048_v20 = vor.u32 %v7099_v10, %v6047_v9  ;;  %v7131_v3 = vld [vmem:[%s7871_s28 + $0x22c] sm:$0xf0]  ;;  %v6151_v10 = vld [vmem:[%s7871_s28 + $0x1d8] sm:$0xf] }
 0x53c   : > { %v6017_v61 = vld [vmem:[%s7871_s28 + $0xf0] sm:$0xf0] }
 0x53d   : > { %v8747_v60 = vadd.f32 %v2885_v12, %v2882_v38  ;;  %v8749_v27 = vadd.f32 %v2886_v23, %v2883_v25  ;;  %v6052_v12 = vor.u32 %v7095_v6, %v6049_v42  ;;  %v6308_v23 = vor.u32 %v7159_v18, %v6305_v19  ;;  %v7151_v31 = vld [vmem:[%s7871_s28 + $0x2d4] sm:$0xf]  ;;  %v6153_v18 = vld [vmem:[%s7871_s28 + $0x1f8] sm:$0xf0] }
 0x53e   : > { %v6273_v38 = vld [vmem:[%s7871_s28 + $0x2f0] sm:$0xf0]  ;;  %v6016_v25 = vor.u32 %v7091_v39, %v6015_v21  ;;  %v6020_v34 = vor.u32 %v7087_v29, %v6017_v61  ;;  %v5920_v6 = vor.u32 %v7067_v1, %v5919_v62  ;;  %v6176_v42 = vor.u32 %v7131_v3, %v6175_v2  ;;  %v7184_v19 = vld [vmem:[%s7871_s28 + $0x3dc] sm:$0xf]  ;;  %v6375_v61 = vld [vmem:[%s7871_s28 + $0x398] sm:$0xf] }
 0x53f   : > { %v8756_v44 = vpack.c.bf16 %v8747_v60, %v8743_v36  ;;  %v8760_v48 = vpack.c.bf16 %v8749_v27, %v8745_v37  ;;  %v6276_v35 = vor.u32 %v7151_v31, %v6273_v38  ;;  %v6177_v9 = vld [vmem:[%s7871_s28 + $0x230] sm:$0xf0]  ;;  %v6156_v30 = vor.u32 %v7120_v14, %v6153_v18  ;;  %v7180_v31 = vld [vmem:[%s7871_s28 + $0x3b4] sm:$0xf0]  ;;  %v7112_v38 = vld [vmem:[%s7871_s28 + $0x19c] sm:$0xf] }
 0x540   : > { %v6057_v62 = vld [vmem:[%s7871_s28 + $0x138] sm:$0xf0]  ;;  %v6023_v3 = vld [vmem:[%s7871_s28 + $0xd8] sm:$0xf] }
 0x541   : > { %3700 = vmatmul.bf16.vlgmr.msrb.gmra.mxu0 %v8756_v44  ;;  %3714 = vmatmul.bf16.vlgmr.msrb.gmra.mxu1 %v8760_v48 }
 0x542   : > { %3728 = vmatmul.bf16.vlgmr.msrb.gmra.mxu2 %v8756_v44  ;;  %3742 = vmatmul.bf16.vlgmr.msrb.gmra.mxu3 %v8760_v48 }
 0x543   : > { %3804 = vmatpush.bf16.msrb.mxu0 %v6144_v43  ;;  %3818 = vmatpush.bf16.msrb.mxu1 %v6400_v47  ;;  %v5985_v43 = vld [vmem:[%s7871_s28 + $0xb0] sm:$0xf0] }
 0x544   : > { %3832 = vmatpush.bf16.msrb.mxu2 %v6148_v22  ;;  %3846 = vmatpush.bf16.msrb.mxu3 %v6404_v50  ;;  %v7143_v47 = vld [vmem:[%s7871_s28 + $0x294] sm:$0xf]  ;;  %v6240_v22 = vor.u32 %v7147_v40, %v6239_v41  ;;  %v5951_v50 = vld [vmem:[%s7871_s28 + $0x50] sm:$0xf]  ;;  %v5988_v24 = vor.u32 %v7079_v17, %v5985_v43  ;;  %v7108_v41 = vld [vmem:[%s7871_s28 + $0x174] sm:$0xf0] }
 0x545   : > { %v6244_v52 = vor.u32 %v7143_v47, %v6241_v46  ;;  %v6343_v43 = vld [vmem:[%s7871_s28 + $0x358] sm:$0xf]  ;;  %v7104_v46 = vld [vmem:[%s7871_s28 + $0x15c] sm:$0xf] }
 0x546   : > { %v7172_v47 = vld [vmem:[%s7871_s28 + $0x374] sm:$0xf0] }
 0x547   : > { %3805 = vmatpush.bf16.msrb.mxu0 %v6112_v28  ;;  %3819 = vmatpush.bf16.msrb.mxu1 %v6368_v56  ;;  %v5953_v28 = vld [vmem:[%s7871_s28 + $0x70] sm:$0xf0] }
 0x548   : > { %3833 = vmatpush.bf16.msrb.mxu2 %v6116_v63  ;;  %3847 = vmatpush.bf16.msrb.mxu3 %v6372_v0  ;;  %v7135_v56 = vld [vmem:[%s7871_s28 + $0x254] sm:$0xf]  ;;  %v5952_v63 = vor.u32 %v7075_v51, %v5951_v50  ;;  %v6208_v0 = vor.u32 %v7139_v54, %v6207_v53  ;;  %v5956_v58 = vor.u32 %v7071_v55, %v5953_v28  ;;  %v6345_v50 = vld [vmem:[%s7871_s28 + $0x378] sm:$0xf0]  ;;  %v7100_v53 = vld [vmem:[%s7871_s28 + $0x134] sm:$0xf0] }
 0x549   : > { %v6212_v4 = vor.u32 %v7135_v56, %v6209_v59  ;;  %v6311_v28 = vld [vmem:[%s7871_s28 + $0x318] sm:$0xf]  ;;  %v7096_v59 = vld [vmem:[%s7871_s28 + $0x11c] sm:$0xf] }
 0x54a   : > { %v7164_v56 = vld [vmem:[%s7871_s28 + $0x334] sm:$0xf0] }
 0x54b   : > { %3806 = vmatpush.bf16.msrb.mxu0 %v6080_v7  ;;  %3820 = vmatpush.bf16.msrb.mxu1 %v6336_v8  ;;  %v5921_v7 = vld [vmem:[%s7871_s28 + $0x30] sm:$0xf0]  ;;  %v6312_v2 = vor.u32 %v7164_v56, %v6311_v28  ;;  %v7220_v28 = vld [vmem:[%s7873_s18 + $0xf4] sm:$0xf0] }
 0x54c   : > { %3834 = vmatpush.bf16.msrb.mxu2 %v6084_v13  ;;  %3848 = vmatpush.bf16.msrb.mxu3 %v6340_v11  ;;  %v7127_v8 = vld [vmem:[%s7871_s28 + $0x214] sm:$0xf]  ;;  %v7124_v13 = vld [vmem:[%s7871_s28 + $0x1f4] sm:$0xf0] }
 0x54d   : > { %v6407_v11 = vld [vmem:[%s7871_s28 + $0x3d8] sm:$0xf]  ;;  %v6180_v21 = vor.u32 %v7127_v8, %v6177_v9  ;;  %v6152_v39 = vor.u32 %v7124_v13, %v6151_v10  ;;  %v7088_v9 = vld [vmem:[%s7871_s28 + $0xdc] sm:$0xf] }
 0x54e   : > { %v7156_v8 = vld [vmem:[%s7871_s28 + $0x2f4] sm:$0xf0]  ;;  %v6025_v10 = vld [vmem:[%s7871_s28 + $0xf8] sm:$0xf0] }
 0x54f   : > { %3807 = vmatpush.bf16.msrb.mxu0 %v6048_v20  ;;  %3821 = vmatpush.bf16.msrb.mxu1 %v6304_v16  ;;  %v6409_v20 = vld [vmem:[%s7871_s28 + $0x3f8] sm:$0xf0]  ;;  %v5924_v16 = vor.u32 %v7063_v5, %v5921_v7  ;;  %v6279_v7 = vld [vmem:[%s7871_s28 + $0x2d8] sm:$0xf]  ;;  %v6028_v18 = vor.u32 %v7088_v9, %v6025_v10 }
 0x550   : > { %3835 = vmatpush.bf16.msrb.mxu2 %v6052_v12  ;;  %3849 = vmatpush.bf16.msrb.mxu3 %v6308_v23  ;;  %v6408_v12 = vor.u32 %v7188_v15, %v6407_v11  ;;  %v6119_v23 = vld [vmem:[%s7871_s28 + $0x198] sm:$0xf]  ;;  %v6412_v29 = vor.u32 %v7184_v19, %v6409_v20  ;;  %v7152_v13 = vld [vmem:[%s7871_s28 + $0x2dc] sm:$0xf]  ;;  %v6280_v14 = vor.u32 %v7156_v8, %v6279_v7  ;;  %v7218_v7 = vld [vmem:[%s7873_s18 + $0xe4] sm:$0xf0] }
 0x551   : > { %3756 = vmatmul.bf16.vlgmr.msra.gmra.mxu0 %v8756_v44  ;;  %3770 = vmatmul.bf16.vlgmr.msra.gmra.mxu1 %v8760_v48  ;;  %v6120_v33 = vor.u32 %v7116_v26, %v6119_v23  ;;  %v6281_v11 = vld [vmem:[%s7871_s28 + $0x2f8] sm:$0xf0]  ;;  %v6247_v20 = vld [vmem:[%s7871_s28 + $0x298] sm:$0xf]  ;;  %v6455_v8 = vld [vmem:[%s7873_s18 + $0x50] sm:$0xf] }
 0x552   : > { %3784 = vmatmul.bf16.vlgmr.msra.gmra.mxu2 %v8756_v44  ;;  %3798 = vmatmul.bf16.vlgmr.msra.gmra.mxu3 %v8760_v48  ;;  %v6284_v19 = vor.u32 %v7152_v13, %v6281_v11  ;;  %v6249_v23 = vld [vmem:[%s7871_s28 + $0x2b8] sm:$0xf0]  ;;  %v7200_v13 = vld [vmem:[%s7873_s18 + $0x54] sm:$0xf0] }
 0x553   : > { %3808 = vmatpush.bf16.msrb.mxu0 %v6016_v25  ;;  %3822 = vmatpush.bf16.msrb.mxu1 %v6272_v45  ;;  %v6121_v25 = vld [vmem:[%s7871_s28 + $0x1b8] sm:$0xf0] }
 0x554   : > { %3836 = vmatpush.bf16.msrb.mxu2 %v6020_v34  ;;  %3850 = vmatpush.bf16.msrb.mxu3 %v6276_v35  ;;  %v7176_v45 = vld [vmem:[%s7871_s28 + $0x39c] sm:$0xf]  ;;  %v6376_v34 = vor.u32 %v7180_v31, %v6375_v61  ;;  %v6087_v35 = vld [vmem:[%s7871_s28 + $0x158] sm:$0xf]  ;;  %v6124_v40 = vor.u32 %v7112_v38, %v6121_v25 }
 0x555   : > { %v6380_v17 = vor.u32 %v7176_v45, %v6377_v32  ;;  %v6088_v51 = vor.u32 %v7108_v41, %v6087_v35  ;;  %v7076_v61 = vld [vmem:[%s7871_s28 + $0x74] sm:$0xf0]  ;;  %v7072_v32 = vld [vmem:[%s7871_s28 + $0x5c] sm:$0xf] }
 0x556   : > { %v6215_v25 = vld [vmem:[%s7871_s28 + $0x258] sm:$0xf]  ;;  %v6217_v35 = vld [vmem:[%s7871_s28 + $0x278] sm:$0xf0] }
 0x557   : > { %3809 = vmatpush.bf16.msrb.mxu0 %v5984_v49  ;;  %3823 = vmatpush.bf16.msrb.mxu1 %v6240_v22  ;;  %v6089_v49 = vld [vmem:[%s7871_s28 + $0x178] sm:$0xf0]  ;;  %v7140_v45 = vld [vmem:[%s7871_s28 + $0x274] sm:$0xf0] }
 0x558   : > { %3837 = vmatpush.bf16.msrb.mxu2 %v5988_v24  ;;  %3851 = vmatpush.bf16.msrb.mxu3 %v6244_v52  ;;  %v7168_v22 = vld [vmem:[%s7871_s28 + $0x35c] sm:$0xf]  ;;  %v6344_v24 = vor.u32 %v7172_v47, %v6343_v43  ;;  %v6055_v52 = vld [vmem:[%s7871_s28 + $0x118] sm:$0xf]  ;;  %v6092_v54 = vor.u32 %v7104_v46, %v6089_v49 }
 0x559   : > { %v6348_v55 = vor.u32 %v7168_v22, %v6345_v50  ;;  %v6056_v1 = vor.u32 %v7100_v53, %v6055_v52  ;;  %v7068_v43 = vld [vmem:[%s7871_s28 + $0x34] sm:$0xf0]  ;;  %v7064_v50 = vld [vmem:[%s7871_s28 + $0x1c] sm:$0xf]  ;;  %v6471_v53 = vld [vmem:[%s7873_s18 + $0x70] sm:$0xf] }
 0x55a   : > { %v6183_v47 = vld [vmem:[%s7871_s28 + $0x218] sm:$0xf]  ;;  %v6185_v52 = vld [vmem:[%s7871_s28 + $0x238] sm:$0xf0] }
 0x55b   : > { %3810 = vmatpush.bf16.msrb.mxu0 %v5952_v63  ;;  %3824 = vmatpush.bf16.msrb.mxu1 %v6208_v0  ;;  %v7160_v63 = vld [vmem:[%s7871_s28 + $0x31c] sm:$0xf]  ;;  %v7132_v22 = vld [vmem:[%s7871_s28 + $0x234] sm:$0xf0] }
 0x55c   : > { %3838 = vmatpush.bf16.msrb.mxu2 %v5956_v58  ;;  %3852 = vmatpush.bf16.msrb.mxu3 %v6212_v4  ;;  %v6313_v0 = vld [vmem:[%s7871_s28 + $0x338] sm:$0xf0]  ;;  %v7092_v58 = vld [vmem:[%s7871_s28 + $0xf4] sm:$0xf0]  ;;  %v6060_v4 = vor.u32 %v7096_v59, %v6057_v62  ;;  %v6184_v59 = vor.u32 %v7132_v22, %v6183_v47  ;;  %v6423_v47 = vld [vmem:[%s7873_s18 + $0x10] sm:$0xf] }
 0x55d   : > { %v6316_v5 = vor.u32 %v7160_v63, %v6313_v0  ;;  %v6024_v15 = vor.u32 %v7092_v58, %v6023_v3  ;;  %v6599_v3 = vld [vmem:[%s7873_s18 + $0x170] sm:$0xf]  ;;  %v7236_v58 = vld [vmem:[%s7873_s18 + $0x174] sm:$0xf0] }
 0x55e   : > { %v6600_v9 = vor.u32 %v7236_v58, %v6599_v3  ;;  %v6487_v22 = vld [vmem:[%s7873_s18 + $0x90] sm:$0xf]  ;;  %v6719_v3 = vld [vmem:[%s7873_s18 + $0x260] sm:$0xf]  ;;  %v7266_v58 = vld [vmem:[%s7873_s18 + $0x264] sm:$0xf0] }
 0x55f   : > { %3811 = vmatpush.bf16.msrb.mxu0 %v5920_v6  ;;  %3825 = vmatpush.bf16.msrb.mxu1 %v6176_v42  ;;  %v5991_v6 = vld [vmem:[%s7871_s28 + $0x98] sm:$0xf] }
 0x560   : > { %3839 = vmatpush.bf16.msrb.mxu2 %v5924_v16  ;;  %3853 = vmatpush.bf16.msrb.mxu3 %v6180_v21  ;;  %v7084_v42 = vld [vmem:[%s7871_s28 + $0xb4] sm:$0xf0]  ;;  %v7080_v21 = vld [vmem:[%s7871_s28 + $0x9c] sm:$0xf] }
 0x561   : > { %v7148_v16 = vld [vmem:[%s7871_s28 + $0x2b4] sm:$0xf0]  ;;  %v5992_v26 = vor.u32 %v7084_v42, %v5991_v6  ;;  %v6519_v6 = vld [vmem:[%s7873_s18 + $0xd0] sm:$0xf] }
 0x562   : > { %3812 = vmatmul.bf16.vlgmr.msrb.gmra.mxu0 %v8756_v44  ;;  %3826 = vmatmul.bf16.vlgmr.msrb.gmra.mxu1 %v8760_v48  ;;  %v7216_v42 = vld [vmem:[%s7873_s18 + $0xd4] sm:$0xf0] }
 0x563   : > { %3860 = vmatpush.bf16.msra.mxu0 %v6152_v39  ;;  %3874 = vmatpush.bf16.msra.mxu1 %v6408_v12  ;;  %v5993_v39 = vld [vmem:[%s7871_s28 + $0xb8] sm:$0xf0] }
 0x564   : > { %3888 = vmatpush.bf16.msra.mxu2 %v6156_v30  ;;  %3902 = vmatpush.bf16.msra.mxu3 %v6412_v29  ;;  %v7144_v12 = vld [vmem:[%s7871_s28 + $0x29c] sm:$0xf]  ;;  %v6248_v30 = vor.u32 %v7148_v16, %v6247_v20  ;;  %v5959_v29 = vld [vmem:[%s7871_s28 + $0x58] sm:$0xf]  ;;  %v5996_v31 = vor.u32 %v7080_v21, %v5993_v39  ;;  %v6456_v21 = vor.u32 %v7200_v13, %v6455_v8  ;;  %v6447_v39 = vld [vmem:[%s7873_s18 + $0x40] sm:$0xf] }
 0x565   : > { %3840 = vmatmul.bf16.vlgmr.msrb.gmra.mxu2 %v8756_v44  ;;  %3854 = vmatmul.bf16.vlgmr.msrb.gmra.mxu3 %v8760_v48  ;;  %v6252_v38 = vor.u32 %v7144_v12, %v6249_v23  ;;  %v5960_v41 = vor.u32 %v7076_v61, %v5959_v29  ;;  %v6520_v12 = vor.u32 %v7216_v42, %v6519_v6  ;;  %v6583_v23 = vld [vmem:[%s7873_s18 + $0x150] sm:$0xf]  ;;  %v6511_v29 = vld [vmem:[%s7873_s18 + $0xc0] sm:$0xf]  ;;  %v7230_v42 = vld [vmem:[%s7873_s18 + $0x144] sm:$0xf0] }
 0x566   : > { %v6655_v8 = vld [vmem:[%s7873_s18 + $0x1e0] sm:$0xf] }
 0x567   : > { %3861 = vmatpush.bf16.msra.mxu0 %v6120_v33  ;;  %3875 = vmatpush.bf16.msra.mxu1 %v6376_v34  ;;  %v5961_v33 = vld [vmem:[%s7871_s28 + $0x78] sm:$0xf0]  ;;  %v6783_v13 = vld [vmem:[%s7873_s18 + $0x2e0] sm:$0xf] }
 0x568   : > { %3889 = vmatpush.bf16.msra.mxu2 %v6124_v40  ;;  %3903 = vmatpush.bf16.msra.mxu3 %v6380_v17  ;;  %v7136_v34 = vld [vmem:[%s7871_s28 + $0x25c] sm:$0xf]  ;;  %v6216_v40 = vor.u32 %v7140_v45, %v6215_v25  ;;  %v5927_v17 = vld [vmem:[%s7871_s28 + $0x18] sm:$0xf]  ;;  %v5964_v46 = vor.u32 %v7072_v32, %v5961_v33  ;;  %v6503_v45 = vld [vmem:[%s7873_s18 + $0xb0] sm:$0xf] }
 0x569   : > { %v6220_v49 = vor.u32 %v7136_v34, %v6217_v35  ;;  %v5928_v56 = vor.u32 %v7068_v43, %v5927_v17  ;;  %v7196_v25 = vld [vmem:[%s7873_s18 + $0x34] sm:$0xf0]  ;;  %v6431_v34 = vld [vmem:[%s7873_s18 + $0x20] sm:$0xf]  ;;  %v7210_v17 = vld [vmem:[%s7873_s18 + $0xa4] sm:$0xf0] }
 0x56a   : > { %v7212_v32 = vld [vmem:[%s7873_s18 + $0xb4] sm:$0xf0]  ;;  %v6575_v6 = vld [vmem:[%s7873_s18 + $0x140] sm:$0xf] }
 0x56b   : > { %3862 = vmatpush.bf16.msra.mxu0 %v6088_v51  ;;  %3876 = vmatpush.bf16.msra.mxu1 %v6344_v24  ;;  %v5929_v51 = vld [vmem:[%s7871_s28 + $0x38] sm:$0xf0]  ;;  %v6504_v35 = vor.u32 %v7212_v32, %v6503_v45  ;;  %v7246_v45 = vld [vmem:[%s7873_s18 + $0x1c4] sm:$0xf0]  ;;  %v6767_v32 = vld [vmem:[%s7873_s18 + $0x2c0] sm:$0xf] }
 0x56c   : > { %3890 = vmatpush.bf16.msra.mxu2 %v6092_v54  ;;  %3904 = vmatpush.bf16.msra.mxu3 %v6348_v55  ;;  %v7128_v24 = vld [vmem:[%s7871_s28 + $0x21c] sm:$0xf]  ;;  %v7204_v54 = vld [vmem:[%s7873_s18 + $0x74] sm:$0xf0]  ;;  %v6535_v55 = vld [vmem:[%s7873_s18 + $0xf0] sm:$0xf]  ;;  %v5932_v62 = vor.u32 %v7064_v50, %v5929_v51 }
 0x56d   : > { %v6188_v63 = vor.u32 %v7128_v24, %v6185_v52  ;;  %v6472_v0 = vor.u32 %v7204_v54, %v6471_v53  ;;  %v7208_v50 = vld [vmem:[%s7873_s18 + $0x94] sm:$0xf0]  ;;  %v6415_v24 = vld [vmem:[%s7873_s18] sm:$0xf]  ;;  %v7190_v52 = vld [vmem:[%s7873_s18 + $0x4] sm:$0xf0] }
 0x56e   : > { %v6488_v53 = vor.u32 %v7208_v50, %v6487_v22  ;;  %v6727_v54 = vld [vmem:[%s7873_s18 + $0x270] sm:$0xf] }
 0x56f   : > { %3863 = vmatpush.bf16.msra.mxu0 %v6056_v1  ;;  %3877 = vmatpush.bf16.msra.mxu1 %v6312_v2  ;;  %v6463_v1 = vld [vmem:[%s7873_s18 + $0x60] sm:$0xf]  ;;  %v6536_v2 = vor.u32 %v7220_v28, %v6535_v55  ;;  %v7206_v28 = vld [vmem:[%s7873_s18 + $0x84] sm:$0xf0] }
 0x570   : > { %3891 = vmatpush.bf16.msra.mxu2 %v6060_v4  ;;  %3905 = vmatpush.bf16.msra.mxu3 %v6316_v5  ;;  %v7202_v4 = vld [vmem:[%s7873_s18 + $0x64] sm:$0xf0]  ;;  %v6527_v5 = vld [vmem:[%s7873_s18 + $0xe0] sm:$0xf] }
 0x571   : > { %v6464_v10 = vor.u32 %v7202_v4, %v6463_v1  ;;  %v6528_v11 = vor.u32 %v7218_v7, %v6527_v5  ;;  %v6479_v55 = vld [vmem:[%s7873_s18 + $0x80] sm:$0xf]  ;;  %v6720_v4 = vor.u32 %v7266_v58, %v6719_v3  ;;  %v6711_v5 = vld [vmem:[%s7873_s18 + $0x250] sm:$0xf]  ;;  %v7264_v7 = vld [vmem:[%s7873_s18 + $0x254] sm:$0xf0] }
 0x572   : > { %v6751_v3 = vld [vmem:[%s7873_s18 + $0x2a0] sm:$0xf]  ;;  %v7274_v58 = vld [vmem:[%s7873_s18 + $0x2a4] sm:$0xf0] }
 0x573   : > { %3864 = vmatpush.bf16.msra.mxu0 %v6024_v15  ;;  %3878 = vmatpush.bf16.msra.mxu1 %v6280_v14  ;;  %v6591_v15 = vld [vmem:[%s7873_s18 + $0x160] sm:$0xf]  ;;  %v7234_v14 = vld [vmem:[%s7873_s18 + $0x164] sm:$0xf0] }
 0x574   : > { %3892 = vmatpush.bf16.msra.mxu2 %v6028_v18  ;;  %3906 = vmatpush.bf16.msra.mxu3 %v6284_v19  ;;  %v6663_v18 = vld [vmem:[%s7873_s18 + $0x1f0] sm:$0xf]  ;;  %v7252_v19 = vld [vmem:[%s7873_s18 + $0x1f4] sm:$0xf0]  ;;  %v6592_v20 = vor.u32 %v7234_v14, %v6591_v15 }
 0x575   : > { %v6664_v16 = vor.u32 %v7252_v19, %v6663_v18  ;;  %v6703_v18 = vld [vmem:[%s7873_s18 + $0x240] sm:$0xf]  ;;  %v6576_v19 = vor.u32 %v7230_v42, %v6575_v6  ;;  %v6615_v42 = vld [vmem:[%s7873_s18 + $0x190] sm:$0xf] }
 0x577   : > { %3865 = vmatpush.bf16.msra.mxu0 %v5992_v26  ;;  %3879 = vmatpush.bf16.msra.mxu1 %v6248_v30  ;;  %v7232_v26 = vld [vmem:[%s7873_s18 + $0x154] sm:$0xf0]  ;;  %v7198_v30 = vld [vmem:[%s7873_s18 + $0x44] sm:$0xf0] }
 0x578   : > { %3893 = vmatpush.bf16.msra.mxu2 %v5996_v31  ;;  %3907 = vmatpush.bf16.msra.mxu3 %v6252_v38  ;;  %v6448_v61 = vor.u32 %v7198_v30, %v6447_v39  ;;  %v6439_v31 = vld [vmem:[%s7873_s18 + $0x30] sm:$0xf] }
 0x579   : > { %v6440_v33 = vor.u32 %v7196_v25, %v6439_v31  ;;  %v6567_v30 = vld [vmem:[%s7873_s18 + $0x130] sm:$0xf]  ;;  %v7260_v31 = vld [vmem:[%s7873_s18 + $0x234] sm:$0xf0] }
 0x57b   : > { %3866 = vmatpush.bf16.msra.mxu0 %v5960_v41  ;;  %3880 = vmatpush.bf16.msra.mxu1 %v6216_v40  ;;  %v7194_v41 = vld [vmem:[%s7873_s18 + $0x24] sm:$0xf0]  ;;  %v6495_v40 = vld [vmem:[%s7873_s18 + $0xa0] sm:$0xf] }
 0x57c   : > { %3894 = vmatpush.bf16.msra.mxu2 %v5964_v46  ;;  %3908 = vmatpush.bf16.msra.mxu3 %v6220_v49  ;;  %v6432_v43 = vor.u32 %v7194_v41, %v6431_v34  ;;  %v6496_v46 = vor.u32 %v7210_v17, %v6495_v40  ;;  %v7192_v49 = vld [vmem:[%s7873_s18 + $0x14] sm:$0xf0]  ;;  %v6559_v41 = vld [vmem:[%s7873_s18 + $0x120] sm:$0xf]  ;;  %v7226_v40 = vld [vmem:[%s7873_s18 + $0x124] sm:$0xf0] }
 0x57d   : > { %v6424_v51 = vor.u32 %v7192_v49, %v6423_v47  ;;  %v6687_v17 = vld [vmem:[%s7873_s18 + $0x220] sm:$0xf]  ;;  %v7258_v47 = vld [vmem:[%s7873_s18 + $0x224] sm:$0xf0]  ;;  %v7244_v49 = vld [vmem:[%s7873_s18 + $0x1b4] sm:$0xf0] }
 0x57e   : > { %v6688_v22 = vor.u32 %v7258_v47, %v6687_v17  ;;  %v7314_v47 = vld [vmem:[%s7873_s18 + $0x3e4] sm:$0xf0] }
 0x57f   : > { %3867 = vmatpush.bf16.msra.mxu0 %v5928_v56  ;;  %3881 = vmatpush.bf16.msra.mxu1 %v6184_v59  ;;  %v7268_v56 = vld [vmem:[%s7873_s18 + $0x274] sm:$0xf0]  ;;  %v6791_v59 = vld [vmem:[%s7873_s18 + $0x2f0] sm:$0xf] }
 0x580   : > { %3895 = vmatpush.bf16.msra.mxu2 %v5932_v62  ;;  %3909 = vmatpush.bf16.msra.mxu3 %v6188_v63  ;;  %v7284_v62 = vld [vmem:[%s7873_s18 + $0x2f4] sm:$0xf0]  ;;  %v6416_v63 = vor.u32 %v7190_v52, %v6415_v24  ;;  %v6728_v1 = vor.u32 %v7268_v56, %v6727_v54  ;;  %v6759_v24 = vld [vmem:[%s7873_s18 + $0x2b0] sm:$0xf] }
 0x581   : > { %v7276_v52 = vld [vmem:[%s7873_s18 + $0x2b4] sm:$0xf0] }
 0x582   : > { %3868 = vmatmul.bf16.vlgmr.msra.gmra.mxu0 %v8756_v44  ;;  %3882 = vmatmul.bf16.vlgmr.msra.gmra.mxu1 %v8760_v48  ;;  %v6760_v54 = vor.u32 %v7276_v52, %v6759_v24  ;;  %v7294_v24 = vld [vmem:[%s7873_s18 + $0x344] sm:$0xf0] }
 0x583   : > { %4717 = vmatpush.bf16.msrb.mxu0 %v6472_v0  ;;  %4731 = vmatpush.bf16.msrb.mxu1 %v6536_v2  ;;  %v6480_v0 = vor.u32 %v7206_v28, %v6479_v55  ;;  %v6792_v2 = vor.u32 %v7284_v62, %v6791_v59  ;;  %v7224_v55 = vld [vmem:[%s7873_s18 + $0x114] sm:$0xf0]  ;;  %v6679_v28 = vld [vmem:[%s7873_s18 + $0x210] sm:$0xf] }
 0x584   : > { %3896 = vmatmul.bf16.vlgmr.msra.gmra.mxu2 %v8756_v44  ;;  %3910 = vmatmul.bf16.vlgmr.msra.gmra.mxu3 %v8760_v48  ;;  %v7214_v44 = vld [vmem:[%s7873_s18 + $0xc4] sm:$0xf0]  ;;  %v6584_v48 = vor.u32 %v7232_v26, %v6583_v23  ;;  %v6775_v23 = vld [vmem:[%s7873_s18 + $0x2d0] sm:$0xf]  ;;  %v7280_v26 = vld [vmem:[%s7873_s18 + $0x2d4] sm:$0xf0] }
 0x585   : > { %4745 = vmatpush.bf16.msrb.mxu2 %v6600_v9  ;;  %4759 = vmatpush.bf16.msrb.mxu3 %v6664_v16  ;;  %v6512_v38 = vor.u32 %v7214_v44, %v6511_v29  ;;  %v6712_v9 = vor.u32 %v7264_v7, %v6711_v5  ;;  %v6647_v16 = vld [vmem:[%s7873_s18 + $0x1d0] sm:$0xf]  ;;  %v6776_v29 = vor.u32 %v7280_v26, %v6775_v23  ;;  %v7228_v44 = vld [vmem:[%s7873_s18 + $0x134] sm:$0xf0]  ;;  %v6543_v5 = vld [vmem:[%s7873_s18 + $0x100] sm:$0xf] }
 0x586   : > { %v7256_v62 = vld [vmem:[%s7873_s18 + $0x214] sm:$0xf0]  ;;  %v7222_v7 = vld [vmem:[%s7873_s18 + $0x104] sm:$0xf0]  ;;  %v6607_v23 = vld [vmem:[%s7873_s18 + $0x180] sm:$0xf] }
 0x587   : > { %4718 = vmatpush.bf16.msrb.mxu0 %v6464_v10  ;;  %4732 = vmatpush.bf16.msrb.mxu1 %v6528_v11  ;;  %v7250_v10 = vld [vmem:[%s7873_s18 + $0x1e4] sm:$0xf0] }
 0x588   : > { %v7282_v11 = vld [vmem:[%s7873_s18 + $0x2e4] sm:$0xf0]  ;;  %v6656_v15 = vor.u32 %v7250_v10, %v6655_v8  ;;  %v6671_v8 = vld [vmem:[%s7873_s18 + $0x200] sm:$0xf] }
 0x589   : > { %4746 = vmatpush.bf16.msrb.mxu2 %v6592_v20  ;;  %v6784_v14 = vor.u32 %v7282_v11, %v6783_v13  ;;  %v7262_v20 = vld [vmem:[%s7873_s18 + $0x244] sm:$0xf0]  ;;  %v6855_v13 = vld [vmem:[%s7873_s18 + $0x370] sm:$0xf]  ;;  %v7300_v11 = vld [vmem:[%s7873_s18 + $0x374] sm:$0xf0] }
 0x58a   : > { %4760 = vmatpush.bf16.msrb.mxu3 %v6656_v15  ;;  %v6704_v39 = vor.u32 %v7262_v20, %v6703_v18  ;;  %v7254_v10 = vld [vmem:[%s7873_s18 + $0x204] sm:$0xf0]  ;;  %v6856_v6 = vor.u32 %v7300_v11, %v6855_v13  ;;  %v7240_v18 = vld [vmem:[%s7873_s18 + $0x194] sm:$0xf0]  ;;  %v6743_v20 = vld [vmem:[%s7873_s18 + $0x290] sm:$0xf] }
 0x58b   : > { %4719 = vmatpush.bf16.msrb.mxu0 %v6456_v21  ;;  %4733 = vmatpush.bf16.msrb.mxu1 %v6520_v12  ;;  %v7248_v21 = vld [vmem:[%s7873_s18 + $0x1d4] sm:$0xf0]  ;;  %v6895_v11 = vld [vmem:[%s7873_s18 + $0x3c0] sm:$0xf] }
 0x58c   : > { %v6648_v12 = vor.u32 %v7248_v21, %v6647_v16  ;;  %v7272_v16 = vld [vmem:[%s7873_s18 + $0x294] sm:$0xf0] }
 0x58d   : > { %4747 = vmatpush.bf16.msrb.mxu2 %v6584_v48  ;;  %v6568_v48 = vor.u32 %v7228_v44, %v6567_v30  ;;  %v6744_v21 = vor.u32 %v7272_v16, %v6743_v20 }
 0x58e   : > { %4761 = vmatpush.bf16.msrb.mxu3 %v6648_v12  ;;  %v7298_v12 = vld [vmem:[%s7873_s18 + $0x364] sm:$0xf0] }
 0x58f   : > { %4720 = vmatpush.bf16.msrb.mxu0 %v6448_v61  ;;  %4734 = vmatpush.bf16.msrb.mxu1 %v6512_v38  ;;  %v6695_v61 = vld [vmem:[%s7873_s18 + $0x230] sm:$0xf]  ;;  %v6639_v38 = vld [vmem:[%s7873_s18 + $0x1c0] sm:$0xf] }
 0x590   : > { %v6696_v25 = vor.u32 %v7260_v31, %v6695_v61  ;;  %v6640_v34 = vor.u32 %v7246_v45, %v6639_v38  ;;  %v6735_v31 = vld [vmem:[%s7873_s18 + $0x280] sm:$0xf]  ;;  %v7270_v38 = vld [vmem:[%s7873_s18 + $0x284] sm:$0xf0] }
 0x591   : > { %4748 = vmatpush.bf16.msrb.mxu2 %v6576_v19  ;;  %v6616_v19 = vor.u32 %v7240_v18, %v6615_v42  ;;  %v6736_v45 = vor.u32 %v7270_v38, %v6735_v31  ;;  %v7201_v18 = vld [vmem:[%s7873_s18 + $0x64] sm:$0xf]  ;;  %v6537_v31 = vld [vmem:[%s7873_s18 + $0xf8] sm:$0xf0] }
 0x592   : > { %4762 = vmatpush.bf16.msrb.mxu3 %v6640_v34  ;;  %v6839_v34 = vld [vmem:[%s7873_s18 + $0x350] sm:$0xf] }
 0x593   : > { %4721 = vmatpush.bf16.msrb.mxu0 %v6440_v33  ;;  %4735 = vmatpush.bf16.msrb.mxu1 %v6504_v35  ;;  %v7278_v33 = vld [vmem:[%s7873_s18 + $0x2c4] sm:$0xf0] }
 0x594   : > { %v6768_v35 = vor.u32 %v7278_v33, %v6767_v32  ;;  %v7316_v32 = vld [vmem:[%s7873_s18 + $0x3f4] sm:$0xf0] }
 0x595   : > { %4749 = vmatpush.bf16.msrb.mxu2 %v6568_v48  ;;  %v7238_v48 = vld [vmem:[%s7873_s18 + $0x184] sm:$0xf0] }
 0x596   : > { %v6608_v61 = vor.u32 %v7238_v48, %v6607_v23 }
 0x597   : > { %4722 = vmatpush.bf16.msrb.mxu0 %v6432_v43  ;;  %4736 = vmatpush.bf16.msrb.mxu1 %v6496_v46  ;;  %v6560_v43 = vor.u32 %v7226_v40, %v6559_v41  ;;  %v6631_v46 = vld [vmem:[%s7873_s18 + $0x1b0] sm:$0xf] }
 0x598   : > { %v6632_v50 = vor.u32 %v7244_v49, %v6631_v46 }
 0x599   : > { %4750 = vmatpush.bf16.msrb.mxu2 %v6560_v43  ;;  %v6911_v43 = vld [vmem:[%s7873_s18 + $0x3e0] sm:$0xf] }
 0x59a   : > { %4763 = vmatpush.bf16.msrb.mxu3 %v6632_v50  ;;  %v6831_v50 = vld [vmem:[%s7873_s18 + $0x340] sm:$0xf] }
 0x59b   : > { %4723 = vmatpush.bf16.msrb.mxu0 %v6424_v51  ;;  %4737 = vmatpush.bf16.msrb.mxu1 %v6488_v53  ;;  %v8973_v51 = vld [vmem:[%s7908_s19] sm:$0xff]  ;;  %v6551_v53 = vld [vmem:[%s7873_s18 + $0x110] sm:$0xf] }
 0x59c   : > { %v8981_v56 = vunpack.c.l.bf16 %v8973_v51  ;;  %v6552_v59 = vor.u32 %v7224_v55, %v6551_v53  ;;  %v6832_v55 = vor.u32 %v7294_v24, %v6831_v50  ;;  %v6529_v50 = vld [vmem:[%s7873_s18 + $0xe8] sm:$0xf0] }
 0x59e   : > { %4751 = vmatpush.bf16.msrb.mxu2 %v6552_v59  ;;  %v3028_v15 = vperm.slane %v8981_v56, 0  ;;  %v3029_v41 = vperm.slane %v8981_v56, 2 }
 0x59f   : > { %4724 = vmatpush.bf16.msrb.mxu0 %v6416_v63  ;;  %4738 = vmatpush.bf16.msrb.mxu1 %v6480_v0  ;;  %v6623_v63 = vld [vmem:[%s7873_s18 + $0x1a0] sm:$0xf]  ;;  %v7242_v0 = vld [vmem:[%s7873_s18 + $0x1a4] sm:$0xf0] }
 0x5a0   : > { %v3044_v26 = vperm.slane %v3028_v15, 0  ;;  %v3045_v52 = vperm.slane %v3029_v41, 0  ;;  %v7310_v15 = vld [vmem:[%s7873_s18 + $0x3c4] sm:$0xf0] }
 0x5a1   : > { %v6896_v20 = vor.u32 %v7310_v15, %v6895_v11  ;;  %v7235_v11 = vld [vmem:[%s7873_s18 + $0x174] sm:$0xf] }
 0x5a3   : > { %4773 = vmatpush.bf16.msra.mxu0 %v6728_v1  ;;  %4787 = vmatpush.bf16.msra.mxu1 %v6792_v2  ;;  %v6680_v1 = vor.u32 %v7256_v62, %v6679_v28  ;;  %v6624_v2 = vor.u32 %v7242_v0, %v6623_v63  ;;  %v6903_v62 = vld [vmem:[%s7873_s18 + $0x3d0] sm:$0xf]  ;;  %v7312_v63 = vld [vmem:[%s7873_s18 + $0x3d4] sm:$0xf0] }
 0x5a4   : > { %v6904_v0 = vor.u32 %v7312_v63, %v6903_v62  ;;  %v9047_v62 = vunpack.c.h.bf16 %v8973_v51  ;;  %v7215_v63 = vld [vmem:[%s7873_s18 + $0xd4] sm:$0xf] }
 0x5a5   : > { %4764 = vmatpush.bf16.msrb.mxu3 %v6624_v2 }
 0x5a7   : > { %4774 = vmatpush.bf16.msra.mxu0 %v6720_v4  ;;  %4788 = vmatpush.bf16.msra.mxu1 %v6784_v14  ;;  %v6752_v4 = vor.u32 %v7274_v58, %v6751_v3  ;;  %v6672_v14 = vor.u32 %v7254_v10, %v6671_v8  ;;  %v7203_v3 = vld [vmem:[%s7873_s18 + $0x74] sm:$0xf]  ;;  %v6473_v58 = vld [vmem:[%s7873_s18 + $0x78] sm:$0xf0] }
 0x5a8   : > { %v6476_v13 = vor.u32 %v7203_v3, %v6473_v58 }
 0x5a9   : > { %4765 = vmatpush.bf16.msrb.mxu3 %v6616_v19  ;;  %v6465_v19 = vld [vmem:[%s7873_s18 + $0x68] sm:$0xf0] }
 0x5ab   : > { %4775 = vmatpush.bf16.msra.mxu0 %v6712_v9  ;;  %4789 = vmatpush.bf16.msra.mxu1 %v6776_v29  ;;  %v6544_v9 = vor.u32 %v7222_v7, %v6543_v5  ;;  %v3030_v7 = vperm.slane %v8981_v56, 4 }
 0x5ad   : > { %4752 = vmatpush.bf16.msrb.mxu2 %v6544_v9  ;;  %4766 = vmatpush.bf16.msrb.mxu3 %v6608_v61  ;;  %v6468_v61 = vor.u32 %v7201_v18, %v6465_v19  ;;  %v7304_v18 = vld [vmem:[%s7873_s18 + $0x394] sm:$0xf0] }
 0x5af   : > { %4776 = vmatpush.bf16.msra.mxu0 %v6704_v39  ;;  %4790 = vmatpush.bf16.msra.mxu1 %v6768_v35  ;;  %v6847_v39 = vld [vmem:[%s7873_s18 + $0x360] sm:$0xf]  ;;  %v7296_v35 = vld [vmem:[%s7873_s18 + $0x354] sm:$0xf0] }
 0x5b0   : > { %v6848_v44 = vor.u32 %v7298_v12, %v6847_v39  ;;  %v6840_v40 = vor.u32 %v7296_v35, %v6839_v34  ;;  %v3046_v39 = vperm.slane %v3030_v7, 0  ;;  %v6807_v34 = vld [vmem:[%s7873_s18 + $0x310] sm:$0xf]  ;;  %v6799_v7 = vld [vmem:[%s7873_s18 + $0x300] sm:$0xf] }
 0x5b1   : > { %4801 = vmatpush.bf16.msra.mxu2 %v6856_v6 }
 0x5b3   : > { %4777 = vmatpush.bf16.msra.mxu0 %v6696_v25  ;;  %4791 = vmatpush.bf16.msra.mxu1 %v6760_v54  ;;  %v6919_v25 = vld [vmem:[%s7873_s18 + $0x3f0] sm:$0xf] }
 0x5b4   : > { %v6920_v33 = vor.u32 %v7316_v32, %v6919_v25  ;;  %v6887_v25 = vld [vmem:[%s7873_s18 + $0x3b0] sm:$0xf]  ;;  %v7199_v32 = vld [vmem:[%s7873_s18 + $0x54] sm:$0xf] }
 0x5b5   : > { %4802 = vmatpush.bf16.msra.mxu2 %v6848_v44  ;;  %v7290_v44 = vld [vmem:[%s7873_s18 + $0x324] sm:$0xf0] }
 0x5b6   : > { %4815 = vmatpush.bf16.msra.mxu3 %v6920_v33  ;;  %v6457_v33 = vld [vmem:[%s7873_s18 + $0x58] sm:$0xf0] }
 0x5b7   : > { %4778 = vmatpush.bf16.msra.mxu0 %v6688_v22  ;;  %4792 = vmatpush.bf16.msra.mxu1 %v6752_v4  ;;  %v6912_v22 = vor.u32 %v7314_v47, %v6911_v43  ;;  %v7292_v4 = vld [vmem:[%s7873_s18 + $0x334] sm:$0xf0] }
 0x5b9   : > { %4803 = vmatpush.bf16.msra.mxu2 %v6840_v40  ;;  %v7288_v40 = vld [vmem:[%s7873_s18 + $0x314] sm:$0xf0] }
 0x5ba   : > { %4816 = vmatpush.bf16.msra.mxu3 %v6912_v22  ;;  %v6808_v47 = vor.u32 %v7288_v40, %v6807_v34  ;;  %v7217_v22 = vld [vmem:[%s7873_s18 + $0xe4] sm:$0xf] }
 0x5bb   : > { %4779 = vmatpush.bf16.msra.mxu0 %v6680_v1  ;;  %4793 = vmatpush.bf16.msra.mxu1 %v6744_v21  ;;  %v6823_v1 = vld [vmem:[%s7873_s18 + $0x330] sm:$0xf]  ;;  %v6532_v58 = vor.u32 %v7217_v22, %v6529_v50 }
 0x5bc   : > { %v6824_v8 = vor.u32 %v7292_v4, %v6823_v1  ;;  %v7306_v1 = vld [vmem:[%s7873_s18 + $0x3a4] sm:$0xf0]  ;;  %v6521_v4 = vld [vmem:[%s7873_s18 + $0xd8] sm:$0xf0] }
 0x5bd   : > { %4804 = vmatpush.bf16.msra.mxu2 %v6832_v55  ;;  %v6449_v55 = vld [vmem:[%s7873_s18 + $0x48] sm:$0xf0] }
 0x5be   : > { %v3701_v30 = vpop.f32.mrf.mxu0  ;;  %v3715_v29 = vpop.f32.mrf.mxu1  ;;  %4817 = vmatpush.bf16.msra.mxu3 %v6904_v0  ;;  %v6879_v0 = vld [vmem:[%s7873_s18 + $0x3a0] sm:$0xf] }
 0x5bf   : > { %4780 = vmatpush.bf16.msra.mxu0 %v6672_v14  ;;  %v3702_v17 = vadd.f32 %v3701_v30, %v3044_v26  ;;  %4794 = vmatpush.bf16.msra.mxu1 %v6736_v45  ;;  %v7219_v30 = vld [vmem:[%s7873_s18 + $0xf4] sm:$0xf]  ;;  %v7308_v45 = vld [vmem:[%s7873_s18 + $0x3b4] sm:$0xf0] }
 0x5c0   : > { %v6540_v43 = vor.u32 %v7219_v30, %v6537_v31 }
 0x5c1   : > { %v3716_v28 = vadd.f32 %v3715_v29, %v3702_v17  ;;  %4805 = vmatpush.bf16.msra.mxu2 %v6824_v8  ;;  %v6815_v29 = vld [vmem:[%s7873_s18 + $0x320] sm:$0xf]  ;;  %v7286_v8 = vld [vmem:[%s7873_s18 + $0x304] sm:$0xf0] }
 0x5c2   : > { %4818 = vmatpush.bf16.msra.mxu3 %v6896_v20  ;;  %v6816_v38 = vor.u32 %v7290_v44, %v6815_v29  ;;  %v3032_v20 = vperm.slane %v9047_v62, 0  ;;  %v7193_v29 = vld [vmem:[%s7873_s18 + $0x24] sm:$0xf]  ;;  %v6433_v44 = vld [vmem:[%s7873_s18 + $0x28] sm:$0xf0] }
 0x5c3   : > { %v3916_v9 = vmax.f32 %v3716_v28, 0.0  ;;  %v6436_v50 = vor.u32 %v7193_v29, %v6433_v44  ;;  %v6649_v29 = vld [vmem:[%s7873_s18 + $0x1d8] sm:$0xf0] }
 0x5c5   : > { %v3729_v46 = vpop.f32.mrf.mxu2  ;;  %v3743_v49 = vpop.f32.mrf.mxu3  ;;  %4806 = vmatpush.bf16.msra.mxu2 %v6816_v38 }
 0x5c6   : > { %v3703_v53 = vpop.f32.mrf.mxu0  ;;  %v3717_v54 = vpop.f32.mrf.mxu1  ;;  %v3730_v5 = vadd.f32 %v3729_v46, %v3045_v52 }
 0x5c7   : > { %v3704_v59 = vadd.f32 %v3703_v53, %v3044_v26  ;;  %v3031_v26 = vperm.slane %v8981_v56, 6  ;;  %v6888_v56 = vor.u32 %v7308_v45, %v6887_v25  ;;  %v7233_v45 = vld [vmem:[%s7873_s18 + $0x164] sm:$0xf] }
 0x5c8   : > { %v3744_v16 = vadd.f32 %v3743_v49, %v3730_v5  ;;  %v6460_v49 = vor.u32 %v7199_v32, %v6457_v33  ;;  %v6880_v5 = vor.u32 %v7306_v1, %v6879_v0  ;;  %v6593_v32 = vld [vmem:[%s7873_s18 + $0x168] sm:$0xf0]  ;;  %v7302_v33 = vld [vmem:[%s7873_s18 + $0x384] sm:$0xf0]  ;;  %v3033_v1 = vperm.slane %v9047_v62, 2 }
 0x5c9   : > { %v3718_v2 = vadd.f32 %v3717_v54, %v3704_v59  ;;  %4819 = vmatpush.bf16.msra.mxu3 %v6888_v56  ;;  %v3047_v24 = vperm.slane %v3031_v26, 0  ;;  %v7197_v54 = vld [vmem:[%s7873_s18 + $0x44] sm:$0xf]  ;;  %4807 = vmatpush.bf16.msra.mxu2 %v6808_v47  ;;  %v6513_v26 = vld [vmem:[%s7873_s18 + $0xc8] sm:$0xf0] }
 0x5ca   : > { %v3917_v35 = vmax.f32 %v3744_v16, 0.0  ;;  %v6452_v51 = vor.u32 %v7197_v54, %v6449_v55  ;;  %v6665_v54 = vld [vmem:[%s7873_s18 + $0x1f8] sm:$0xf0] }
 0x5cb   : > { %v3924_v10 = vmax.f32 %v3718_v2, 0.0  ;;  %v6425_v55 = vld [vmem:[%s7873_s18 + $0x18] sm:$0xf0] }
 0x5cd   : > { %v9023_v14 = vpack.c.bf16 %v3924_v10, %v3916_v9  ;;  %v3731_v6 = vpop.f32.mrf.mxu2  ;;  %v3745_v42 = vpop.f32.mrf.mxu3  ;;  %v7195_v9 = vld [vmem:[%s7873_s18 + $0x34] sm:$0xf]  ;;  %v6441_v10 = vld [vmem:[%s7873_s18 + $0x38] sm:$0xf0]  ;;  %4820 = vmatpush.bf16.msra.mxu3 %v6880_v5 }
 0x5ce   : > { %v3732_v21 = vadd.f32 %v3731_v6, %v3045_v52  ;;  %v3757_v12 = vpop.f32.mrf.mxu0  ;;  %v3771_v23 = vpop.f32.mrf.mxu1  ;;  %v6601_v6 = vld [vmem:[%s7873_s18 + $0x178] sm:$0xf0]  ;;  %v6444_v30 = vor.u32 %v7195_v9, %v6441_v10  ;;  %v7249_v9 = vld [vmem:[%s7873_s18 + $0x1e4] sm:$0xf]  ;;  %v6657_v10 = vld [vmem:[%s7873_s18 + $0x1e8] sm:$0xf0] }
 0x5cf   : > { %4725 = vmatmul.bf16.vlgmr.msrb.gmra.mxu0 %v9023_v14  ;;  %v3758_v17 = vadd.f32 %v3757_v12, %v3046_v39  ;;  %v6524_v12 = vor.u32 %v7215_v63, %v6521_v4 }
 0x5d0   : > { %v3746_v48 = vadd.f32 %v3745_v42, %v3732_v21  ;;  %4829 = vmatpush.bf16.msrb.mxu0 %v6476_v13  ;;  %v6800_v13 = vor.u32 %v7286_v8, %v6799_v7  ;;  %v6871_v42 = vld [vmem:[%s7873_s18 + $0x390] sm:$0xf]  ;;  %v7189_v8 = vld [vmem:[%s7873_s18 + $0x4] sm:$0xf] }
 0x5d1   : > { %v3772_v2 = vadd.f32 %v3771_v23, %v3758_v17  ;;  %v6872_v16 = vor.u32 %v7304_v18, %v6871_v42  ;;  %v7213_v23 = vld [vmem:[%s7873_s18 + $0xc4] sm:$0xf]  ;;  %v7211_v17 = vld [vmem:[%s7873_s18 + $0xb4] sm:$0xf]  ;;  %v3049_v42 = vperm.slane %v3033_v1, 0 }
 0x5d2   : > { %v3925_v41 = vmax.f32 %v3746_v48, 0.0  ;;  %4808 = vmatpush.bf16.msra.mxu2 %v6800_v13  ;;  %v6604_v48 = vor.u32 %v7235_v11, %v6601_v6  ;;  %v6516_v40 = vor.u32 %v7213_v23, %v6513_v26  ;;  %v6417_v11 = vld [vmem:[%s7873_s18 + $0x8] sm:$0xf0]  ;;  %v6489_v23 = vld [vmem:[%s7873_s18 + $0x98] sm:$0xf0] }
 0x5d3   : > { %v3918_v21 = vmax.f32 %v3772_v2, 0.0  ;;  %4821 = vmatpush.bf16.msra.mxu3 %v6872_v16  ;;  %v6577_v6 = vld [vmem:[%s7873_s18 + $0x148] sm:$0xf0]  ;;  %v7207_v16 = vld [vmem:[%s7873_s18 + $0x94] sm:$0xf] }
 0x5d4   : > { %v9039_v46 = vpack.c.bf16 %v3925_v41, %v3917_v35  ;;  %4830 = vmatpush.bf16.msrb.mxu0 %v6468_v61  ;;  %v6863_v61 = vld [vmem:[%s7873_s18 + $0x380] sm:$0xf]  ;;  %v3048_v41 = vperm.slane %v3032_v20, 0 }
 0x5d5   : > { %v3785_v52 = vpop.f32.mrf.mxu2  ;;  %v3799_v53 = vpop.f32.mrf.mxu3  ;;  %v6864_v35 = vor.u32 %v7302_v33, %v6863_v61  ;;  %v7227_v61 = vld [vmem:[%s7873_s18 + $0x134] sm:$0xf]  ;;  %v6729_v33 = vld [vmem:[%s7873_s18 + $0x278] sm:$0xf0] }
 0x5d6   : > { %4739 = vmatmul.bf16.vlgmr.msrb.gmra.mxu1 %v9039_v46  ;;  %v3759_v28 = vpop.f32.mrf.mxu0  ;;  %v3773_v59 = vpop.f32.mrf.mxu1  ;;  %v3786_v19 = vadd.f32 %v3785_v52, %v3047_v24  ;;  %v6596_v52 = vor.u32 %v7233_v45, %v6593_v32  ;;  %v7267_v32 = vld [vmem:[%s7873_s18 + $0x274] sm:$0xf] }
 0x5d7   : > { %v3760_v3 = vadd.f32 %v3759_v28, %v3046_v39  ;;  %4843 = vmatpush.bf16.msrb.mxu1 %v6540_v43  ;;  %v6505_v43 = vld [vmem:[%s7873_s18 + $0xb8] sm:$0xf0]  ;;  %4822 = vmatpush.bf16.msra.mxu3 %v6864_v35  ;;  %v7231_v28 = vld [vmem:[%s7873_s18 + $0x154] sm:$0xf] }
 0x5d8   : > { %4831 = vmatpush.bf16.msrb.mxu0 %v6460_v49  ;;  %v3800_v56 = vadd.f32 %v3799_v53, %v3786_v19  ;;  %v7251_v53 = vld [vmem:[%s7873_s18 + $0x1f4] sm:$0xf]  ;;  %v6508_v2 = vor.u32 %v7211_v17, %v6505_v43  ;;  %v7245_v43 = vld [vmem:[%s7873_s18 + $0x1c4] sm:$0xf] }
 0x5d9   : > { %v3774_v15 = vadd.f32 %v3773_v59, %v3760_v3  ;;  %v6585_v59 = vld [vmem:[%s7873_s18 + $0x158] sm:$0xf0]  ;;  %v7209_v3 = vld [vmem:[%s7873_s18 + $0xa4] sm:$0xf]  ;;  %v6668_v4 = vor.u32 %v7251_v53, %v6665_v54 }
 0x5da   : > { %v3919_v63 = vmax.f32 %v3800_v56, 0.0  ;;  %v6492_v56 = vor.u32 %v7207_v16, %v6489_v23  ;;  %v6625_v16 = vld [vmem:[%s7873_s18 + $0x1a8] sm:$0xf0] }
 0x5db   : > { %v3926_v39 = vmax.f32 %v3774_v15, 0.0  ;;  %4844 = vmatpush.bf16.msrb.mxu1 %v6532_v58  ;;  %v6497_v58 = vld [vmem:[%s7873_s18 + $0xa8] sm:$0xf0]  ;;  %v7229_v15 = vld [vmem:[%s7873_s18 + $0x144] sm:$0xf] }
 0x5dc   : > { %4832 = vmatpush.bf16.msrb.mxu0 %v6452_v51  ;;  %v6588_v51 = vor.u32 %v7231_v28, %v6585_v59  ;;  %v6500_v20 = vor.u32 %v7209_v3, %v6497_v58  ;;  %v6580_v26 = vor.u32 %v7229_v15, %v6577_v6  ;;  %v6721_v28 = vld [vmem:[%s7873_s18 + $0x268] sm:$0xf0]  ;;  %v7243_v3 = vld [vmem:[%s7873_s18 + $0x1b4] sm:$0xf]  ;;  %v6633_v58 = vld [vmem:[%s7873_s18 + $0x1b8] sm:$0xf0] }
 0x5dd   : > { %v9067_v31 = vpack.c.bf16 %v3926_v39, %v3918_v21  ;;  %v3787_v38 = vpop.f32.mrf.mxu2  ;;  %v3801_v25 = vpop.f32.mrf.mxu3  ;;  %v6660_v21 = vor.u32 %v7249_v9, %v6657_v10  ;;  %v7283_v10 = vld [vmem:[%s7873_s18 + $0x2f4] sm:$0xf]  ;;  %v6713_v15 = vld [vmem:[%s7873_s18 + $0x258] sm:$0xf0]  ;;  %v6636_v6 = vor.u32 %v7243_v3, %v6633_v58 }
 0x5de   : > { %v3788_v34 = vadd.f32 %v3787_v38, %v3047_v24  ;;  %v7191_v24 = vld [vmem:[%s7873_s18 + $0x14] sm:$0xf]  ;;  %v6569_v38 = vld [vmem:[%s7873_s18 + $0x138] sm:$0xf0] }
 0x5df   : > { %4753 = vmatmul.bf16.vlgmr.msrb.gmra.mxu2 %v9067_v31  ;;  %4845 = vmatpush.bf16.msrb.mxu1 %v6524_v12  ;;  %v3813_v49 = vpop.f32.mrf.mxu0  ;;  %v3827_v22 = vpop.f32.mrf.mxu1  ;;  %v6428_v7 = vor.u32 %v7191_v24, %v6425_v55  ;;  %v6420_v12 = vor.u32 %v7189_v8, %v6417_v11  ;;  %v6572_v17 = vor.u32 %v7227_v61, %v6569_v38  ;;  %v6561_v24 = vld [vmem:[%s7873_s18 + $0x128] sm:$0xf0]  ;;  %v7265_v55 = vld [vmem:[%s7873_s18 + $0x264] sm:$0xf]  ;;  %v6553_v8 = vld [vmem:[%s7873_s18 + $0x118] sm:$0xf0] }
 0x5e0   : > { %v3802_v47 = vadd.f32 %v3801_v25, %v3788_v34  ;;  %4833 = vmatpush.bf16.msrb.mxu0 %v6444_v30  ;;  %4857 = vmatpush.bf16.msrb.mxu2 %v6604_v48  ;;  %v3814_v13 = vadd.f32 %v3813_v49, %v3048_v41  ;;  %v7247_v30 = vld [vmem:[%s7873_s18 + $0x1d4] sm:$0xf]  ;;  %v7205_v34 = vld [vmem:[%s7873_s18 + $0x84] sm:$0xf]  ;;  %v6724_v9 = vor.u32 %v7265_v55, %v6721_v28  ;;  %v6769_v55 = vld [vmem:[%s7873_s18 + $0x2c8] sm:$0xf0] }
 0x5e1   : > { %v6652_v35 = vor.u32 %v7247_v30, %v6649_v29  ;;  %v7263_v11 = vld [vmem:[%s7873_s18 + $0x254] sm:$0xf]  ;;  %v7281_v30 = vld [vmem:[%s7873_s18 + $0x2e4] sm:$0xf]  ;;  %v6785_v29 = vld [vmem:[%s7873_s18 + $0x2e8] sm:$0xf0] }
 0x5e2   : > { %v3927_v0 = vmax.f32 %v3802_v47, 0.0  ;;  %v3828_v44 = vadd.f32 %v3827_v22, %v3814_v13  ;;  %v6641_v47 = vld [vmem:[%s7873_s18 + $0x1c8] sm:$0xf0]  ;;  %v6793_v13 = vld [vmem:[%s7873_s18 + $0x2f8] sm:$0xf0] }
 0x5e3   : > { %4846 = vmatpush.bf16.msrb.mxu1 %v6516_v40  ;;  %v7257_v28 = vld [vmem:[%s7873_s18 + $0x224] sm:$0xf]  ;;  %v7275_v58 = vld [vmem:[%s7873_s18 + $0x2b4] sm:$0xf] }
 0x5e4   : > { %v9084_v5 = vpack.c.bf16 %v3927_v0, %v3919_v63  ;;  %4834 = vmatpush.bf16.msrb.mxu0 %v6436_v50  ;;  %4858 = vmatpush.bf16.msrb.mxu2 %v6596_v52  ;;  %v3920_v49 = vmax.f32 %v3828_v44, 0.0  ;;  %v7225_v50 = vld [vmem:[%s7873_s18 + $0x124] sm:$0xf]  ;;  %v6732_v52 = vor.u32 %v7267_v32, %v6729_v33  ;;  %v6644_v63 = vor.u32 %v7245_v43, %v6641_v47  ;;  %v6609_v47 = vld [vmem:[%s7873_s18 + $0x188] sm:$0xf0] }
 0x5e5   : > { %v7261_v44 = vld [vmem:[%s7873_s18 + $0x244] sm:$0xf]  ;;  %v6788_v32 = vor.u32 %v7281_v30, %v6785_v29  ;;  %v3034_v33 = vperm.slane %v9047_v62, 4 }
 0x5e6   : > { %4767 = vmatmul.bf16.vlgmr.msrb.gmra.mxu3 %v9084_v5  ;;  %v7237_v43 = vld [vmem:[%s7873_s18 + $0x184] sm:$0xf] }
 0x5e7   : > { %4847 = vmatpush.bf16.msrb.mxu1 %v6508_v2  ;;  %4871 = vmatpush.bf16.msrb.mxu3 %v6668_v4  ;;  %v3815_v39 = vpop.f32.mrf.mxu0  ;;  %v3829_v25 = vpop.f32.mrf.mxu1  ;;  %v6564_v2 = vor.u32 %v7225_v50, %v6561_v24  ;;  %v3050_v24 = vperm.slane %v3034_v33, 0 }
 0x5e8   : > { %v3841_v18 = vpop.f32.mrf.mxu2  ;;  %v3855_v19 = vpop.f32.mrf.mxu3  ;;  %4835 = vmatpush.bf16.msrb.mxu0 %v6428_v7  ;;  %4859 = vmatpush.bf16.msrb.mxu2 %v6588_v51  ;;  %v3816_v48 = vadd.f32 %v3815_v39, %v3048_v41  ;;  %v6481_v41 = vld [vmem:[%s7873_s18 + $0x88] sm:$0xf0]  ;;  %v7223_v7 = vld [vmem:[%s7873_s18 + $0x114] sm:$0xf]  ;;  %v7221_v39 = vld [vmem:[%s7873_s18 + $0x104] sm:$0xf] }
 0x5e9   : > { %v3842_v40 = vadd.f32 %v3841_v18, %v3049_v42  ;;  %v6484_v59 = vor.u32 %v7205_v34, %v6481_v41  ;;  %v7279_v34 = vld [vmem:[%s7873_s18 + $0x2d4] sm:$0xf]  ;;  %v6697_v41 = vld [vmem:[%s7873_s18 + $0x238] sm:$0xf0] }
 0x5ea   : > { %v3830_v45 = vadd.f32 %v3829_v25, %v3816_v48  ;;  %v6705_v48 = vld [vmem:[%s7873_s18 + $0x248] sm:$0xf0]  ;;  %v7239_v25 = vld [vmem:[%s7873_s18 + $0x194] sm:$0xf] }
 0x5eb   : > { %4848 = vmatpush.bf16.msrb.mxu1 %v6500_v20  ;;  %4872 = vmatpush.bf16.msrb.mxu3 %v6660_v21  ;;  %v3856_v0 = vadd.f32 %v3855_v19, %v3842_v40  ;;  %v6556_v19 = vor.u32 %v7223_v7, %v6553_v8  ;;  %v7241_v20 = vld [vmem:[%s7873_s18 + $0x1a4] sm:$0xf]  ;;  %v6796_v21 = vor.u32 %v7283_v10, %v6793_v13  ;;  %v7259_v40 = vld [vmem:[%s7873_s18 + $0x234] sm:$0xf]  ;;  %v6681_v8 = vld [vmem:[%s7873_s18 + $0x218] sm:$0xf0] }
 0x5ec   : > { %4836 = vmatpush.bf16.msrb.mxu0 %v6420_v12  ;;  %4860 = vmatpush.bf16.msrb.mxu2 %v6580_v26  ;;  %v3928_v22 = vmax.f32 %v3830_v45, 0.0  ;;  %v6545_v12 = vld [vmem:[%s7873_s18 + $0x108] sm:$0xf0]  ;;  %v6716_v26 = vor.u32 %v7263_v11, %v6713_v15  ;;  %v6628_v61 = vor.u32 %v7241_v20, %v6625_v16  ;;  %v6617_v45 = vld [vmem:[%s7873_s18 + $0x198] sm:$0xf0] }
 0x5ed   : > { %v6548_v38 = vor.u32 %v7221_v39, %v6545_v12  ;;  %v7255_v7 = vld [vmem:[%s7873_s18 + $0x214] sm:$0xf]  ;;  %v6673_v20 = vld [vmem:[%s7873_s18 + $0x208] sm:$0xf0]  ;;  %v6857_v39 = vld [vmem:[%s7873_s18 + $0x378] sm:$0xf0] }
 0x5ee   : > { %v9107_v53 = vpack.c.bf16 %v3928_v22, %v3920_v49  ;;  %v6684_v15 = vor.u32 %v7255_v7, %v6681_v8  ;;  %v7291_v7 = vld [vmem:[%s7873_s18 + $0x334] sm:$0xf]  ;;  %v6825_v8 = vld [vmem:[%s7873_s18 + $0x338] sm:$0xf0] }
 0x5ef   : > { %4849 = vmatpush.bf16.msrb.mxu1 %v6492_v56  ;;  %4873 = vmatpush.bf16.msrb.mxu3 %v6652_v35  ;;  %v6708_v56 = vor.u32 %v7261_v44, %v6705_v48  ;;  %v6777_v35 = vld [vmem:[%s7873_s18 + $0x2d8] sm:$0xf0]  ;;  %v7271_v48 = vld [vmem:[%s7873_s18 + $0x294] sm:$0xf] }
 0x5f0   : > { %v3843_v54 = vpop.f32.mrf.mxu2  ;;  %4861 = vmatpush.bf16.msrb.mxu2 %v6572_v17  ;;  %v3857_v4 = vpop.f32.mrf.mxu3  ;;  %4781 = vmatmul.bf16.vlgmr.msra.gmra.mxu0 %v9107_v53  ;;  %v6620_v17 = vor.u32 %v7239_v25, %v6617_v45  ;;  %v6780_v50 = vor.u32 %v7279_v34, %v6777_v35 }
 0x5f1   : > { %v3844_v1 = vadd.f32 %v3843_v54, %v3049_v42  ;;  %4885 = vmatpush.bf16.msra.mxu0 %v6732_v52  ;;  %v3921_v42 = vmax.f32 %v3856_v0, 0.0  ;;  %v6700_v52 = vor.u32 %v7259_v40, %v6697_v41  ;;  %v7277_v54 = vld [vmem:[%s7873_s18 + $0x2c4] sm:$0xf]  ;;  %v3035_v0 = vperm.slane %v9047_v62, 6  ;;  %v6737_v41 = vld [vmem:[%s7873_s18 + $0x288] sm:$0xf0] }
 0x5f2   : > { %v7269_v40 = vld [vmem:[%s7873_s18 + $0x284] sm:$0xf] }
 0x5f3   : > { %v3858_v51 = vadd.f32 %v3857_v4, %v3844_v1  ;;  %4850 = vmatpush.bf16.msrb.mxu1 %v6484_v59  ;;  %4874 = vmatpush.bf16.msrb.mxu3 %v6644_v63  ;;  %v6689_v59 = vld [vmem:[%s7873_s18 + $0x228] sm:$0xf0]  ;;  %v6612_v63 = vor.u32 %v7237_v43, %v6609_v47  ;;  %v6772_v1 = vor.u32 %v7277_v54, %v6769_v55  ;;  %v6761_v4 = vld [vmem:[%s7873_s18 + $0x2b8] sm:$0xf0]  ;;  %v3051_v10 = vperm.slane %v3035_v0, 0 }
 0x5f4   : > { %4862 = vmatpush.bf16.msrb.mxu2 %v6564_v2  ;;  %v6692_v3 = vor.u32 %v7257_v28, %v6689_v59  ;;  %v6764_v62 = vor.u32 %v7275_v58, %v6761_v4  ;;  %v7315_v47 = vld [vmem:[%s7873_s18 + $0x3f4] sm:$0xf]  ;;  %v6740_v54 = vor.u32 %v7269_v40, %v6737_v41  ;;  %v6913_v0 = vld [vmem:[%s7873_s18 + $0x3e8] sm:$0xf0]  ;;  %v6905_v4 = vld [vmem:[%s7873_s18 + $0x3d8] sm:$0xf0] }
 0x5f5   : > { %v3929_v18 = vmax.f32 %v3858_v51, 0.0  ;;  %4886 = vmatpush.bf16.msra.mxu0 %v6724_v9  ;;  %v7311_v58 = vld [vmem:[%s7873_s18 + $0x3d4] sm:$0xf] }
 0x5f7   : > { %v9124_v23 = vpack.c.bf16 %v3929_v18, %v3921_v42  ;;  %4875 = vmatpush.bf16.msrb.mxu3 %v6636_v6  ;;  %v7273_v6 = vld [vmem:[%s7873_s18 + $0x2a4] sm:$0xf]  ;;  %v6753_v42 = vld [vmem:[%s7873_s18 + $0x2a8] sm:$0xf0] }
 0x5f8   : > { %4863 = vmatpush.bf16.msrb.mxu2 %v6556_v19  ;;  %v7253_v19 = vld [vmem:[%s7873_s18 + $0x204] sm:$0xf] }
 0x5f9   : > { %4795 = vmatmul.bf16.vlgmr.msra.gmra.mxu1 %v9124_v23  ;;  %4887 = vmatpush.bf16.msra.mxu0 %v6716_v26  ;;  %v6756_v26 = vor.u32 %v7273_v6, %v6753_v42  ;;  %v6676_v44 = vor.u32 %v7253_v19, %v6673_v20  ;;  %v6889_v6 = vld [vmem:[%s7873_s18 + $0x3b8] sm:$0xf0]  ;;  %v7287_v42 = vld [vmem:[%s7873_s18 + $0x314] sm:$0xf] }
 0x5fa   : > { %4899 = vmatpush.bf16.msra.mxu1 %v6796_v21  ;;  %v7299_v21 = vld [vmem:[%s7873_s18 + $0x374] sm:$0xf] }
 0x5fb   : > { %4876 = vmatpush.bf16.msrb.mxu3 %v6628_v61  ;;  %v6745_v61 = vld [vmem:[%s7873_s18 + $0x298] sm:$0xf0] }
 0x5fc   : > { %4864 = vmatpush.bf16.msrb.mxu2 %v6548_v38  ;;  %v6860_v38 = vor.u32 %v7299_v21, %v6857_v39  ;;  %v6748_v34 = vor.u32 %v7271_v48, %v6745_v61  ;;  %v6881_v21 = vld [vmem:[%s7873_s18 + $0x3a8] sm:$0xf0]  ;;  %v7285_v39 = vld [vmem:[%s7873_s18 + $0x304] sm:$0xf] }
 0x5fd   : > { %4888 = vmatpush.bf16.msra.mxu0 %v6708_v56  ;;  %v7301_v48 = vld [vmem:[%s7873_s18 + $0x384] sm:$0xf]  ;;  %v6865_v61 = vld [vmem:[%s7873_s18 + $0x388] sm:$0xf0] }
 0x5fe   : > { %4900 = vmatpush.bf16.msra.mxu1 %v6788_v32  ;;  %v6849_v32 = vld [vmem:[%s7873_s18 + $0x368] sm:$0xf0] }
 0x5ff   : > { %v3869_v49 = vpop.f32.mrf.mxu0  ;;  %v3883_v22 = vpop.f32.mrf.mxu1  ;;  %4877 = vmatpush.bf16.msrb.mxu3 %v6620_v17 }
 0x600   : > { %4837 = vmatmul.bf16.vlgmr.msrb.gmra.mxu0 %v9023_v14  ;;  %v3870_v2 = vadd.f32 %v3869_v49, %v3050_v24  ;;  %v6921_v49 = vld [vmem:[%s7873_s18 + $0x3f8] sm:$0xf0] }
 0x601   : > { %4889 = vmatpush.bf16.msra.mxu0 %v6700_v52  ;;  %v6924_v55 = vor.u32 %v7315_v47, %v6921_v49 }
 0x602   : > { %4901 = vmatpush.bf16.msra.mxu1 %v6780_v50  ;;  %v3884_v13 = vadd.f32 %v3883_v22, %v3870_v2  ;;  %v7295_v22 = vld [vmem:[%s7873_s18 + $0x354] sm:$0xf]  ;;  %v6841_v50 = vld [vmem:[%s7873_s18 + $0x358] sm:$0xf0]  ;;  %v6833_v2 = vld [vmem:[%s7873_s18 + $0x348] sm:$0xf0] }
 0x603   : > { %4878 = vmatpush.bf16.msrb.mxu3 %v6612_v63  ;;  %v6844_v59 = vor.u32 %v7295_v22, %v6841_v50  ;;  %v7313_v63 = vld [vmem:[%s7873_s18 + $0x3e4] sm:$0xf] }
 0x604   : > { %v3922_v30 = vmax.f32 %v3884_v13, 0.0  ;;  %v6817_v13 = vld [vmem:[%s7873_s18 + $0x328] sm:$0xf0] }
 0x605   : > { %4890 = vmatpush.bf16.msra.mxu0 %v6692_v3 }
 0x606   : > { %4902 = vmatpush.bf16.msra.mxu1 %v6772_v1  ;;  %v7293_v1 = vld [vmem:[%s7873_s18 + $0x344] sm:$0xf] }
 0x607   : > { %v3897_v51 = vpop.f32.mrf.mxu2  ;;  %v3911_v9 = vpop.f32.mrf.mxu3  ;;  %v6836_v3 = vor.u32 %v7293_v1, %v6833_v2 }
 0x608   : > { %v3871_v14 = vpop.f32.mrf.mxu0  ;;  %v3885_v18 = vpop.f32.mrf.mxu1  ;;  %v3898_v12 = vadd.f32 %v3897_v51, %v3051_v10  ;;  %v6908_v51 = vor.u32 %v7311_v58, %v6905_v4 }
 0x609   : > { %v3872_v11 = vadd.f32 %v3871_v14, %v3050_v24  ;;  %4851 = vmatmul.bf16.vlgmr.msrb.gmra.mxu1 %v9039_v46  ;;  %4891 = vmatpush.bf16.msra.mxu0 %v6684_v15  ;;  %v7297_v46 = vld [vmem:[%s7873_s18 + $0x364] sm:$0xf]  ;;  %v6897_v14 = vld [vmem:[%s7873_s18 + $0x3c8] sm:$0xf0]  ;;  %v7307_v15 = vld [vmem:[%s7873_s18 + $0x3b4] sm:$0xf] }
 0x60a   : > { %4903 = vmatpush.bf16.msra.mxu1 %v6764_v62  ;;  %v3912_v33 = vadd.f32 %v3911_v9, %v3898_v12  ;;  %v6852_v43 = vor.u32 %v7297_v46, %v6849_v32  ;;  %v6828_v9 = vor.u32 %v7291_v7, %v6825_v8  ;;  %v7289_v62 = vld [vmem:[%s7873_s18 + $0x324] sm:$0xf]  ;;  %v6892_v19 = vor.u32 %v7307_v15, %v6889_v6  ;;  %v6801_v12 = vld [vmem:[%s7873_s18 + $0x308] sm:$0xf0] }
 0x60b   : > { %v3886_v16 = vadd.f32 %v3885_v18, %v3872_v11  ;;  %v6820_v11 = vor.u32 %v7289_v62, %v6817_v13  ;;  %v6809_v18 = vld [vmem:[%s7873_s18 + $0x318] sm:$0xf0] }
 0x60c   : > { %v3923_v24 = vmax.f32 %v3912_v33, 0.0  ;;  %v6812_v20 = vor.u32 %v7287_v42, %v6809_v18 }
 0x60d   : > { %v3930_v29 = vmax.f32 %v3886_v16, 0.0  ;;  %4892 = vmatpush.bf16.msra.mxu0 %v6676_v44  ;;  %v7305_v16 = vld [vmem:[%s7873_s18 + $0x3a4] sm:$0xf] }
 0x60e   : > { %4904 = vmatpush.bf16.msra.mxu1 %v6756_v26  ;;  %v6804_v26 = vor.u32 %v7285_v39, %v6801_v12 }
 0x60f   : > { %v9159_v25 = vpack.c.bf16 %v3930_v29, %v3922_v30  ;;  %v3899_v45 = vpop.f32.mrf.mxu2  ;;  %v3913_v35 = vpop.f32.mrf.mxu3  ;;  %v7303_v30 = vld [vmem:[%s7873_s18 + $0x394] sm:$0xf]  ;;  %v6873_v29 = vld [vmem:[%s7873_s18 + $0x398] sm:$0xf0] }
 0x610   : > { %v3900_v56 = vadd.f32 %v3899_v45, %v3051_v10  ;;  %4893 = vmatmul.bf16.vlgmr.msra.gmra.mxu0 %v9107_v53  ;;  %v6916_v53 = vor.u32 %v7313_v63, %v6913_v0  ;;  %v7309_v10 = vld [vmem:[%s7873_s18 + $0x3c4] sm:$0xf]  ;;  %v6876_v44 = vor.u32 %v7303_v30, %v6873_v29 }
 0x611   : > { %4809 = vmatmul.bf16.vlgmr.msra.gmra.mxu2 %v9159_v25 }
 0x612   : > { %v3914_v17 = vadd.f32 %v3913_v35, %v3900_v56  ;;  %4913 = vmatpush.bf16.msra.mxu2 %v6860_v38  ;;  %4905 = vmatpush.bf16.msra.mxu1 %v6748_v34  ;;  %v6868_v38 = vor.u32 %v7301_v48, %v6865_v61 }
 0x614   : > { %v3931_v52 = vmax.f32 %v3914_v17, 0.0 }
 0x616   : > { %v3939_v28 = vpack.c.bf16 %v3931_v52, %v3923_v24  ;;  %4914 = vmatpush.bf16.msra.mxu2 %v6852_v43  ;;  %4906 = vmatpush.bf16.msra.mxu1 %v6740_v54 }
 0x618   : > { %4823 = vmatmul.bf16.vlgmr.msra.gmra.mxu3 %v3939_v28 }
 0x619   : > { %4927 = vmatpush.bf16.msra.mxu3 %v6924_v55  ;;  %4907 = vmatmul.bf16.vlgmr.msra.gmra.mxu1 %v9124_v23  ;;  %v6900_v23 = vor.u32 %v7309_v10, %v6897_v14 }
 0x61a   : > { %4915 = vmatpush.bf16.msra.mxu2 %v6844_v59 }
 0x61d   : > { %4928 = vmatpush.bf16.msra.mxu3 %v6916_v53 }
 0x61e   : > { %4916 = vmatpush.bf16.msra.mxu2 %v6836_v3 }
 0x621   : > { %4929 = vmatpush.bf16.msra.mxu3 %v6908_v51  ;;  %4865 = vmatmul.bf16.vlgmr.msrb.gmra.mxu2 %v9067_v31  ;;  %v6884_v31 = vor.u32 %v7305_v16, %v6881_v21 }
 0x622   : > { %4917 = vmatpush.bf16.msra.mxu2 %v6828_v9 }
 0x625   : > { %4930 = vmatpush.bf16.msra.mxu3 %v6900_v23 }
 0x626   : > { %4918 = vmatpush.bf16.msra.mxu2 %v6820_v11 }
 0x628   : > { %4879 = vmatmul.bf16.vlgmr.msrb.gmra.mxu3 %v9084_v5 }
 0x629   : > { %4931 = vmatpush.bf16.msra.mxu3 %v6892_v19 }
 0x62a   : > { %4919 = vmatpush.bf16.msra.mxu2 %v6812_v20 }
 0x62d   : > { %4932 = vmatpush.bf16.msra.mxu3 %v6884_v31 }
 0x62e   : > { %4920 = vmatpush.bf16.msra.mxu2 %v6804_v26 }
 0x631   : > { %4933 = vmatpush.bf16.msra.mxu3 %v6876_v44  ;;  %4921 = vmatmul.bf16.vlgmr.msra.gmra.mxu2 %v9159_v25  ;;  %v4068_v25 = vld [vmem:[%s794_s2] sm:$0x3] }
 0x632   : > { %v4069_v24 = vunpack.c.l.bf16 %v4068_v25 }
 0x634   : > { %v4072_v54 = vperm.slane %v4069_v24, 2 }
 0x635   : > { %4934 = vmatpush.bf16.msra.mxu3 %v6868_v38 }
 0x636   : > { %v4076_v63 = vperm.slane %v4072_v54, 0 }
 0x638   : > { %4935 = vmatmul.bf16.vlgmr.msra.gmra.mxu3 %v3939_v28  ;;  %v4071_v28 = vperm.slane %v4069_v24, 0 }
 0x63a   : > { %v4075_v1 = vperm.slane %v4071_v28, 0 }
 0x64c   : > { %v4726_v45 = vpop.f32.mrf.mxu0 }
 0x64d   : > { %v4727_v58 = vadd.f32 %v4726_v45, %v4075_v1 }
 0x653   : > { %v4740_v5 = vpop.f32.mrf.mxu1 }
 0x654   : > { %v4728_v46 = vpop.f32.mrf.mxu0  ;;  %v4741_v8 = vadd.f32 %v4740_v5, %v4727_v58 }
 0x655   : > { %v4729_v11 = vadd.f32 %v4728_v46, %v4075_v1 }
 0x65b   : > { %v4742_v33 = vpop.f32.mrf.mxu1 }
 0x65c   : > { %v4743_v20 = vadd.f32 %v4742_v33, %v4729_v11 }
 0x662   : > { %v4754_v32 = vpop.f32.mrf.mxu2 }
 0x663   : > { %v4755_v9 = vadd.f32 %v4754_v32, %v4741_v8 }
 0x669   : > { %v4768_v56 = vpop.f32.mrf.mxu3 }
 0x66a   : > { %v4756_v35 = vpop.f32.mrf.mxu2  ;;  %v4769_v62 = vadd.f32 %v4768_v56, %v4755_v9 }
 0x66b   : > { %v4757_v39 = vadd.f32 %v4756_v35, %v4743_v20 }
 0x66d   : > { %v4782_v34 = vpop.f32.mrf.mxu0 }
 0x66e   : > { %v4783_v15 = vadd.f32 %v4782_v34, %v4769_v62 }
 0x671   : > { %v4770_v41 = vpop.f32.mrf.mxu3 }
 0x672   : > { %v4771_v30 = vadd.f32 %v4770_v41, %v4757_v39 }
 0x675   : > { %v4784_v17 = vpop.f32.mrf.mxu0 }
 0x676   : > { %v4796_v40 = vpop.f32.mrf.mxu1  ;;  %v4785_v38 = vadd.f32 %v4784_v17, %v4771_v30 }
 0x677   : > { %v4797_v16 = vadd.f32 %v4796_v40, %v4783_v15 }
 0x67d   : > { %v4838_v50 = vpop.f32.mrf.mxu0 }
 0x67e   : > { %v4798_v47 = vpop.f32.mrf.mxu1  ;;  %v4839_v2 = vadd.f32 %v4838_v50, %v4076_v63 }
 0x67f   : > { %v4799_v46 = vadd.f32 %v4798_v47, %v4785_v38  ;;  %v7450_v38 = vld [vmem:[#allocation2 + $0x10] sm:$0xff] }
 0x685   : > { %v4840_v0 = vpop.f32.mrf.mxu0 }
 0x686   : > { %v4852_v52 = vpop.f32.mrf.mxu1  ;;  %v4841_v13 = vadd.f32 %v4840_v0, %v4076_v63 }
 0x687   : > { %v4853_v4 = vadd.f32 %v4852_v52, %v4839_v2 }
 0x68d   : > { %v4894_v14 = vpop.f32.mrf.mxu0 }
 0x68e   : > { %v4854_v53 = vpop.f32.mrf.mxu1 }
 0x68f   : > { %v4855_v6 = vadd.f32 %v4854_v53, %v4841_v13  ;;  %v4945_v13 = vld [vmem:[%s798_s8] sm:$0x3] }
 0x694   : > { %v4810_v43 = vpop.f32.mrf.mxu2 }
 0x695   : > { %v4811_v12 = vadd.f32 %v4810_v43, %v4797_v16  ;;  %v4896_v48 = vpop.f32.mrf.mxu0 }
 0x696   : > { %v4908_v18 = vpop.f32.mrf.mxu1 }
 0x69b   : > { %v4824_v49 = vpop.f32.mrf.mxu3 }
 0x69c   : > { %v4812_v22 = vpop.f32.mrf.mxu2  ;;  %v4825_v29 = vadd.f32 %v4824_v49, %v4811_v12 }
 0x69d   : > { %v4813_v40 = vadd.f32 %v4812_v22, %v4799_v46 }
 0x69e   : > { %v4941_v32 = vadd.f32 %v4825_v29, %v8743_v36  ;;  %v4910_v33 = vpop.f32.mrf.mxu1 }
 0x6a3   : > { %v4826_v55 = vpop.f32.mrf.mxu3 }
 0x6a4   : > { %v4866_v59 = vpop.f32.mrf.mxu2  ;;  %v4827_v25 = vadd.f32 %v4826_v55, %v4813_v40 }
 0x6a5   : > { %v4867_v51 = vadd.f32 %v4866_v59, %v4853_v4 }
 0x6a6   : > { %v4943_v24 = vadd.f32 %v4827_v25, %v8747_v60 }
 0x6ab   : > { %v4880_v3 = vpop.f32.mrf.mxu3 }
 0x6ac   : > { %v4868_v7 = vpop.f32.mrf.mxu2  ;;  %v4881_v10 = vadd.f32 %v4880_v3, %v4867_v51 }
 0x6ad   : > { %v4869_v21 = vadd.f32 %v4868_v7, %v4855_v6  ;;  %v4946_v6 = vld [vmem:[%s802_s26] sm:$0x3] }
 0x6ae   : > { %v4895_v42 = vadd.f32 %v4894_v14, %v4881_v10  ;;  %v5007_v39 = vperm.slane %v4946_v6, 0  ;;  %v5008_v12 = vperm.slane %v4946_v6, 1 }
 0x6b0   : > { %v4909_v26 = vadd.f32 %v4908_v18, %v4895_v42  ;;  %v4998_v42 = vperm.slane %v4945_v13, 0  ;;  %v4999_v18 = vperm.slane %v4945_v13, 1 }
 0x6b3   : > { %v4882_v23 = vpop.f32.mrf.mxu3 }
 0x6b4   : > { %v4922_v19 = vpop.f32.mrf.mxu2  ;;  %v4883_v31 = vadd.f32 %v4882_v23, %v4869_v21 }
 0x6b5   : > { %v4923_v44 = vadd.f32 %v4922_v19, %v4909_v26 }
 0x6b6   : > { %v4897_v45 = vadd.f32 %v4896_v48, %v4883_v31 }
 0x6b8   : > { %v4911_v35 = vadd.f32 %v4910_v33, %v4897_v45 }
 0x6bb   : > { %v4936_v61 = vpop.f32.mrf.mxu3 }
 0x6bc   : > { %v4937_v5 = vadd.f32 %v4936_v61, %v4923_v44  ;;  %v4924_v34 = vpop.f32.mrf.mxu2 }
 0x6bd   : > { %v4925_v50 = vadd.f32 %v4924_v34, %v4911_v35 }
 0x6be   : > { %v4942_v56 = vadd.f32 %v4937_v5, %v8745_v37  ;;  %v7451_v5 = vld [vmem:[#allocation2] sm:$0xff] }
 0x6c0   : > { %v4947_v43 = vadd.f32 %v4942_v56, %v4941_v32 }
 0x6c2   : > { %4948 = vadd.xlane.f32.xlu0 %v4947_v43 }
 0x6c3   : > { %v4938_v41 = vpop.f32.mrf.mxu3 }
 0x6c4   : > { %v4939_v49 = vadd.f32 %v4938_v41, %v4925_v50  ;;  %v7452_v50 = vld [vmem:[#allocation2 + $0x18] sm:$0xff] }
 0x6c6   : > { %v4944_v17 = vadd.f32 %v4939_v49, %v8749_v27  ;;  %v7453_v49 = vld [vmem:[#allocation2 + $0x8] sm:$0xff] }
 0x6c8   : > { %v4950_v52 = vadd.f32 %v4944_v17, %v4943_v24 }
 0x6ca   : > { %4951 = vadd.xlane.f32.xlu1 %v4950_v52 }
 0x735   : > { %v4949_v47 = vpop.xlane.xlu0 %4948 }
 0x736   : > { %v4953_v36 = vmul.f32 %v4949_v47, %v8595_v57 }
 0x738   : > { %v4955_v37 = vsub.f32 %v4941_v32, %v4953_v36  ;;  %v4956_v54 = vsub.f32 %v4942_v56, %v4953_v36 }
 0x73a   : > { %v4959_v28 = vmul.f32 %v4955_v37, %v4955_v37  ;;  %v4960_v22 = vmul.f32 %v4956_v54, %v4956_v54 }
 0x73c   : > { %v4963_v59 = vadd.f32 %v4960_v22, %v4959_v28 }
 0x73d   : > { %v4952_v63 = vpop.xlane.xlu1 %4951 }
 0x73e   : > { %v4954_v55 = vmul.f32 %v4952_v63, %v8595_v57  ;;  %4964 = vadd.xlane.f32.xlu2 %v4963_v59 }
 0x740   : > { %v4957_v0 = vsub.f32 %v4943_v24, %v4954_v55  ;;  %v4958_v1 = vsub.f32 %v4944_v17, %v4954_v55 }
 0x742   : > { %v4961_v2 = vmul.f32 %v4957_v0, %v4957_v0  ;;  %v4962_v60 = vmul.f32 %v4958_v1, %v4958_v1 }
 0x744   : > { %v4966_v53 = vadd.f32 %v4962_v60, %v4961_v2 }
 0x746   : > { %4967 = vadd.xlane.f32.xlu0 %v4966_v53 }
 0x7b1   : > { %v4965_v27 = vpop.xlane.xlu2 %4964 }
 0x7b2   : > { %v4969_v3 = vmul.f32 %v4965_v27, %v8595_v57 }
 0x7b4   : > { %v4971_v58 = vadd.f32 1e-05, %v4969_v3 }
 0x7b6   : > { %7438 = vrsqrt.f32 %v4971_v58  ;;  %vm4979_vm12 = vweird.f32 %v4971_v58 }
 0x7b9   : > { %v4968_v4 = vpop.xlane.xlu0 %4967 }
 0x7ba   : > { %v4970_v7 = vmul.f32 %v4968_v4, %v8595_v57 }
 0x7bc   : > { %v7439_v8 = vpop.eup %7438  ;;  %v4972_v51 = vadd.f32 1e-05, %v4970_v7 }
 0x7bd   : > { %v4974_v9 = vmul.f32 %v7439_v8, %v4971_v58  ;;  %vm4980_vm11 = vweird.f32 %v7439_v8 }
 0x7be   : > { %7440 = vrsqrt.f32 %v4972_v51  ;;  %vm4981_vm13 = vmor %vm4979_vm12, %vm4980_vm11  ;;  %vm4989_vm15 = vweird.f32 %v4972_v51 }
 0x7bf   : > { %v4975_v10 = vmul.f32 %v7439_v8, %v4974_v9 }
 0x7c1   : > { %v4976_v14 = vmul.f32 0.5, %v4975_v10 }
 0x7c3   : > { %v4977_v62 = vsub.f32 1.5, %v4976_v14  ;;  %v5019_v14 = vld [vmem:[%s9336_s1] sm:$0x3] }
 0x7c4   : > { %v7441_v23 = vpop.eup %7440  ;;  %v5073_v6 = vperm.slane %v5019_v14, 1 }
 0x7c5   : > { %v4978_v11 = vmul.f32 %v7439_v8, %v4977_v62  ;;  %v4984_v15 = vmul.f32 %v7441_v23, %v4972_v51  ;;  %vm4990_vm14 = vweird.f32 %v7441_v23 }
 0x7c6   : > { %vm4991_vm1 = vmor %vm4989_vm15, %vm4990_vm14 }
 0x7c7   : > { %v4982_v19 = vsel %vm4981_vm13, %v7439_v8, %v4978_v11  ;;  %v4985_v20 = vmul.f32 %v7441_v23, %v4984_v15  ;;  %v5072_v15 = vperm.slane %v5019_v14, 0 }
 0x7c8   : > { %v4993_v16 = vmul.f32 %v4982_v19, %v4955_v37  ;;  %v4994_v21 = vmul.f32 %v4982_v19, %v4956_v54 }
 0x7c9   : > { %v4986_v31 = vmul.f32 0.5, %v4985_v20 }
 0x7ca   : > { %v5002_v26 = vmul.f32 %v4998_v42, %v4993_v16  ;;  %v5003_v30 = vmul.f32 %v4999_v18, %v4994_v21 }
 0x7cb   : > { %v4987_v29 = vsub.f32 1.5, %v4986_v31 }
 0x7cc   : > { %v5011_v44 = vadd.f32 %v5007_v39, %v5002_v26  ;;  %v5012_v48 = vadd.f32 %v5008_v12, %v5003_v30 }
 0x7cd   : > { %v4988_v61 = vmul.f32 %v7441_v23, %v4987_v29 }
 0x7ce   : > { %v5015_v45 = vadd.f32 %v7450_v38, %v5011_v44  ;;  %v5016_v46 = vadd.f32 %v7451_v5, %v5012_v48 }
 0x7cf   : > { %v4992_v32 = vsel %vm4991_vm1, %v7441_v23, %v4988_v61  ;;  %v5020_v23 = vld [vmem:[%s9337_s13] sm:$0x3] }
 0x7d0   : > { %v5021_v56 = vadd.f32 %v5016_v46, %v5015_v45  ;;  %v4995_v33 = vmul.f32 %v4992_v32, %v4957_v0  ;;  %v4996_v34 = vmul.f32 %v4992_v32, %v4958_v1  ;;  %v5081_v19 = vperm.slane %v5020_v23, 0 }
 0x7d1   : > { %v5082_v20 = vperm.slane %v5020_v23, 1 }
 0x7d2   : > { %5022 = vadd.xlane.f32.xlu1 %v5021_v56  ;;  %v5004_v40 = vmul.f32 %v4998_v42, %v4995_v33  ;;  %v5005_v35 = vmul.f32 %v4999_v18, %v4996_v34 }
 0x7d4   : > { %v5013_v43 = vadd.f32 %v5007_v39, %v5004_v40  ;;  %v5014_v25 = vadd.f32 %v5008_v12, %v5005_v35 }
 0x7d6   : > { %v5017_v41 = vadd.f32 %v7452_v50, %v5013_v43  ;;  %v5018_v24 = vadd.f32 %v7453_v49, %v5014_v25 }
 0x7d8   : > { %v5024_v17 = vadd.f32 %v5018_v24, %v5017_v41 }
 0x7da   : > { %5025 = vadd.xlane.f32.xlu2 %v5024_v17 }
 0x845   : > { %v5023_v52 = vpop.xlane.xlu1 %5022 }
 0x846   : > { %v5027_v47 = vmul.f32 %v5023_v52, %v8595_v57 }
 0x848   : > { %v5029_v36 = vsub.f32 %v5015_v45, %v5027_v47  ;;  %v5030_v37 = vsub.f32 %v5016_v46, %v5027_v47 }
 0x84a   : > { %v5033_v54 = vmul.f32 %v5029_v36, %v5029_v36  ;;  %v5034_v28 = vmul.f32 %v5030_v37, %v5030_v37 }
 0x84c   : > { %v5037_v22 = vadd.f32 %v5034_v28, %v5033_v54 }
 0x84d   : > { %v5026_v59 = vpop.xlane.xlu2 %5025 }
 0x84e   : > { %v5028_v63 = vmul.f32 %v5026_v59, %v8595_v57  ;;  %5038 = vadd.xlane.f32.xlu0 %v5037_v22 }
 0x850   : > { %v5031_v55 = vsub.f32 %v5017_v41, %v5028_v63  ;;  %v5032_v0 = vsub.f32 %v5018_v24, %v5028_v63 }
 0x852   : > { %v5035_v1 = vmul.f32 %v5031_v55, %v5031_v55  ;;  %v5036_v2 = vmul.f32 %v5032_v0, %v5032_v0 }
 0x854   : > { %v5040_v60 = vadd.f32 %v5036_v2, %v5035_v1 }
 0x856   : > { %5041 = vadd.xlane.f32.xlu1 %v5040_v60 }
 0x8c1   : > { %v5039_v53 = vpop.xlane.xlu0 %5038 }
 0x8c2   : > { %v5043_v27 = vmul.f32 %v5039_v53, %v8595_v57 }
 0x8c4   : > { %v5045_v3 = vadd.f32 1e-05, %v5043_v27 }
 0x8c6   : > { %7442 = vrsqrt.f32 %v5045_v3  ;;  %vm5053_vm4 = vweird.f32 %v5045_v3 }
 0x8c9   : > { %v5042_v58 = vpop.xlane.xlu1 %5041 }
 0x8ca   : > { %v5044_v4 = vmul.f32 %v5042_v58, %v8595_v57 }
 0x8cc   : > { %v7443_v7 = vpop.eup %7442  ;;  %v5046_v8 = vadd.f32 1e-05, %v5044_v4 }
 0x8cd   : > { %v5048_v51 = vmul.f32 %v7443_v7, %v5045_v3  ;;  %vm5054_vm3 = vweird.f32 %v7443_v7 }
 0x8ce   : > { %7444 = vrsqrt.f32 %v5046_v8  ;;  %vm5055_vm5 = vmor %vm5053_vm4, %vm5054_vm3  ;;  %vm5063_vm2 = vweird.f32 %v5046_v8 }
 0x8cf   : > { %v5049_v9 = vmul.f32 %v7443_v7, %v5048_v51 }
 0x8d1   : > { %v5050_v10 = vmul.f32 0.5, %v5049_v9 }
 0x8d3   : > { %v5051_v62 = vsub.f32 1.5, %v5050_v10 }
 0x8d4   : > { %v7445_v13 = vpop.eup %7444 }
 0x8d5   : > { %v5052_v11 = vmul.f32 %v7443_v7, %v5051_v62  ;;  %v5058_v57 = vmul.f32 %v7445_v13, %v5046_v8  ;;  %vm5064_vm0 = vweird.f32 %v7445_v13 }
 0x8d6   : > { %vm5065_vm6 = vmor %vm5063_vm2, %vm5064_vm0 }
 0x8d7   : > { %v5056_v42 = vsel %vm5055_vm5, %v7443_v7, %v5052_v11  ;;  %v5059_v18 = vmul.f32 %v7445_v13, %v5058_v57 }
 0x8d8   : > { %v5067_v16 = vmul.f32 %v5056_v42, %v5029_v36  ;;  %v5068_v21 = vmul.f32 %v5056_v42, %v5030_v37 }
 0x8d9   : > { %v5060_v39 = vmul.f32 0.5, %v5059_v18 }
 0x8da   : > { %v5076_v12 = vmul.f32 %v5072_v15, %v5067_v16  ;;  %v5077_v31 = vmul.f32 %v5073_v6, %v5068_v21 }
 0x8db   : > { %v5061_v26 = vsub.f32 1.5, %v5060_v39 }
 0x8dc   : > { %v5085_v30 = vadd.f32 %v5081_v19, %v5076_v12  ;;  %v5086_v29 = vadd.f32 %v5082_v20, %v5077_v31 }
 0x8dd   : > { %v5062_v44 = vmul.f32 %v7445_v13, %v5061_v26 }
 0x8de   : > { %5089 = vst [vmem:[#allocation2 + $0x10] sm:$0xff] %v5085_v30 }
 0x8df   : > { %5090 = vst [vmem:[#allocation2] sm:$0xff] %v5086_v29  ;;  %v5066_v48 = vsel %vm5065_vm6, %v7445_v13, %v5062_v44 }
 0x8e0   : > { %v5069_v61 = vmul.f32 %v5066_v48, %v5031_v55  ;;  %v5070_v38 = vmul.f32 %v5066_v48, %v5032_v0 }
 0x8e2   : > { %v5078_v45 = vmul.f32 %v5072_v15, %v5069_v61  ;;  %v5079_v5 = vmul.f32 %v5073_v6, %v5070_v38 }
 0x8e3   : > { %5096 = sbr.rel (%p6925_p3) target bundleno = 2290 (0x8f2), region = 104 }
 0x8e4   : > { %v5087_v46 = vadd.f32 %v5081_v19, %v5078_v45  ;;  %v5088_v32 = vadd.f32 %v5082_v20, %v5079_v5 }
 0x8e6   : > { %5091 = vst [vmem:[#allocation2 + $0x18] sm:$0xff] %v5087_v46 }
 0x8e7   : > { %5092 = vst [vmem:[#allocation2 + $0x8] sm:$0xff] %v5088_v32 }
 0x8e8   : > { %v5097_v56 = vld [vmem:[#allocation2 + $0x10] sm:$0xff]  ;;  %v5098_v33 = vld [vmem:[#allocation2] sm:$0xff] }
 0x8e9   : > { %v5101_v40 = vpack.c.bf16 %v5098_v33, %v5097_v56 }
 0x8eb   : > { %5103 = vst [vmem:[%s7925_s11] sm:$0xff] %v5101_v40 }
 0x8ed   : > { %v5099_v34 = vld [vmem:[#allocation2 + $0x18] sm:$0xff] }
 0x8ee   : > { %v5100_v35 = vld [vmem:[#allocation2 + $0x8] sm:$0xff] }
 0x8ef   : > { %v5102_v43 = vpack.c.bf16 %v5100_v35, %v5099_v34 }
 0x8f1   : > { %5104 = vst [vmem:[%s7925_s11 + $0x8] sm:$0xff] %v5102_v43 }
 0x8f2 PF: > { %s9338_s26 = sld [smem:[#allocation17_spill]] }
 0x8f3   : > { %s9339_s18 = sld [smem:[#allocation13_spill]] }
 0x8f4   : > { %s9340_s19 = sld [smem:[#allocation14_spill]] }
 0x8f5   : > { %s9341_s20 = sld [smem:[#allocation20_spill]] }
 0x8f6   : > { %s9342_s21 = sld [smem:[#allocation15_spill]] }
 0x8f7   : > { %s9343_s22 = sld [smem:[#allocation16_spill]] }
 0x8f8   : > { %s34_s25 = sadd.s32 1, %s9338_s26   ;;  %s9344_s23 = sld [smem:[#allocation18_spill]] }
 0x8f9   : > { %p31_p4 = scmp.ge.s32.totalorder %s34_s25, 6   ;;  %s9345_s24 = sld [smem:[#allocation19_spill]] }
 0x8fb   :  { %33 = sbr.rel (!%p31_p4) target bundleno = 26 (0x1a), region = 192 }
 0x900   :  { %5126 = vsyncpa [#allocation4], 1 }
 0x901   :  { %5128 = vsyncpa [#allocation4 + $0x1], 1 }
 0x902   :  { %5129 = vsyncpa [#allocation6], 1 }
 0x903   :  { %5131 = vsyncpa [#allocation6 + $0x1], 1 }
 0x904   :  { %5132 = vsyncpa [#allocation9], 1 }
 0x905   :  { %5134 = vsyncpa [#allocation9 + $0x1], 1 }

</bundles_post_ra>
